<compile_context>
chip_gen: v5e
topology: v5e:2x2
jax: 0.10.0
libtpu: 0.0.40
codegen_flags: <defaults>
</compile_context>

<pallas_src>
import functools

import jax
import jax.numpy as jnp
from jax.experimental import pallas as pl
from jax.experimental.pallas import tpu as pltpu

# ---- model hyperparameters (from Args / module definition) -------------------
NUM_MFCC = 13          # Conv1d in_channels
NUM_CLASSES = 2
CONV1_OUT = 16         # args.conv1_out_channels
CONV2_OUT = 8          # args.conv2_out_channels
HIDDEN = 60            # args.num_memory_cts
HIDDEN_PAD = 64        # per-gate lane padding (H=60 <= 64)
FC_IN = 600            # args.fc_in_size  => T = 10 LSTM steps
FC1_OUT = 256
FC2_OUT = 128
K1 = 4                 # conv1 kernel size
K2 = 2                 # conv2 kernel size
POOL = 8               # MaxPool1d kernel size
SEQ_LEN_IN = 84        # 84 -(k=4)-> 81 -(k=2)-> 80 -(pool 8)-> 10; 10*60 = 600


def _sigmoid(x):
    # exact sigmoid (approx reciprocal error compounds over the 10-step recurrence)
    return 1.0 / (1.0 + jnp.exp(-x))


def gender_classifier_kernel(
    xbig_ref,                        # (POOL*T*BP, K2*K1*Cin)  conv2-pair im2col, rows (j,t,b)
    w1bd_ref, b1d_ref,               # (K2*K1*Cin, K2*C1) block-diag conv1, (1, K2*C1)
    w2s_ref, b2_ref,                 # (K2*C1, C2) stacked conv2 taps, (1, C2)
    wih_ref, whh_ref, blstm_ref,     # (C2, 4*HP), (HP, 4*HP), (1, 4*HP)   gate-padded
    fw1_ref, fb1_ref,                # (T, HP, FC1) row-padded, (1, FC1)
    fw2_ref, fb2_ref,                # (FC1, FC2), (1, FC2)
    fw3_ref, fb3_ref,                # (FC2, NUM_CLASSES), (1, NUM_CLASSES)
    out_ref,                         # (BP, NUM_CLASSES)
    *, batch_pad,
):
    f32 = jnp.float32
    BP = batch_pad
    T, HP, FC1 = fw1_ref.shape
    G = T * BP                                           # rows per pool-tap slab

    # ---- Conv1d(k=4) + ReLU: ONE matmul (block-diag pair of conv1 windows) ----
    y1 = jnp.maximum(
        jnp.dot(xbig_ref[...], w1bd_ref[...].astype(f32),
                preferred_element_type=f32) + b1d_ref[...], 0.0)   # (8*G, 2*C1)

    # ---- Conv1d(k=2) + ReLU: ONE matmul (stacked taps), no shifts -------------
    s = jnp.maximum(
        jnp.dot(y1, w2s_ref[...].astype(f32),
                preferred_element_type=f32) + b2_ref[...], 0.0)    # (8*G, C2)

    # ---- MaxPool1d(8): pairwise-max tree over tile-aligned slabs --------------
    # rows are (j, t, b); slab j holds conv2 position 8t+j for every (t, b).
    m = s
    size = POOL
    while size > 1:
        half = (size // 2) * G
        m = jnp.maximum(m[:half, :], m[half:, :])
        size //= 2
    pooled = m                                           # (G, C2), row = t*BP + b

    # ---- LSTM input projection for all steps at once (biases folded in) -------
    xproj = (jnp.dot(pooled, wih_ref[...].astype(f32),
                     preferred_element_type=f32) + blstm_ref[...])  # (G, 4*HP)

    # ---- LSTM recurrence (64-lane gate blocks) with FC1 fused ------------------
    whh = whh_ref[...].astype(f32)                       # hoisted bf16->f32 convert
    h = jnp.zeros((BP, HP), f32)
    c = jnp.zeros((BP, HP), f32)
    z1 = jnp.zeros((BP, FC1), f32)
    for t in range(T):
        xt = xproj[t * BP:(t + 1) * BP, :]               # aligned 8-sublane tile slice
        gates = xt + jnp.dot(h, whh, preferred_element_type=f32)
        # PyTorch LSTM gate order: input, forget, cell, output
        i_g = _sigmoid(gates[:, 0:HP])
        f_g = _sigmoid(gates[:, HP:2 * HP])
        g_g = jnp.tanh(gates[:, 2 * HP:3 * HP])
        o_g = _sigmoid(gates[:, 3 * HP:4 * HP])
        c = f_g * c + i_g * g_g
        h = o_g * jnp.tanh(c)
        # fused FC1 accumulation (padded rows of fw1 are zero); off the h/c chain
        z1 = z1 + jnp.dot(h.astype(fw1_ref.dtype), fw1_ref[t],
                          preferred_element_type=f32)

    # ---- FC head + Softmax(dim=1) ----------------------------------------------
    z1 = z1 + fb1_ref[...]
    z2 = jnp.dot(z1, fw2_ref[...].astype(f32),
                 preferred_element_type=f32) + fb2_ref[...]
    z3 = jnp.dot(z2, fw3_ref[...], preferred_element_type=f32) + fb3_ref[...]
    z3 = z3 - jnp.max(z3, axis=1, keepdims=True)
    e = jnp.exp(z3)
    out_ref[...] = e / jnp.sum(e, axis=1, keepdims=True)


def init_params(key):
    """Deterministic PyTorch-style uniform(-1/sqrt(fan_in), 1/sqrt(fan_in)) init,
    pre-transposed / block-packed / gate-padded for the kernel."""
    ks = jax.random.split(key, 14)

    def u(k, shape, fan_in):
        bound = 1.0 / (fan_in ** 0.5)
        return jax.random.uniform(k, shape, jnp.float32, -bound, bound)

    w1 = u(ks[0], (CONV1_OUT, NUM_MFCC, K1), NUM_MFCC * K1)
    b1 = u(ks[1], (1, CONV1_OUT), NUM_MFCC * K1)
    w2 = u(ks[2], (CONV2_OUT, CONV1_OUT, K2), CONV1_OUT * K2)
    b2 = u(ks[3], (1, CONV2_OUT), CONV1_OUT * K2)
    wih = u(ks[4], (4 * HIDDEN, CONV2_OUT), HIDDEN)      # PyTorch (4H, in)
    whh = u(ks[5], (4 * HIDDEN, HIDDEN), HIDDEN)         # PyTorch (4H, H)
    bih = u(ks[6], (1, 4 * HIDDEN), HIDDEN)
    bhh = u(ks[7], (1, 4 * HIDDEN), HIDDEN)
    fw1 = u(ks[8], (FC1_OUT, FC_IN), FC_IN)
    fb1 = u(ks[9], (1, FC1_OUT), FC_IN)
    fw2 = u(ks[10], (FC2_OUT, FC1_OUT), FC1_OUT)
    fb2 = u(ks[11], (1, FC2_OUT), FC1_OUT)
    fw3 = u(ks[12], (NUM_CLASSES, FC2_OUT), FC2_OUT)
    fb3 = u(ks[13], (1, NUM_CLASSES), FC2_OUT)

    H, HP = HIDDEN, HIDDEN_PAD
    T = FC_IN // HIDDEN
    bf16 = jnp.bfloat16
    F1 = K1 * NUM_MFCC                                   # 52 im2col features per window

    # conv1 im2col weight (52, 16), rows ordered (k, cin)
    w1i = jnp.transpose(w1, (2, 1, 0)).reshape(F1, CONV1_OUT)
    # block-diagonal over the two conv2 taps -> single conv1 matmul per conv2 position
    w1bd = jnp.zeros((K2 * F1, K2 * CONV1_OUT), jnp.float32)
    w1bd = w1bd.at[:F1, :CONV1_OUT].set(w1i).at[F1:, CONV1_OUT:].set(w1i)
    b1d = jnp.concatenate([b1, b1], axis=1)              # (1, 32)
    # conv2 stacked-tap weight (32, 8), rows ordered (k, c1)
    w2s = jnp.transpose(w2, (2, 1, 0)).reshape(K2 * CONV1_OUT, CONV2_OUT)

    def pad_gate_cols(m):
        # (rows, 4H) -> (rows, 4*HP), gate g placed at lanes [g*HP, g*HP+H)
        out = jnp.zeros((m.shape[0], 4 * HP), jnp.float32)
        for g in range(4):
            out = out.at[:, g * HP:g * HP + H].set(m[:, g * H:(g + 1) * H])
        return out

    wih_p = pad_gate_cols(jnp.transpose(wih))                          # (C2, 4HP)
    whh_p = jnp.zeros((HP, 4 * HP), jnp.float32).at[:H, :].set(
        pad_gate_cols(jnp.transpose(whh)))                             # (HP, 4HP)
    blstm_p = pad_gate_cols(bih + bhh)                                 # (1, 4HP)

    fw1t = jnp.transpose(fw1)                                          # (600, 256)
    fw1_p = jnp.zeros((T, HP, FC1_OUT), jnp.float32).at[:, :H, :].set(
        fw1t.reshape(T, H, FC1_OUT))                                   # (T, HP, 256)

    return dict(
        w1bd=w1bd.astype(bf16), b1d=b1d,
        w2s=w2s.astype(bf16), b2=b2,
        wih_p=wih_p.astype(bf16), whh_p=whh_p.astype(bf16), blstm_p=blstm_p,
        fw1_p=fw1_p.astype(bf16), fb1=fb1,
        fw2t=jnp.transpose(fw2).astype(bf16), fb2=fb2,                 # (256, 128)
        fw3t=jnp.transpose(fw3), fb3=fb3,                              # (128, 2)
    )


def gender_classifier_forward(x_ncl, params):
    """x_ncl: (B, NUM_MFCC, L) exactly like the PyTorch forward input."""
    B, C, L = x_ncl.shape
    assert C == NUM_MFCC
    L1 = L - K1 + 1                                      # conv1 output length (81)
    L2 = L1 - K2 + 1                                     # conv2 output length (80)
    T = L2 // POOL                                       # LSTM steps (10)
    assert T * HIDDEN == FC_IN, "sequence length inconsistent with fc_in_size"

    BP = max(8, ((B + 7) // 8) * 8)                      # sublane-aligned padded batch
    F = K2 * K1 * NUM_MFCC                               # 104 pair-im2col features

    x_blc = jnp.transpose(x_ncl, (0, 2, 1)).astype(jnp.float32)        # (B, L, Cin)
    # conv1 im2col for positions 0..L1-1, features ordered (k, cin)
    im2col = jnp.concatenate([x_blc[:, k:k + L1, :] for k in range(K1)],
                             axis=-1)                                  # (B, L1, 52)
    # conv2-window pair features for positions 0..L2-1
    pair = jnp.concatenate([im2col[:, 0:L2, :], im2col[:, 1:1 + L2, :]],
                           axis=-1)                                    # (B, L2, 104)
    # row ordering (j, t, b): slab j holds conv2 position 8t+j for every (t, b);
    # batch padded to BP so every pool window / time step is an aligned tile.
    pair = pair.reshape(B, T, POOL, F)                                 # (B, T, 8, F)
    pair = jnp.transpose(pair, (2, 1, 0, 3))                           # (8, T, B, F)
    pair = jnp.pad(pair, ((0, 0), (0, 0), (0, BP - B), (0, 0)))        # (8, T, BP, F)
    x_big = pair.reshape(POOL * T * BP, F)                             # (8*T*BP, 104)

    inputs = (
        x_big,
        params["w1bd"], params["b1d"], params["w2s"], params["b2"],
        params["wih_p"], params["whh_p"], params["blstm_p"],
        params["fw1_p"], params["fb1"], params["fw2t"], params["fb2"],
        params["fw3t"], params["fb3"],
    )
    out = pl.pallas_call(
        functools.partial(gender_classifier_kernel, batch_pad=BP),
        out_shape=jax.ShapeDtypeStruct((BP, NUM_CLASSES), jnp.float32),
        in_specs=[pl.BlockSpec(memory_space=pltpu.MemorySpace.VMEM)] * len(inputs),
        out_specs=pl.BlockSpec(memory_space=pltpu.MemorySpace.VMEM),
    )(*inputs)
    return out[:B]


if __name__ == "__main__":
    key = jax.random.PRNGKey(0)
    k_x, k_p = jax.random.split(key)

    B = 2
    # PyTorch Conv1d input layout: (batch, channels=NUM_MFCC, length)
    x = jax.random.normal(k_x, (B, NUM_MFCC, SEQ_LEN_IN), jnp.float32)

    params = init_params(k_p)
    probs = gender_classifier_forward(x, params)
    probs = jax.block_until_ready(probs)

    assert probs.shape == (B, NUM_CLASSES)
    row_sums = jnp.sum(probs, axis=1)
    assert bool(jnp.all(jnp.abs(row_sums - 1.0) < 1e-4)), row_sums
    print("KERNEL_OK")
</pallas_src>

<mosaic_0001>
module attributes {stable_mosaic.version = 11 : i64} {
  func.func @gender_classifier_kernel(%arg0: memref<640x104xf32, #tpu.memory_space<vmem>>, %arg1: memref<104x32xbf16, #tpu.memory_space<vmem>>, %arg2: memref<1x32xf32, #tpu.memory_space<vmem>>, %arg3: memref<32x8xbf16, #tpu.memory_space<vmem>>, %arg4: memref<1x8xf32, #tpu.memory_space<vmem>>, %arg5: memref<8x256xbf16, #tpu.memory_space<vmem>>, %arg6: memref<64x256xbf16, #tpu.memory_space<vmem>>, %arg7: memref<1x256xf32, #tpu.memory_space<vmem>>, %arg8: memref<10x64x256xbf16, #tpu.memory_space<vmem>>, %arg9: memref<1x256xf32, #tpu.memory_space<vmem>>, %arg10: memref<256x128xbf16, #tpu.memory_space<vmem>>, %arg11: memref<1x128xf32, #tpu.memory_space<vmem>>, %arg12: memref<128x2xf32, #tpu.memory_space<vmem>>, %arg13: memref<1x2xf32, #tpu.memory_space<vmem>>, %arg14: memref<8x2xf32, #tpu.memory_space<vmem>>) attributes {dimension_semantics = [], scalar_prefetch = 0 : i64, scratch_operands = 0 : i64, tpu.core_type = #tpu.core_type<tc>} {
    %c0 = arith.constant 0 : index
    %c0_0 = arith.constant 0 : index
    %0 = vector.load %arg0[%c0, %c0_0] : memref<640x104xf32, #tpu.memory_space<vmem>>, vector<640x104xf32>
    %c0_1 = arith.constant 0 : index
    %c0_2 = arith.constant 0 : index
    %1 = vector.load %arg1[%c0_1, %c0_2] : memref<104x32xbf16, #tpu.memory_space<vmem>>, vector<104x32xbf16>
    %2 = arith.extf %1 : vector<104x32xbf16> to vector<104x32xf32>
    %cst = arith.constant dense<0.000000e+00> : vector<640x32xf32>
    %3 = tpu.matmul %0, %2, %cst {dimension_numbers = #tpu.dot_dimension_numbers<[1], [0], [0], [1], [0, 0, 1, 1], [], []>} : vector<640x104xf32>, vector<104x32xf32>, vector<640x32xf32> -> vector<640x32xf32>
    %c0_3 = arith.constant 0 : index
    %c0_4 = arith.constant 0 : index
    %4 = vector.load %arg2[%c0_3, %c0_4] : memref<1x32xf32, #tpu.memory_space<vmem>>, vector<1x32xf32>
    %5 = vector.broadcast %4 : vector<1x32xf32> to vector<640x32xf32>
    %6 = arith.addf %3, %5 : vector<640x32xf32>
    %cst_5 = arith.constant 0.000000e+00 : f32
    %7 = vector.broadcast %cst_5 : f32 to vector<640x32xf32>
    %8 = arith.maximumf %6, %7 : vector<640x32xf32>
    %c0_6 = arith.constant 0 : index
    %c0_7 = arith.constant 0 : index
    %9 = vector.load %arg3[%c0_6, %c0_7] : memref<32x8xbf16, #tpu.memory_space<vmem>>, vector<32x8xbf16>
    %10 = arith.extf %9 : vector<32x8xbf16> to vector<32x8xf32>
    %cst_8 = arith.constant dense<0.000000e+00> : vector<640x8xf32>
    %11 = tpu.matmul %8, %10, %cst_8 {dimension_numbers = #tpu.dot_dimension_numbers<[1], [0], [0], [1], [0, 0, 1, 1], [], []>} : vector<640x32xf32>, vector<32x8xf32>, vector<640x8xf32> -> vector<640x8xf32>
    %c0_9 = arith.constant 0 : index
    %c0_10 = arith.constant 0 : index
    %12 = vector.load %arg4[%c0_9, %c0_10] : memref<1x8xf32, #tpu.memory_space<vmem>>, vector<1x8xf32>
    %13 = vector.broadcast %12 : vector<1x8xf32> to vector<640x8xf32>
    %14 = arith.addf %11, %13 : vector<640x8xf32>
    %cst_11 = arith.constant 0.000000e+00 : f32
    %15 = vector.broadcast %cst_11 : f32 to vector<640x8xf32>
    %16 = arith.maximumf %14, %15 : vector<640x8xf32>
    %17 = vector.extract_strided_slice %16 {offsets = [0, 0], sizes = [320, 8], strides = [1, 1]} : vector<640x8xf32> to vector<320x8xf32>
    %18 = vector.extract_strided_slice %16 {offsets = [320, 0], sizes = [320, 8], strides = [1, 1]} : vector<640x8xf32> to vector<320x8xf32>
    %19 = arith.maximumf %17, %18 : vector<320x8xf32>
    %20 = vector.extract_strided_slice %19 {offsets = [0, 0], sizes = [160, 8], strides = [1, 1]} : vector<320x8xf32> to vector<160x8xf32>
    %21 = vector.extract_strided_slice %19 {offsets = [160, 0], sizes = [160, 8], strides = [1, 1]} : vector<320x8xf32> to vector<160x8xf32>
    %22 = arith.maximumf %20, %21 : vector<160x8xf32>
    %23 = vector.extract_strided_slice %22 {offsets = [0, 0], sizes = [80, 8], strides = [1, 1]} : vector<160x8xf32> to vector<80x8xf32>
    %24 = vector.extract_strided_slice %22 {offsets = [80, 0], sizes = [80, 8], strides = [1, 1]} : vector<160x8xf32> to vector<80x8xf32>
    %25 = arith.maximumf %23, %24 : vector<80x8xf32>
    %c0_12 = arith.constant 0 : index
    %c0_13 = arith.constant 0 : index
    %26 = vector.load %arg5[%c0_12, %c0_13] : memref<8x256xbf16, #tpu.memory_space<vmem>>, vector<8x256xbf16>
    %27 = arith.extf %26 : vector<8x256xbf16> to vector<8x256xf32>
    %cst_14 = arith.constant dense<0.000000e+00> : vector<80x256xf32>
    %28 = tpu.matmul %25, %27, %cst_14 {dimension_numbers = #tpu.dot_dimension_numbers<[1], [0], [0], [1], [0, 0, 1, 1], [], []>} : vector<80x8xf32>, vector<8x256xf32>, vector<80x256xf32> -> vector<80x256xf32>
    %c0_15 = arith.constant 0 : index
    %c0_16 = arith.constant 0 : index
    %29 = vector.load %arg7[%c0_15, %c0_16] : memref<1x256xf32, #tpu.memory_space<vmem>>, vector<1x256xf32>
    %30 = vector.broadcast %29 : vector<1x256xf32> to vector<80x256xf32>
    %31 = arith.addf %28, %30 : vector<80x256xf32>
    %c0_17 = arith.constant 0 : index
    %c0_18 = arith.constant 0 : index
    %32 = vector.load %arg6[%c0_17, %c0_18] : memref<64x256xbf16, #tpu.memory_space<vmem>>, vector<64x256xbf16>
    %33 = arith.extf %32 : vector<64x256xbf16> to vector<64x256xf32>
    %cst_19 = arith.constant 0.000000e+00 : f32
    %34 = vector.broadcast %cst_19 : f32 to vector<8x64xf32>
    %cst_20 = arith.constant 0.000000e+00 : f32
    %35 = vector.broadcast %cst_20 : f32 to vector<8x64xf32>
    %cst_21 = arith.constant 0.000000e+00 : f32
    %36 = vector.broadcast %cst_21 : f32 to vector<8x256xf32>
    %37 = vector.extract_strided_slice %31 {offsets = [0, 0], sizes = [8, 256], strides = [1, 1]} : vector<80x256xf32> to vector<8x256xf32>
    %cst_22 = arith.constant dense<0.000000e+00> : vector<8x256xf32>
    %38 = tpu.matmul %34, %33, %cst_22 {dimension_numbers = #tpu.dot_dimension_numbers<[1], [0], [0], [1], [0, 0, 1, 1], [], []>} : vector<8x64xf32>, vector<64x256xf32>, vector<8x256xf32> -> vector<8x256xf32>
    %39 = arith.addf %37, %38 : vector<8x256xf32>
    %40 = vector.extract_strided_slice %39 {offsets = [0, 0], sizes = [8, 64], strides = [1, 1]} : vector<8x256xf32> to vector<8x64xf32>
    %cst_23 = arith.constant 0.000000e+00 : f32
    %41 = vector.broadcast %cst_23 : f32 to vector<8x64xf32>
    %42 = arith.subf %41, %40 : vector<8x64xf32>
    %43 = math.exp %42 : vector<8x64xf32>
    %cst_24 = arith.constant 1.000000e+00 : f32
    %44 = vector.broadcast %cst_24 : f32 to vector<8x64xf32>
    %45 = arith.addf %44, %43 : vector<8x64xf32>
    %cst_25 = arith.constant 1.000000e+00 : f32
    %46 = vector.broadcast %cst_25 : f32 to vector<8x64xf32>
    %47 = arith.divf %46, %45 : vector<8x64xf32>
    %48 = vector.extract_strided_slice %39 {offsets = [0, 64], sizes = [8, 64], strides = [1, 1]} : vector<8x256xf32> to vector<8x64xf32>
    %cst_26 = arith.constant 0.000000e+00 : f32
    %49 = vector.broadcast %cst_26 : f32 to vector<8x64xf32>
    %50 = arith.subf %49, %48 : vector<8x64xf32>
    %51 = math.exp %50 : vector<8x64xf32>
    %cst_27 = arith.constant 1.000000e+00 : f32
    %52 = vector.broadcast %cst_27 : f32 to vector<8x64xf32>
    %53 = arith.addf %52, %51 : vector<8x64xf32>
    %cst_28 = arith.constant 1.000000e+00 : f32
    %54 = vector.broadcast %cst_28 : f32 to vector<8x64xf32>
    %55 = arith.divf %54, %53 : vector<8x64xf32>
    %56 = vector.extract_strided_slice %39 {offsets = [0, 128], sizes = [8, 64], strides = [1, 1]} : vector<8x256xf32> to vector<8x64xf32>
    %57 = math.tanh %56 : vector<8x64xf32>
    %58 = vector.extract_strided_slice %39 {offsets = [0, 192], sizes = [8, 64], strides = [1, 1]} : vector<8x256xf32> to vector<8x64xf32>
    %cst_29 = arith.constant 0.000000e+00 : f32
    %59 = vector.broadcast %cst_29 : f32 to vector<8x64xf32>
    %60 = arith.subf %59, %58 : vector<8x64xf32>
    %61 = math.exp %60 : vector<8x64xf32>
    %cst_30 = arith.constant 1.000000e+00 : f32
    %62 = vector.broadcast %cst_30 : f32 to vector<8x64xf32>
    %63 = arith.addf %62, %61 : vector<8x64xf32>
    %cst_31 = arith.constant 1.000000e+00 : f32
    %64 = vector.broadcast %cst_31 : f32 to vector<8x64xf32>
    %65 = arith.divf %64, %63 : vector<8x64xf32>
    %66 = arith.mulf %55, %35 : vector<8x64xf32>
    %67 = arith.mulf %47, %57 : vector<8x64xf32>
    %68 = arith.addf %66, %67 : vector<8x64xf32>
    %69 = math.tanh %68 : vector<8x64xf32>
    %70 = arith.mulf %65, %69 : vector<8x64xf32>
    %71 = arith.truncf %70 : vector<8x64xf32> to vector<8x64xbf16>
    %c0_32 = arith.constant 0 : index
    %c0_33 = arith.constant 0 : index
    %c0_34 = arith.constant 0 : index
    %72 = vector.load %arg8[%c0_32, %c0_33, %c0_34] : memref<10x64x256xbf16, #tpu.memory_space<vmem>>, vector<1x64x256xbf16>
    %73 = vector.shape_cast %72 : vector<1x64x256xbf16> to vector<64x256xbf16>
    %cst_35 = arith.constant dense<0.000000e+00> : vector<8x256xf32>
    %74 = tpu.matmul %71, %73, %cst_35 {dimension_numbers = #tpu.dot_dimension_numbers<[1], [0], [0], [1], [0, 0, 1, 1], [], []>} : vector<8x64xbf16>, vector<64x256xbf16>, vector<8x256xf32> -> vector<8x256xf32>
    %75 = arith.addf %36, %74 : vector<8x256xf32>
    %76 = vector.extract_strided_slice %31 {offsets = [8, 0], sizes = [8, 256], strides = [1, 1]} : vector<80x256xf32> to vector<8x256xf32>
    %cst_36 = arith.constant dense<0.000000e+00> : vector<8x256xf32>
    %77 = tpu.matmul %70, %33, %cst_36 {dimension_numbers = #tpu.dot_dimension_numbers<[1], [0], [0], [1], [0, 0, 1, 1], [], []>} : vector<8x64xf32>, vector<64x256xf32>, vector<8x256xf32> -> vector<8x256xf32>
    %78 = arith.addf %76, %77 : vector<8x256xf32>
    %79 = vector.extract_strided_slice %78 {offsets = [0, 0], sizes = [8, 64], strides = [1, 1]} : vector<8x256xf32> to vector<8x64xf32>
    %cst_37 = arith.constant 0.000000e+00 : f32
    %80 = vector.broadcast %cst_37 : f32 to vector<8x64xf32>
    %81 = arith.subf %80, %79 : vector<8x64xf32>
    %82 = math.exp %81 : vector<8x64xf32>
    %cst_38 = arith.constant 1.000000e+00 : f32
    %83 = vector.broadcast %cst_38 : f32 to vector<8x64xf32>
    %84 = arith.addf %83, %82 : vector<8x64xf32>
    %cst_39 = arith.constant 1.000000e+00 : f32
    %85 = vector.broadcast %cst_39 : f32 to vector<8x64xf32>
    %86 = arith.divf %85, %84 : vector<8x64xf32>
    %87 = vector.extract_strided_slice %78 {offsets = [0, 64], sizes = [8, 64], strides = [1, 1]} : vector<8x256xf32> to vector<8x64xf32>
    %cst_40 = arith.constant 0.000000e+00 : f32
    %88 = vector.broadcast %cst_40 : f32 to vector<8x64xf32>
    %89 = arith.subf %88, %87 : vector<8x64xf32>
    %90 = math.exp %89 : vector<8x64xf32>
    %cst_41 = arith.constant 1.000000e+00 : f32
    %91 = vector.broadcast %cst_41 : f32 to vector<8x64xf32>
    %92 = arith.addf %91, %90 : vector<8x64xf32>
    %cst_42 = arith.constant 1.000000e+00 : f32
    %93 = vector.broadcast %cst_42 : f32 to vector<8x64xf32>
    %94 = arith.divf %93, %92 : vector<8x64xf32>
    %95 = vector.extract_strided_slice %78 {offsets = [0, 128], sizes = [8, 64], strides = [1, 1]} : vector<8x256xf32> to vector<8x64xf32>
    %96 = math.tanh %95 : vector<8x64xf32>
    %97 = vector.extract_strided_slice %78 {offsets = [0, 192], sizes = [8, 64], strides = [1, 1]} : vector<8x256xf32> to vector<8x64xf32>
    %cst_43 = arith.constant 0.000000e+00 : f32
    %98 = vector.broadcast %cst_43 : f32 to vector<8x64xf32>
    %99 = arith.subf %98, %97 : vector<8x64xf32>
    %100 = math.exp %99 : vector<8x64xf32>
    %cst_44 = arith.constant 1.000000e+00 : f32
    %101 = vector.broadcast %cst_44 : f32 to vector<8x64xf32>
    %102 = arith.addf %101, %100 : vector<8x64xf32>
    %cst_45 = arith.constant 1.000000e+00 : f32
    %103 = vector.broadcast %cst_45 : f32 to vector<8x64xf32>
    %104 = arith.divf %103, %102 : vector<8x64xf32>
    %105 = arith.mulf %94, %68 : vector<8x64xf32>
    %106 = arith.mulf %86, %96 : vector<8x64xf32>
    %107 = arith.addf %105, %106 : vector<8x64xf32>
    %108 = math.tanh %107 : vector<8x64xf32>
    %109 = arith.mulf %104, %108 : vector<8x64xf32>
    %110 = arith.truncf %109 : vector<8x64xf32> to vector<8x64xbf16>
    %c1 = arith.constant 1 : index
    %c0_46 = arith.constant 0 : index
    %c0_47 = arith.constant 0 : index
    %111 = vector.load %arg8[%c1, %c0_46, %c0_47] : memref<10x64x256xbf16, #tpu.memory_space<vmem>>, vector<1x64x256xbf16>
    %112 = vector.shape_cast %111 : vector<1x64x256xbf16> to vector<64x256xbf16>
    %cst_48 = arith.constant dense<0.000000e+00> : vector<8x256xf32>
    %113 = tpu.matmul %110, %112, %cst_48 {dimension_numbers = #tpu.dot_dimension_numbers<[1], [0], [0], [1], [0, 0, 1, 1], [], []>} : vector<8x64xbf16>, vector<64x256xbf16>, vector<8x256xf32> -> vector<8x256xf32>
    %114 = arith.addf %75, %113 : vector<8x256xf32>
    %115 = vector.extract_strided_slice %31 {offsets = [16, 0], sizes = [8, 256], strides = [1, 1]} : vector<80x256xf32> to vector<8x256xf32>
    %cst_49 = arith.constant dense<0.000000e+00> : vector<8x256xf32>
    %116 = tpu.matmul %109, %33, %cst_49 {dimension_numbers = #tpu.dot_dimension_numbers<[1], [0], [0], [1], [0, 0, 1, 1], [], []>} : vector<8x64xf32>, vector<64x256xf32>, vector<8x256xf32> -> vector<8x256xf32>
    %117 = arith.addf %115, %116 : vector<8x256xf32>
    %118 = vector.extract_strided_slice %117 {offsets = [0, 0], sizes = [8, 64], strides = [1, 1]} : vector<8x256xf32> to vector<8x64xf32>
    %cst_50 = arith.constant 0.000000e+00 : f32
    %119 = vector.broadcast %cst_50 : f32 to vector<8x64xf32>
    %120 = arith.subf %119, %118 : vector<8x64xf32>
    %121 = math.exp %120 : vector<8x64xf32>
    %cst_51 = arith.constant 1.000000e+00 : f32
    %122 = vector.broadcast %cst_51 : f32 to vector<8x64xf32>
    %123 = arith.addf %122, %121 : vector<8x64xf32>
    %cst_52 = arith.constant 1.000000e+00 : f32
    %124 = vector.broadcast %cst_52 : f32 to vector<8x64xf32>
    %125 = arith.divf %124, %123 : vector<8x64xf32>
    %126 = vector.extract_strided_slice %117 {offsets = [0, 64], sizes = [8, 64], strides = [1, 1]} : vector<8x256xf32> to vector<8x64xf32>
    %cst_53 = arith.constant 0.000000e+00 : f32
    %127 = vector.broadcast %cst_53 : f32 to vector<8x64xf32>
    %128 = arith.subf %127, %126 : vector<8x64xf32>
    %129 = math.exp %128 : vector<8x64xf32>
    %cst_54 = arith.constant 1.000000e+00 : f32
    %130 = vector.broadcast %cst_54 : f32 to vector<8x64xf32>
    %131 = arith.addf %130, %129 : vector<8x64xf32>
    %cst_55 = arith.constant 1.000000e+00 : f32
    %132 = vector.broadcast %cst_55 : f32 to vector<8x64xf32>
    %133 = arith.divf %132, %131 : vector<8x64xf32>
    %134 = vector.extract_strided_slice %117 {offsets = [0, 128], sizes = [8, 64], strides = [1, 1]} : vector<8x256xf32> to vector<8x64xf32>
    %135 = math.tanh %134 : vector<8x64xf32>
    %136 = vector.extract_strided_slice %117 {offsets = [0, 192], sizes = [8, 64], strides = [1, 1]} : vector<8x256xf32> to vector<8x64xf32>
    %cst_56 = arith.constant 0.000000e+00 : f32
    %137 = vector.broadcast %cst_56 : f32 to vector<8x64xf32>
    %138 = arith.subf %137, %136 : vector<8x64xf32>
    %139 = math.exp %138 : vector<8x64xf32>
    %cst_57 = arith.constant 1.000000e+00 : f32
    %140 = vector.broadcast %cst_57 : f32 to vector<8x64xf32>
    %141 = arith.addf %140, %139 : vector<8x64xf32>
    %cst_58 = arith.constant 1.000000e+00 : f32
    %142 = vector.broadcast %cst_58 : f32 to vector<8x64xf32>
    %143 = arith.divf %142, %141 : vector<8x64xf32>
    %144 = arith.mulf %133, %107 : vector<8x64xf32>
    %145 = arith.mulf %125, %135 : vector<8x64xf32>
    %146 = arith.addf %144, %145 : vector<8x64xf32>
    %147 = math.tanh %146 : vector<8x64xf32>
    %148 = arith.mulf %143, %147 : vector<8x64xf32>
    %149 = arith.truncf %148 : vector<8x64xf32> to vector<8x64xbf16>
    %c2 = arith.constant 2 : index
    %c0_59 = arith.constant 0 : index
    %c0_60 = arith.constant 0 : index
    %150 = vector.load %arg8[%c2, %c0_59, %c0_60] : memref<10x64x256xbf16, #tpu.memory_space<vmem>>, vector<1x64x256xbf16>
    %151 = vector.shape_cast %150 : vector<1x64x256xbf16> to vector<64x256xbf16>
    %cst_61 = arith.constant dense<0.000000e+00> : vector<8x256xf32>
    %152 = tpu.matmul %149, %151, %cst_61 {dimension_numbers = #tpu.dot_dimension_numbers<[1], [0], [0], [1], [0, 0, 1, 1], [], []>} : vector<8x64xbf16>, vector<64x256xbf16>, vector<8x256xf32> -> vector<8x256xf32>
    %153 = arith.addf %114, %152 : vector<8x256xf32>
    %154 = vector.extract_strided_slice %31 {offsets = [24, 0], sizes = [8, 256], strides = [1, 1]} : vector<80x256xf32> to vector<8x256xf32>
    %cst_62 = arith.constant dense<0.000000e+00> : vector<8x256xf32>
    %155 = tpu.matmul %148, %33, %cst_62 {dimension_numbers = #tpu.dot_dimension_numbers<[1], [0], [0], [1], [0, 0, 1, 1], [], []>} : vector<8x64xf32>, vector<64x256xf32>, vector<8x256xf32> -> vector<8x256xf32>
    %156 = arith.addf %154, %155 : vector<8x256xf32>
    %157 = vector.extract_strided_slice %156 {offsets = [0, 0], sizes = [8, 64], strides = [1, 1]} : vector<8x256xf32> to vector<8x64xf32>
    %cst_63 = arith.constant 0.000000e+00 : f32
    %158 = vector.broadcast %cst_63 : f32 to vector<8x64xf32>
    %159 = arith.subf %158, %157 : vector<8x64xf32>
    %160 = math.exp %159 : vector<8x64xf32>
    %cst_64 = arith.constant 1.000000e+00 : f32
    %161 = vector.broadcast %cst_64 : f32 to vector<8x64xf32>
    %162 = arith.addf %161, %160 : vector<8x64xf32>
    %cst_65 = arith.constant 1.000000e+00 : f32
    %163 = vector.broadcast %cst_65 : f32 to vector<8x64xf32>
    %164 = arith.divf %163, %162 : vector<8x64xf32>
    %165 = vector.extract_strided_slice %156 {offsets = [0, 64], sizes = [8, 64], strides = [1, 1]} : vector<8x256xf32> to vector<8x64xf32>
    %cst_66 = arith.constant 0.000000e+00 : f32
    %166 = vector.broadcast %cst_66 : f32 to vector<8x64xf32>
    %167 = arith.subf %166, %165 : vector<8x64xf32>
    %168 = math.exp %167 : vector<8x64xf32>
    %cst_67 = arith.constant 1.000000e+00 : f32
    %169 = vector.broadcast %cst_67 : f32 to vector<8x64xf32>
    %170 = arith.addf %169, %168 : vector<8x64xf32>
    %cst_68 = arith.constant 1.000000e+00 : f32
    %171 = vector.broadcast %cst_68 : f32 to vector<8x64xf32>
    %172 = arith.divf %171, %170 : vector<8x64xf32>
    %173 = vector.extract_strided_slice %156 {offsets = [0, 128], sizes = [8, 64], strides = [1, 1]} : vector<8x256xf32> to vector<8x64xf32>
    %174 = math.tanh %173 : vector<8x64xf32>
    %175 = vector.extract_strided_slice %156 {offsets = [0, 192], sizes = [8, 64], strides = [1, 1]} : vector<8x256xf32> to vector<8x64xf32>
    %cst_69 = arith.constant 0.000000e+00 : f32
    %176 = vector.broadcast %cst_69 : f32 to vector<8x64xf32>
    %177 = arith.subf %176, %175 : vector<8x64xf32>
    %178 = math.exp %177 : vector<8x64xf32>
    %cst_70 = arith.constant 1.000000e+00 : f32
    %179 = vector.broadcast %cst_70 : f32 to vector<8x64xf32>
    %180 = arith.addf %179, %178 : vector<8x64xf32>
    %cst_71 = arith.constant 1.000000e+00 : f32
    %181 = vector.broadcast %cst_71 : f32 to vector<8x64xf32>
    %182 = arith.divf %181, %180 : vector<8x64xf32>
    %183 = arith.mulf %172, %146 : vector<8x64xf32>
    %184 = arith.mulf %164, %174 : vector<8x64xf32>
    %185 = arith.addf %183, %184 : vector<8x64xf32>
    %186 = math.tanh %185 : vector<8x64xf32>
    %187 = arith.mulf %182, %186 : vector<8x64xf32>
    %188 = arith.truncf %187 : vector<8x64xf32> to vector<8x64xbf16>
    %c3 = arith.constant 3 : index
    %c0_72 = arith.constant 0 : index
    %c0_73 = arith.constant 0 : index
    %189 = vector.load %arg8[%c3, %c0_72, %c0_73] : memref<10x64x256xbf16, #tpu.memory_space<vmem>>, vector<1x64x256xbf16>
    %190 = vector.shape_cast %189 : vector<1x64x256xbf16> to vector<64x256xbf16>
    %cst_74 = arith.constant dense<0.000000e+00> : vector<8x256xf32>
    %191 = tpu.matmul %188, %190, %cst_74 {dimension_numbers = #tpu.dot_dimension_numbers<[1], [0], [0], [1], [0, 0, 1, 1], [], []>} : vector<8x64xbf16>, vector<64x256xbf16>, vector<8x256xf32> -> vector<8x256xf32>
    %192 = arith.addf %153, %191 : vector<8x256xf32>
    %193 = vector.extract_strided_slice %31 {offsets = [32, 0], sizes = [8, 256], strides = [1, 1]} : vector<80x256xf32> to vector<8x256xf32>
    %cst_75 = arith.constant dense<0.000000e+00> : vector<8x256xf32>
    %194 = tpu.matmul %187, %33, %cst_75 {dimension_numbers = #tpu.dot_dimension_numbers<[1], [0], [0], [1], [0, 0, 1, 1], [], []>} : vector<8x64xf32>, vector<64x256xf32>, vector<8x256xf32> -> vector<8x256xf32>
    %195 = arith.addf %193, %194 : vector<8x256xf32>
    %196 = vector.extract_strided_slice %195 {offsets = [0, 0], sizes = [8, 64], strides = [1, 1]} : vector<8x256xf32> to vector<8x64xf32>
    %cst_76 = arith.constant 0.000000e+00 : f32
    %197 = vector.broadcast %cst_76 : f32 to vector<8x64xf32>
    %198 = arith.subf %197, %196 : vector<8x64xf32>
    %199 = math.exp %198 : vector<8x64xf32>
    %cst_77 = arith.constant 1.000000e+00 : f32
    %200 = vector.broadcast %cst_77 : f32 to vector<8x64xf32>
    %201 = arith.addf %200, %199 : vector<8x64xf32>
    %cst_78 = arith.constant 1.000000e+00 : f32
    %202 = vector.broadcast %cst_78 : f32 to vector<8x64xf32>
    %203 = arith.divf %202, %201 : vector<8x64xf32>
    %204 = vector.extract_strided_slice %195 {offsets = [0, 64], sizes = [8, 64], strides = [1, 1]} : vector<8x256xf32> to vector<8x64xf32>
    %cst_79 = arith.constant 0.000000e+00 : f32
    %205 = vector.broadcast %cst_79 : f32 to vector<8x64xf32>
    %206 = arith.subf %205, %204 : vector<8x64xf32>
    %207 = math.exp %206 : vector<8x64xf32>
    %cst_80 = arith.constant 1.000000e+00 : f32
    %208 = vector.broadcast %cst_80 : f32 to vector<8x64xf32>
    %209 = arith.addf %208, %207 : vector<8x64xf32>
    %cst_81 = arith.constant 1.000000e+00 : f32
    %210 = vector.broadcast %cst_81 : f32 to vector<8x64xf32>
    %211 = arith.divf %210, %209 : vector<8x64xf32>
    %212 = vector.extract_strided_slice %195 {offsets = [0, 128], sizes = [8, 64], strides = [1, 1]} : vector<8x256xf32> to vector<8x64xf32>
    %213 = math.tanh %212 : vector<8x64xf32>
    %214 = vector.extract_strided_slice %195 {offsets = [0, 192], sizes = [8, 64], strides = [1, 1]} : vector<8x256xf32> to vector<8x64xf32>
    %cst_82 = arith.constant 0.000000e+00 : f32
    %215 = vector.broadcast %cst_82 : f32 to vector<8x64xf32>
    %216 = arith.subf %215, %214 : vector<8x64xf32>
    %217 = math.exp %216 : vector<8x64xf32>
    %cst_83 = arith.constant 1.000000e+00 : f32
    %218 = vector.broadcast %cst_83 : f32 to vector<8x64xf32>
    %219 = arith.addf %218, %217 : vector<8x64xf32>
    %cst_84 = arith.constant 1.000000e+00 : f32
    %220 = vector.broadcast %cst_84 : f32 to vector<8x64xf32>
    %221 = arith.divf %220, %219 : vector<8x64xf32>
    %222 = arith.mulf %211, %185 : vector<8x64xf32>
    %223 = arith.mulf %203, %213 : vector<8x64xf32>
    %224 = arith.addf %222, %223 : vector<8x64xf32>
    %225 = math.tanh %224 : vector<8x64xf32>
    %226 = arith.mulf %221, %225 : vector<8x64xf32>
    %227 = arith.truncf %226 : vector<8x64xf32> to vector<8x64xbf16>
    %c4 = arith.constant 4 : index
    %c0_85 = arith.constant 0 : index
    %c0_86 = arith.constant 0 : index
    %228 = vector.load %arg8[%c4, %c0_85, %c0_86] : memref<10x64x256xbf16, #tpu.memory_space<vmem>>, vector<1x64x256xbf16>
    %229 = vector.shape_cast %228 : vector<1x64x256xbf16> to vector<64x256xbf16>
    %cst_87 = arith.constant dense<0.000000e+00> : vector<8x256xf32>
    %230 = tpu.matmul %227, %229, %cst_87 {dimension_numbers = #tpu.dot_dimension_numbers<[1], [0], [0], [1], [0, 0, 1, 1], [], []>} : vector<8x64xbf16>, vector<64x256xbf16>, vector<8x256xf32> -> vector<8x256xf32>
    %231 = arith.addf %192, %230 : vector<8x256xf32>
    %232 = vector.extract_strided_slice %31 {offsets = [40, 0], sizes = [8, 256], strides = [1, 1]} : vector<80x256xf32> to vector<8x256xf32>
    %cst_88 = arith.constant dense<0.000000e+00> : vector<8x256xf32>
    %233 = tpu.matmul %226, %33, %cst_88 {dimension_numbers = #tpu.dot_dimension_numbers<[1], [0], [0], [1], [0, 0, 1, 1], [], []>} : vector<8x64xf32>, vector<64x256xf32>, vector<8x256xf32> -> vector<8x256xf32>
    %234 = arith.addf %232, %233 : vector<8x256xf32>
    %235 = vector.extract_strided_slice %234 {offsets = [0, 0], sizes = [8, 64], strides = [1, 1]} : vector<8x256xf32> to vector<8x64xf32>
    %cst_89 = arith.constant 0.000000e+00 : f32
    %236 = vector.broadcast %cst_89 : f32 to vector<8x64xf32>
    %237 = arith.subf %236, %235 : vector<8x64xf32>
    %238 = math.exp %237 : vector<8x64xf32>
    %cst_90 = arith.constant 1.000000e+00 : f32
    %239 = vector.broadcast %cst_90 : f32 to vector<8x64xf32>
    %240 = arith.addf %239, %238 : vector<8x64xf32>
    %cst_91 = arith.constant 1.000000e+00 : f32
    %241 = vector.broadcast %cst_91 : f32 to vector<8x64xf32>
    %242 = arith.divf %241, %240 : vector<8x64xf32>
    %243 = vector.extract_strided_slice %234 {offsets = [0, 64], sizes = [8, 64], strides = [1, 1]} : vector<8x256xf32> to vector<8x64xf32>
    %cst_92 = arith.constant 0.000000e+00 : f32
    %244 = vector.broadcast %cst_92 : f32 to vector<8x64xf32>
    %245 = arith.subf %244, %243 : vector<8x64xf32>
    %246 = math.exp %245 : vector<8x64xf32>
    %cst_93 = arith.constant 1.000000e+00 : f32
    %247 = vector.broadcast %cst_93 : f32 to vector<8x64xf32>
    %248 = arith.addf %247, %246 : vector<8x64xf32>
    %cst_94 = arith.constant 1.000000e+00 : f32
    %249 = vector.broadcast %cst_94 : f32 to vector<8x64xf32>
    %250 = arith.divf %249, %248 : vector<8x64xf32>
    %251 = vector.extract_strided_slice %234 {offsets = [0, 128], sizes = [8, 64], strides = [1, 1]} : vector<8x256xf32> to vector<8x64xf32>
    %252 = math.tanh %251 : vector<8x64xf32>
    %253 = vector.extract_strided_slice %234 {offsets = [0, 192], sizes = [8, 64], strides = [1, 1]} : vector<8x256xf32> to vector<8x64xf32>
    %cst_95 = arith.constant 0.000000e+00 : f32
    %254 = vector.broadcast %cst_95 : f32 to vector<8x64xf32>
    %255 = arith.subf %254, %253 : vector<8x64xf32>
    %256 = math.exp %255 : vector<8x64xf32>
    %cst_96 = arith.constant 1.000000e+00 : f32
    %257 = vector.broadcast %cst_96 : f32 to vector<8x64xf32>
    %258 = arith.addf %257, %256 : vector<8x64xf32>
    %cst_97 = arith.constant 1.000000e+00 : f32
    %259 = vector.broadcast %cst_97 : f32 to vector<8x64xf32>
    %260 = arith.divf %259, %258 : vector<8x64xf32>
    %261 = arith.mulf %250, %224 : vector<8x64xf32>
    %262 = arith.mulf %242, %252 : vector<8x64xf32>
    %263 = arith.addf %261, %262 : vector<8x64xf32>
    %264 = math.tanh %263 : vector<8x64xf32>
    %265 = arith.mulf %260, %264 : vector<8x64xf32>
    %266 = arith.truncf %265 : vector<8x64xf32> to vector<8x64xbf16>
    %c5 = arith.constant 5 : index
    %c0_98 = arith.constant 0 : index
    %c0_99 = arith.constant 0 : index
    %267 = vector.load %arg8[%c5, %c0_98, %c0_99] : memref<10x64x256xbf16, #tpu.memory_space<vmem>>, vector<1x64x256xbf16>
    %268 = vector.shape_cast %267 : vector<1x64x256xbf16> to vector<64x256xbf16>
    %cst_100 = arith.constant dense<0.000000e+00> : vector<8x256xf32>
    %269 = tpu.matmul %266, %268, %cst_100 {dimension_numbers = #tpu.dot_dimension_numbers<[1], [0], [0], [1], [0, 0, 1, 1], [], []>} : vector<8x64xbf16>, vector<64x256xbf16>, vector<8x256xf32> -> vector<8x256xf32>
    %270 = arith.addf %231, %269 : vector<8x256xf32>
    %271 = vector.extract_strided_slice %31 {offsets = [48, 0], sizes = [8, 256], strides = [1, 1]} : vector<80x256xf32> to vector<8x256xf32>
    %cst_101 = arith.constant dense<0.000000e+00> : vector<8x256xf32>
    %272 = tpu.matmul %265, %33, %cst_101 {dimension_numbers = #tpu.dot_dimension_numbers<[1], [0], [0], [1], [0, 0, 1, 1], [], []>} : vector<8x64xf32>, vector<64x256xf32>, vector<8x256xf32> -> vector<8x256xf32>
    %273 = arith.addf %271, %272 : vector<8x256xf32>
    %274 = vector.extract_strided_slice %273 {offsets = [0, 0], sizes = [8, 64], strides = [1, 1]} : vector<8x256xf32> to vector<8x64xf32>
    %cst_102 = arith.constant 0.000000e+00 : f32
    %275 = vector.broadcast %cst_102 : f32 to vector<8x64xf32>
    %276 = arith.subf %275, %274 : vector<8x64xf32>
    %277 = math.exp %276 : vector<8x64xf32>
    %cst_103 = arith.constant 1.000000e+00 : f32
    %278 = vector.broadcast %cst_103 : f32 to vector<8x64xf32>
    %279 = arith.addf %278, %277 : vector<8x64xf32>
    %cst_104 = arith.constant 1.000000e+00 : f32
    %280 = vector.broadcast %cst_104 : f32 to vector<8x64xf32>
    %281 = arith.divf %280, %279 : vector<8x64xf32>
    %282 = vector.extract_strided_slice %273 {offsets = [0, 64], sizes = [8, 64], strides = [1, 1]} : vector<8x256xf32> to vector<8x64xf32>
    %cst_105 = arith.constant 0.000000e+00 : f32
    %283 = vector.broadcast %cst_105 : f32 to vector<8x64xf32>
    %284 = arith.subf %283, %282 : vector<8x64xf32>
    %285 = math.exp %284 : vector<8x64xf32>
    %cst_106 = arith.constant 1.000000e+00 : f32
    %286 = vector.broadcast %cst_106 : f32 to vector<8x64xf32>
    %287 = arith.addf %286, %285 : vector<8x64xf32>
    %cst_107 = arith.constant 1.000000e+00 : f32
    %288 = vector.broadcast %cst_107 : f32 to vector<8x64xf32>
    %289 = arith.divf %288, %287 : vector<8x64xf32>
    %290 = vector.extract_strided_slice %273 {offsets = [0, 128], sizes = [8, 64], strides = [1, 1]} : vector<8x256xf32> to vector<8x64xf32>
    %291 = math.tanh %290 : vector<8x64xf32>
    %292 = vector.extract_strided_slice %273 {offsets = [0, 192], sizes = [8, 64], strides = [1, 1]} : vector<8x256xf32> to vector<8x64xf32>
    %cst_108 = arith.constant 0.000000e+00 : f32
    %293 = vector.broadcast %cst_108 : f32 to vector<8x64xf32>
    %294 = arith.subf %293, %292 : vector<8x64xf32>
    %295 = math.exp %294 : vector<8x64xf32>
    %cst_109 = arith.constant 1.000000e+00 : f32
    %296 = vector.broadcast %cst_109 : f32 to vector<8x64xf32>
    %297 = arith.addf %296, %295 : vector<8x64xf32>
    %cst_110 = arith.constant 1.000000e+00 : f32
    %298 = vector.broadcast %cst_110 : f32 to vector<8x64xf32>
    %299 = arith.divf %298, %297 : vector<8x64xf32>
    %300 = arith.mulf %289, %263 : vector<8x64xf32>
    %301 = arith.mulf %281, %291 : vector<8x64xf32>
    %302 = arith.addf %300, %301 : vector<8x64xf32>
    %303 = math.tanh %302 : vector<8x64xf32>
    %304 = arith.mulf %299, %303 : vector<8x64xf32>
    %305 = arith.truncf %304 : vector<8x64xf32> to vector<8x64xbf16>
    %c6 = arith.constant 6 : index
    %c0_111 = arith.constant 0 : index
    %c0_112 = arith.constant 0 : index
    %306 = vector.load %arg8[%c6, %c0_111, %c0_112] : memref<10x64x256xbf16, #tpu.memory_space<vmem>>, vector<1x64x256xbf16>
    %307 = vector.shape_cast %306 : vector<1x64x256xbf16> to vector<64x256xbf16>
    %cst_113 = arith.constant dense<0.000000e+00> : vector<8x256xf32>
    %308 = tpu.matmul %305, %307, %cst_113 {dimension_numbers = #tpu.dot_dimension_numbers<[1], [0], [0], [1], [0, 0, 1, 1], [], []>} : vector<8x64xbf16>, vector<64x256xbf16>, vector<8x256xf32> -> vector<8x256xf32>
    %309 = arith.addf %270, %308 : vector<8x256xf32>
    %310 = vector.extract_strided_slice %31 {offsets = [56, 0], sizes = [8, 256], strides = [1, 1]} : vector<80x256xf32> to vector<8x256xf32>
    %cst_114 = arith.constant dense<0.000000e+00> : vector<8x256xf32>
    %311 = tpu.matmul %304, %33, %cst_114 {dimension_numbers = #tpu.dot_dimension_numbers<[1], [0], [0], [1], [0, 0, 1, 1], [], []>} : vector<8x64xf32>, vector<64x256xf32>, vector<8x256xf32> -> vector<8x256xf32>
    %312 = arith.addf %310, %311 : vector<8x256xf32>
    %313 = vector.extract_strided_slice %312 {offsets = [0, 0], sizes = [8, 64], strides = [1, 1]} : vector<8x256xf32> to vector<8x64xf32>
    %cst_115 = arith.constant 0.000000e+00 : f32
    %314 = vector.broadcast %cst_115 : f32 to vector<8x64xf32>
    %315 = arith.subf %314, %313 : vector<8x64xf32>
    %316 = math.exp %315 : vector<8x64xf32>
    %cst_116 = arith.constant 1.000000e+00 : f32
    %317 = vector.broadcast %cst_116 : f32 to vector<8x64xf32>
    %318 = arith.addf %317, %316 : vector<8x64xf32>
    %cst_117 = arith.constant 1.000000e+00 : f32
    %319 = vector.broadcast %cst_117 : f32 to vector<8x64xf32>
    %320 = arith.divf %319, %318 : vector<8x64xf32>
    %321 = vector.extract_strided_slice %312 {offsets = [0, 64], sizes = [8, 64], strides = [1, 1]} : vector<8x256xf32> to vector<8x64xf32>
    %cst_118 = arith.constant 0.000000e+00 : f32
    %322 = vector.broadcast %cst_118 : f32 to vector<8x64xf32>
    %323 = arith.subf %322, %321 : vector<8x64xf32>
    %324 = math.exp %323 : vector<8x64xf32>
    %cst_119 = arith.constant 1.000000e+00 : f32
    %325 = vector.broadcast %cst_119 : f32 to vector<8x64xf32>
    %326 = arith.addf %325, %324 : vector<8x64xf32>
    %cst_120 = arith.constant 1.000000e+00 : f32
    %327 = vector.broadcast %cst_120 : f32 to vector<8x64xf32>
    %328 = arith.divf %327, %326 : vector<8x64xf32>
    %329 = vector.extract_strided_slice %312 {offsets = [0, 128], sizes = [8, 64], strides = [1, 1]} : vector<8x256xf32> to vector<8x64xf32>
    %330 = math.tanh %329 : vector<8x64xf32>
    %331 = vector.extract_strided_slice %312 {offsets = [0, 192], sizes = [8, 64], strides = [1, 1]} : vector<8x256xf32> to vector<8x64xf32>
    %cst_121 = arith.constant 0.000000e+00 : f32
    %332 = vector.broadcast %cst_121 : f32 to vector<8x64xf32>
    %333 = arith.subf %332, %331 : vector<8x64xf32>
    %334 = math.exp %333 : vector<8x64xf32>
    %cst_122 = arith.constant 1.000000e+00 : f32
    %335 = vector.broadcast %cst_122 : f32 to vector<8x64xf32>
    %336 = arith.addf %335, %334 : vector<8x64xf32>
    %cst_123 = arith.constant 1.000000e+00 : f32
    %337 = vector.broadcast %cst_123 : f32 to vector<8x64xf32>
    %338 = arith.divf %337, %336 : vector<8x64xf32>
    %339 = arith.mulf %328, %302 : vector<8x64xf32>
    %340 = arith.mulf %320, %330 : vector<8x64xf32>
    %341 = arith.addf %339, %340 : vector<8x64xf32>
    %342 = math.tanh %341 : vector<8x64xf32>
    %343 = arith.mulf %338, %342 : vector<8x64xf32>
    %344 = arith.truncf %343 : vector<8x64xf32> to vector<8x64xbf16>
    %c7 = arith.constant 7 : index
    %c0_124 = arith.constant 0 : index
    %c0_125 = arith.constant 0 : index
    %345 = vector.load %arg8[%c7, %c0_124, %c0_125] : memref<10x64x256xbf16, #tpu.memory_space<vmem>>, vector<1x64x256xbf16>
    %346 = vector.shape_cast %345 : vector<1x64x256xbf16> to vector<64x256xbf16>
    %cst_126 = arith.constant dense<0.000000e+00> : vector<8x256xf32>
    %347 = tpu.matmul %344, %346, %cst_126 {dimension_numbers = #tpu.dot_dimension_numbers<[1], [0], [0], [1], [0, 0, 1, 1], [], []>} : vector<8x64xbf16>, vector<64x256xbf16>, vector<8x256xf32> -> vector<8x256xf32>
    %348 = arith.addf %309, %347 : vector<8x256xf32>
    %349 = vector.extract_strided_slice %31 {offsets = [64, 0], sizes = [8, 256], strides = [1, 1]} : vector<80x256xf32> to vector<8x256xf32>
    %cst_127 = arith.constant dense<0.000000e+00> : vector<8x256xf32>
    %350 = tpu.matmul %343, %33, %cst_127 {dimension_numbers = #tpu.dot_dimension_numbers<[1], [0], [0], [1], [0, 0, 1, 1], [], []>} : vector<8x64xf32>, vector<64x256xf32>, vector<8x256xf32> -> vector<8x256xf32>
    %351 = arith.addf %349, %350 : vector<8x256xf32>
    %352 = vector.extract_strided_slice %351 {offsets = [0, 0], sizes = [8, 64], strides = [1, 1]} : vector<8x256xf32> to vector<8x64xf32>
    %cst_128 = arith.constant 0.000000e+00 : f32
    %353 = vector.broadcast %cst_128 : f32 to vector<8x64xf32>
    %354 = arith.subf %353, %352 : vector<8x64xf32>
    %355 = math.exp %354 : vector<8x64xf32>
    %cst_129 = arith.constant 1.000000e+00 : f32
    %356 = vector.broadcast %cst_129 : f32 to vector<8x64xf32>
    %357 = arith.addf %356, %355 : vector<8x64xf32>
    %cst_130 = arith.constant 1.000000e+00 : f32
    %358 = vector.broadcast %cst_130 : f32 to vector<8x64xf32>
    %359 = arith.divf %358, %357 : vector<8x64xf32>
    %360 = vector.extract_strided_slice %351 {offsets = [0, 64], sizes = [8, 64], strides = [1, 1]} : vector<8x256xf32> to vector<8x64xf32>
    %cst_131 = arith.constant 0.000000e+00 : f32
    %361 = vector.broadcast %cst_131 : f32 to vector<8x64xf32>
    %362 = arith.subf %361, %360 : vector<8x64xf32>
    %363 = math.exp %362 : vector<8x64xf32>
    %cst_132 = arith.constant 1.000000e+00 : f32
    %364 = vector.broadcast %cst_132 : f32 to vector<8x64xf32>
    %365 = arith.addf %364, %363 : vector<8x64xf32>
    %cst_133 = arith.constant 1.000000e+00 : f32
    %366 = vector.broadcast %cst_133 : f32 to vector<8x64xf32>
    %367 = arith.divf %366, %365 : vector<8x64xf32>
    %368 = vector.extract_strided_slice %351 {offsets = [0, 128], sizes = [8, 64], strides = [1, 1]} : vector<8x256xf32> to vector<8x64xf32>
    %369 = math.tanh %368 : vector<8x64xf32>
    %370 = vector.extract_strided_slice %351 {offsets = [0, 192], sizes = [8, 64], strides = [1, 1]} : vector<8x256xf32> to vector<8x64xf32>
    %cst_134 = arith.constant 0.000000e+00 : f32
    %371 = vector.broadcast %cst_134 : f32 to vector<8x64xf32>
    %372 = arith.subf %371, %370 : vector<8x64xf32>
    %373 = math.exp %372 : vector<8x64xf32>
    %cst_135 = arith.constant 1.000000e+00 : f32
    %374 = vector.broadcast %cst_135 : f32 to vector<8x64xf32>
    %375 = arith.addf %374, %373 : vector<8x64xf32>
    %cst_136 = arith.constant 1.000000e+00 : f32
    %376 = vector.broadcast %cst_136 : f32 to vector<8x64xf32>
    %377 = arith.divf %376, %375 : vector<8x64xf32>
    %378 = arith.mulf %367, %341 : vector<8x64xf32>
    %379 = arith.mulf %359, %369 : vector<8x64xf32>
    %380 = arith.addf %378, %379 : vector<8x64xf32>
    %381 = math.tanh %380 : vector<8x64xf32>
    %382 = arith.mulf %377, %381 : vector<8x64xf32>
    %383 = arith.truncf %382 : vector<8x64xf32> to vector<8x64xbf16>
    %c8 = arith.constant 8 : index
    %c0_137 = arith.constant 0 : index
    %c0_138 = arith.constant 0 : index
    %384 = vector.load %arg8[%c8, %c0_137, %c0_138] : memref<10x64x256xbf16, #tpu.memory_space<vmem>>, vector<1x64x256xbf16>
    %385 = vector.shape_cast %384 : vector<1x64x256xbf16> to vector<64x256xbf16>
    %cst_139 = arith.constant dense<0.000000e+00> : vector<8x256xf32>
    %386 = tpu.matmul %383, %385, %cst_139 {dimension_numbers = #tpu.dot_dimension_numbers<[1], [0], [0], [1], [0, 0, 1, 1], [], []>} : vector<8x64xbf16>, vector<64x256xbf16>, vector<8x256xf32> -> vector<8x256xf32>
    %387 = arith.addf %348, %386 : vector<8x256xf32>
    %388 = vector.extract_strided_slice %31 {offsets = [72, 0], sizes = [8, 256], strides = [1, 1]} : vector<80x256xf32> to vector<8x256xf32>
    %cst_140 = arith.constant dense<0.000000e+00> : vector<8x256xf32>
    %389 = tpu.matmul %382, %33, %cst_140 {dimension_numbers = #tpu.dot_dimension_numbers<[1], [0], [0], [1], [0, 0, 1, 1], [], []>} : vector<8x64xf32>, vector<64x256xf32>, vector<8x256xf32> -> vector<8x256xf32>
    %390 = arith.addf %388, %389 : vector<8x256xf32>
    %391 = vector.extract_strided_slice %390 {offsets = [0, 0], sizes = [8, 64], strides = [1, 1]} : vector<8x256xf32> to vector<8x64xf32>
    %cst_141 = arith.constant 0.000000e+00 : f32
    %392 = vector.broadcast %cst_141 : f32 to vector<8x64xf32>
    %393 = arith.subf %392, %391 : vector<8x64xf32>
    %394 = math.exp %393 : vector<8x64xf32>
    %cst_142 = arith.constant 1.000000e+00 : f32
    %395 = vector.broadcast %cst_142 : f32 to vector<8x64xf32>
    %396 = arith.addf %395, %394 : vector<8x64xf32>
    %cst_143 = arith.constant 1.000000e+00 : f32
    %397 = vector.broadcast %cst_143 : f32 to vector<8x64xf32>
    %398 = arith.divf %397, %396 : vector<8x64xf32>
    %399 = vector.extract_strided_slice %390 {offsets = [0, 64], sizes = [8, 64], strides = [1, 1]} : vector<8x256xf32> to vector<8x64xf32>
    %cst_144 = arith.constant 0.000000e+00 : f32
    %400 = vector.broadcast %cst_144 : f32 to vector<8x64xf32>
    %401 = arith.subf %400, %399 : vector<8x64xf32>
    %402 = math.exp %401 : vector<8x64xf32>
    %cst_145 = arith.constant 1.000000e+00 : f32
    %403 = vector.broadcast %cst_145 : f32 to vector<8x64xf32>
    %404 = arith.addf %403, %402 : vector<8x64xf32>
    %cst_146 = arith.constant 1.000000e+00 : f32
    %405 = vector.broadcast %cst_146 : f32 to vector<8x64xf32>
    %406 = arith.divf %405, %404 : vector<8x64xf32>
    %407 = vector.extract_strided_slice %390 {offsets = [0, 128], sizes = [8, 64], strides = [1, 1]} : vector<8x256xf32> to vector<8x64xf32>
    %408 = math.tanh %407 : vector<8x64xf32>
    %409 = vector.extract_strided_slice %390 {offsets = [0, 192], sizes = [8, 64], strides = [1, 1]} : vector<8x256xf32> to vector<8x64xf32>
    %cst_147 = arith.constant 0.000000e+00 : f32
    %410 = vector.broadcast %cst_147 : f32 to vector<8x64xf32>
    %411 = arith.subf %410, %409 : vector<8x64xf32>
    %412 = math.exp %411 : vector<8x64xf32>
    %cst_148 = arith.constant 1.000000e+00 : f32
    %413 = vector.broadcast %cst_148 : f32 to vector<8x64xf32>
    %414 = arith.addf %413, %412 : vector<8x64xf32>
    %cst_149 = arith.constant 1.000000e+00 : f32
    %415 = vector.broadcast %cst_149 : f32 to vector<8x64xf32>
    %416 = arith.divf %415, %414 : vector<8x64xf32>
    %417 = arith.mulf %406, %380 : vector<8x64xf32>
    %418 = arith.mulf %398, %408 : vector<8x64xf32>
    %419 = arith.addf %417, %418 : vector<8x64xf32>
    %420 = math.tanh %419 : vector<8x64xf32>
    %421 = arith.mulf %416, %420 : vector<8x64xf32>
    %422 = arith.truncf %421 : vector<8x64xf32> to vector<8x64xbf16>
    %c9 = arith.constant 9 : index
    %c0_150 = arith.constant 0 : index
    %c0_151 = arith.constant 0 : index
    %423 = vector.load %arg8[%c9, %c0_150, %c0_151] : memref<10x64x256xbf16, #tpu.memory_space<vmem>>, vector<1x64x256xbf16>
    %424 = vector.shape_cast %423 : vector<1x64x256xbf16> to vector<64x256xbf16>
    %cst_152 = arith.constant dense<0.000000e+00> : vector<8x256xf32>
    %425 = tpu.matmul %422, %424, %cst_152 {dimension_numbers = #tpu.dot_dimension_numbers<[1], [0], [0], [1], [0, 0, 1, 1], [], []>} : vector<8x64xbf16>, vector<64x256xbf16>, vector<8x256xf32> -> vector<8x256xf32>
    %426 = arith.addf %387, %425 : vector<8x256xf32>
    %c0_153 = arith.constant 0 : index
    %c0_154 = arith.constant 0 : index
    %427 = vector.load %arg9[%c0_153, %c0_154] : memref<1x256xf32, #tpu.memory_space<vmem>>, vector<1x256xf32>
    %428 = vector.broadcast %427 : vector<1x256xf32> to vector<8x256xf32>
    %429 = arith.addf %426, %428 : vector<8x256xf32>
    %c0_155 = arith.constant 0 : index
    %c0_156 = arith.constant 0 : index
    %430 = vector.load %arg10[%c0_155, %c0_156] : memref<256x128xbf16, #tpu.memory_space<vmem>>, vector<256x128xbf16>
    %431 = arith.extf %430 : vector<256x128xbf16> to vector<256x128xf32>
    %cst_157 = arith.constant dense<0.000000e+00> : vector<8x128xf32>
    %432 = tpu.matmul %429, %431, %cst_157 {dimension_numbers = #tpu.dot_dimension_numbers<[1], [0], [0], [1], [0, 0, 1, 1], [], []>} : vector<8x256xf32>, vector<256x128xf32>, vector<8x128xf32> -> vector<8x128xf32>
    %c0_158 = arith.constant 0 : index
    %c0_159 = arith.constant 0 : index
    %433 = vector.load %arg11[%c0_158, %c0_159] : memref<1x128xf32, #tpu.memory_space<vmem>>, vector<1x128xf32>
    %434 = vector.broadcast %433 : vector<1x128xf32> to vector<8x128xf32>
    %435 = arith.addf %432, %434 : vector<8x128xf32>
    %c0_160 = arith.constant 0 : index
    %c0_161 = arith.constant 0 : index
    %436 = vector.load %arg12[%c0_160, %c0_161] : memref<128x2xf32, #tpu.memory_space<vmem>>, vector<128x2xf32>
    %cst_162 = arith.constant dense<0.000000e+00> : vector<8x2xf32>
    %437 = tpu.matmul %435, %436, %cst_162 {dimension_numbers = #tpu.dot_dimension_numbers<[1], [0], [0], [1], [0, 0, 1, 1], [], []>} : vector<8x128xf32>, vector<128x2xf32>, vector<8x2xf32> -> vector<8x2xf32>
    %c0_163 = arith.constant 0 : index
    %c0_164 = arith.constant 0 : index
    %438 = vector.load %arg13[%c0_163, %c0_164] : memref<1x2xf32, #tpu.memory_space<vmem>>, vector<1x2xf32>
    %439 = vector.broadcast %438 : vector<1x2xf32> to vector<8x2xf32>
    %440 = arith.addf %437, %439 : vector<8x2xf32>
    %cst_165 = arith.constant dense<0xFF800000> : vector<8xf32>
    %441 = vector.multi_reduction <maximumf>, %440, %cst_165 [1] : vector<8x2xf32> to vector<8xf32>
    %442 = vector.shape_cast %441 : vector<8xf32> to vector<8x1xf32>
    %443 = vector.broadcast %442 : vector<8x1xf32> to vector<8x2xf32>
    %444 = arith.subf %440, %443 : vector<8x2xf32>
    %445 = math.exp %444 : vector<8x2xf32>
    %cst_166 = arith.constant dense<0.000000e+00> : vector<8xf32>
    %446 = vector.multi_reduction <add>, %445, %cst_166 [1] : vector<8x2xf32> to vector<8xf32>
    %447 = vector.shape_cast %446 : vector<8xf32> to vector<8x1xf32>
    %448 = vector.broadcast %447 : vector<8x1xf32> to vector<8x2xf32>
    %449 = arith.divf %445, %448 : vector<8x2xf32>
    %c0_167 = arith.constant 0 : index
    %c0_168 = arith.constant 0 : index
    %450 = vector.load %arg14[%c0_167, %c0_168] : memref<8x2xf32, #tpu.memory_space<vmem>>, vector<8x2xf32>
    tpu.vector_store %arg14[%c0_167, %c0_168], %449 {strides = array<i32>} : memref<8x2xf32, #tpu.memory_space<vmem>>, vector<8x2xf32>,
    return
  }
}

</mosaic_0001>

<bundles_post_ra>
// kernel: tpu_custom_call.1
= control target key start
LH: loop header
LB: loop body
LE: loop exit
PB: predicated region body
PF: predicated region fallthrough
CT: control target
= control target key end

     0   :  { %vm158_vm0 = vcmask 850944   ;;  %vm748_vm1 = vcmask 261120   ;;  %vm1405_vm2 = vcmask 64512   ;;  %vm1554_vm11 = vcmask 523264   ;;  %s6454_s1 = inlined_call_operand.vmem [shape: bf16[104,32], index: 1, kind: input, shape index: {}]   ;;  %s6455_s2 = inlined_call_operand.vmem [shape: f32[1,32], index: 2, kind: input, shape index: {}]   ;;  %s6456_s0 = inlined_call_operand.vmem [shape: f32[640,104], index: 0, kind: input, shape index: {}]   ;;  %s6457_s3 = inlined_call_operand.vmem [shape: bf16[32,8], index: 3, kind: input, shape index: {}]   ;;  %s6458_s4 = inlined_call_operand.vmem [shape: f32[1,8], index: 4, kind: input, shape index: {}]   ;;  %s6459_s5 = inlined_call_operand.vmem [shape: bf16[8,256], index: 5, kind: input, shape index: {}]   ;;  %s6460_s6 = inlined_call_operand.vmem [shape: bf16[64,256], index: 6, kind: input, shape index: {}]   ;;  %s6461_s7 = inlined_call_operand.vmem [shape: f32[1,256], index: 7, kind: input, shape index: {}]   ;;  %s6462_s8 = inlined_call_operand.vmem [shape: bf16[10,64,256], index: 8, kind: input, shape index: {}]   ;;  %s6463_s10 = inlined_call_operand.vmem [shape: bf16[256,128], index: 10, kind: input, shape index: {}]   ;;  %s6464_s11 = inlined_call_operand.vmem [shape: f32[1,128], index: 11, kind: input, shape index: {}]   ;;  %s6465_s12 = inlined_call_operand.vmem [shape: f32[128,2], index: 12, kind: input, shape index: {}]   ;;  %s6466_s9 = inlined_call_operand.vmem [shape: f32[1,256], index: 9, kind: input, shape index: {}]   ;;  %s6467_s13 = inlined_call_operand.vmem [shape: f32[1,2], index: 13, kind: input, shape index: {}]   ;;  %s6468_s14 = inlined_call_operand.vmem [shape: f32[8,2], index: 14, kind: output, shape index: {}]  }
   0x1   :  { %v140_v0 = vld [vmem:[%s6454_s1 + $0x30] sm:$0xf]  ;;  %v4314_v1 = vld [vmem:[%s6454_s1 + $0x28] sm:$0xff]   ;;  %v4313_v4 = vld [vmem:[%s6454_s1 + $0x20] sm:$0xff]  }
   0x2   :  { %v153_v2 = vunpack.c.l.bf16 %v140_v0  ;;  %v4237_v3 = vunpack.c.h.bf16 %v4314_v1  ;;  %v4236_v5 = vunpack.c.l.bf16 %v4314_v1  ;;  %v4233_v6 = vunpack.c.h.bf16 %v4313_v4  ;;  %v4312_v7 = vld [vmem:[%s6454_s1 + $0x18] sm:$0xff]   ;;  %v4311_v10 = vld [vmem:[%s6454_s1 + $0x10] sm:$0xff]   ;;  %v4310_v13 = vld [vmem:[%s6454_s1 + $0x8] sm:$0xff]  }
   0x3   :  { %v4232_v8 = vunpack.c.l.bf16 %v4313_v4  ;;  %v4229_v9 = vunpack.c.h.bf16 %v4312_v7  ;;  %v4228_v11 = vunpack.c.l.bf16 %v4312_v7  ;;  %v4225_v12 = vunpack.c.h.bf16 %v4311_v10  ;;  %v4215_v16 = vld [vmem:[%s6454_s1] sm:$0xff]   ;;  %v49_v21 = vld [vmem:[%s6456_s0 + $0x8] sm:$0xff]  ;;  %v50_v22 = vld [vmem:[%s6456_s0 + $0x10] sm:$0xff] }
   0x4   :  { %402 = vmatpush.msra.mxu0 %v153_v2  ;;  %4331 = vmatpush.msra.mxu3 %v153_v2  ;;  %v4224_v14 = vunpack.c.l.bf16 %v4311_v10  ;;  %v4221_v15 = vunpack.c.h.bf16 %v4310_v13  ;;  %v4220_v17 = vunpack.c.l.bf16 %v4310_v13  ;;  %v4217_v18 = vunpack.c.h.bf16 %v4215_v16  ;;  %v48_v20 = vld [vmem:[%s6456_s0] sm:$0xff]  ;;  %v51_v23 = vld [vmem:[%s6456_s0 + $0x18] sm:$0xff]  ;;  %v53_v25 = vld [vmem:[%s6456_s0 + $0x28] sm:$0xff] }
   0x5   :  { %v4216_v19 = vunpack.c.l.bf16 %v4215_v16  ;;  %v52_v24 = vld [vmem:[%s6456_s0 + $0x20] sm:$0xff]  ;;  %v54_v26 = vld [vmem:[%s6456_s0 + $0x30] sm:$0xff]  ;;  %v55_v27 = vld [vmem:[%s6456_s0 + $0x38] sm:$0xff] }
   0x6   :  { %403 = vmatpush.msra.mxu0 %v4237_v3  ;;  %4332 = vmatpush.msra.mxu3 %v4237_v3  ;;  %v56_v28 = vld [vmem:[%s6456_s0 + $0x40] sm:$0xff]  ;;  %v57_v29 = vld [vmem:[%s6456_s0 + $0x48] sm:$0xff]  ;;  %v58_v30 = vld [vmem:[%s6456_s0 + $0x50] sm:$0xff] }
   0x7   :  { %v59_v31 = vld [vmem:[%s6456_s0 + $0x58] sm:$0xff]  ;;  %v4315_v32 = vld [vmem:[%s6457_s3 + $0x8] sm:$0xff]   ;;  %v4239_v35 = vld [vmem:[%s6457_s3] sm:$0xff]  }
   0x8   :  { %404 = vmatpush.msra.mxu0 %v4236_v5  ;;  %4333 = vmatpush.msra.mxu3 %v4236_v5  ;;  %v4245_v33 = vunpack.c.h.bf16 %v4315_v32  ;;  %v4244_v34 = vunpack.c.l.bf16 %v4315_v32  ;;  %v60_v36 = vld [vmem:[%s6456_s0 + $0x60] sm:$0xff]  ;;  %v4241_v37 = vunpack.c.h.bf16 %v4239_v35  ;;  %v4240_v38 = vunpack.c.l.bf16 %v4239_v35  ;;  %v61_v39 = vld [vmem:[%s6456_s0 + $0x68] sm:$0xff]  ;;  %v62_v40 = vld [vmem:[%s6456_s0 + $0x70] sm:$0xff] }
   0x9   :  { %v63_v41 = vld [vmem:[%s6456_s0 + $0x78] sm:$0xff]  ;;  %v4650_v42 = vld [vmem:[%s6455_s2] ss:$0 sm:$0xff]  ;;  %v65_v48 = vld [vmem:[%s6456_s0 + $0x88] sm:$0xff] }
   0xa   :  { %405 = vmatpush.msra.mxu0 %v4233_v6  ;;  %4334 = vmatpush.msra.mxu3 %v4233_v6  ;;  %v64_v44 = vld [vmem:[%s6456_s0 + $0x80] sm:$0xff]  ;;  %v66_v52 = vld [vmem:[%s6456_s0 + $0x90] sm:$0xff]  ;;  %v67_v56 = vld [vmem:[%s6456_s0 + $0x98] sm:$0xff] }
   0xb   :  { %1001 = vmatpush.msra.mxu1 %v4245_v33  ;;  %4344 = vmatpush.msra.mxu2 %v4245_v33  ;;  %v68_v60 = vld [vmem:[%s6456_s0 + $0xa0] sm:$0xff]  ;;  %v69_v0 = vld [vmem:[%s6456_s0 + $0xa8] sm:$0xff]  ;;  %v115_v3 = vld [vmem:[%s6456_s0 + $0x218] sm:$0xff] }
   0xc   :  { %406 = vmatpush.msra.mxu0 %v4232_v8  ;;  %4335 = vmatpush.msra.mxu3 %v4232_v8  ;;  %v70_v5 = vld [vmem:[%s6456_s0 + $0xb0] sm:$0xff]  ;;  %v116_v8 = vld [vmem:[%s6456_s0 + $0x220] sm:$0xff]  ;;  %v71_v10 = vld [vmem:[%s6456_s0 + $0xb8] sm:$0xff] }
   0xd   :  { %1002 = vmatpush.msra.mxu1 %v4244_v34  ;;  %4345 = vmatpush.msra.mxu2 %v4244_v34  ;;  %v117_v13 = vld [vmem:[%s6456_s0 + $0x228] sm:$0xff]  ;;  %v76_v35 = vld [vmem:[%s6456_s0 + $0xe0] sm:$0xff] }
   0xe   :  { %407 = vmatpush.msra.mxu0 %v4229_v9  ;;  %4336 = vmatpush.msra.mxu3 %v4229_v9  ;;  %v121_v33 = vld [vmem:[%s6456_s0 + $0x248] sm:$0xff] }
   0xf   :  { %1003 = vmatpush.msra.mxu1 %v4241_v37  ;;  %4346 = vmatpush.msra.mxu2 %v4241_v37 }
  0x10   :  { %408 = vmatpush.msra.mxu0 %v4228_v11  ;;  %4337 = vmatpush.msra.mxu3 %v4228_v11 }
  0x11   :  { %1004 = vmatpush.msra.mxu1 %v4240_v38  ;;  %4347 = vmatpush.msra.mxu2 %v4240_v38  ;;  %v122_v38 = vld [vmem:[%s6456_s0 + $0x250] sm:$0xff] }
  0x12   :  { %409 = vmatpush.msra.mxu0 %v4225_v12  ;;  %4338 = vmatpush.msra.mxu3 %v4225_v12 }
  0x14   :  { %410 = vmatpush.msra.mxu0 %v4224_v14  ;;  %4339 = vmatpush.msra.mxu3 %v4224_v14 }
  0x16   :  { %411 = vmatpush.msra.mxu0 %v4221_v15  ;;  %4340 = vmatpush.msra.mxu3 %v4221_v15  ;;  %v72_v15 = vld [vmem:[%s6456_s0 + $0xc0] sm:$0xff] }
  0x18   :  { %412 = vmatpush.msra.mxu0 %v4220_v17  ;;  %4341 = vmatpush.msra.mxu3 %v4220_v17 }
  0x1a   :  { %413 = vmatpush.msra.mxu0 %v4217_v18  ;;  %4342 = vmatpush.msra.mxu3 %v4217_v18  ;;  %v118_v18 = vld [vmem:[%s6456_s0 + $0x230] sm:$0xff] }
  0x1c   :  { %414 = vmatpush.msra.mxu0 %v4216_v19  ;;  %4343 = vmatpush.msra.mxu3 %v4216_v19 }
  0x1d   :  { %3524 = vmatmul.msk.f32.vlgmr.msra.gmra.mxu0 %vm158_vm0, %v48_v20  ;;  %3591 = vmatmul.msk.f32.vlgmr.msra.gmra.mxu3 %vm158_vm0, %v115_v3  ;;  %v73_v20 = vld [vmem:[%s6456_s0 + $0xc8] sm:$0xff] }
  0x25   :  { %3525 = vmatmul.msk.f32.gmra.mxu0 %vm158_vm0, %v49_v21  ;;  %3592 = vmatmul.msk.f32.gmra.mxu3 %vm158_vm0, %v116_v8 }
  0x2d   :  { %3526 = vmatmul.msk.f32.gmra.mxu0 %vm158_vm0, %v50_v22  ;;  %3593 = vmatmul.msk.f32.gmra.mxu3 %vm158_vm0, %v117_v13 }
  0x35   :  { %3527 = vmatmul.msk.f32.gmra.mxu0 %vm158_vm0, %v51_v23  ;;  %3594 = vmatmul.msk.f32.gmra.mxu3 %vm158_vm0, %v118_v18  ;;  %v119_v23 = vld [vmem:[%s6456_s0 + $0x238] sm:$0xff] }
  0x3d   :  { %3528 = vmatmul.msk.f32.gmra.mxu0 %vm158_vm0, %v52_v24  ;;  %3595 = vmatmul.msk.f32.gmra.mxu3 %vm158_vm0, %v119_v23 }
  0x45   :  { %3529 = vmatmul.msk.f32.gmra.mxu0 %vm158_vm0, %v53_v25  ;;  %v74_v25 = vld [vmem:[%s6456_s0 + $0xd0] sm:$0xff] }
  0x4d   :  { %3530 = vmatmul.msk.f32.gmra.mxu0 %vm158_vm0, %v54_v26 }
  0x55   :  { %3531 = vmatmul.msk.f32.gmra.mxu0 %vm158_vm0, %v55_v27 }
  0x5d   :  { %3532 = vmatmul.msk.f32.gmra.mxu0 %vm158_vm0, %v56_v28  ;;  %v120_v28 = vld [vmem:[%s6456_s0 + $0x240] sm:$0xff] }
  0x5e   :  { %3596 = vmatmul.msk.f32.gmra.mxu3 %vm158_vm0, %v120_v28 }
  0x65   :  { %3533 = vmatmul.msk.f32.gmra.mxu0 %vm158_vm0, %v57_v29 }
  0x66   :  { %3597 = vmatmul.msk.f32.gmra.mxu3 %vm158_vm0, %v121_v33 }
  0x6d   :  { %3534 = vmatmul.msk.f32.gmra.mxu0 %vm158_vm0, %v58_v30  ;;  %v75_v30 = vld [vmem:[%s6456_s0 + $0xd8] sm:$0xff] }
  0x6e   :  { %3598 = vmatmul.msk.f32.gmra.mxu3 %vm158_vm0, %v122_v38 }
  0x75   :  { %3535 = vmatmul.msk.f32.gmra.mxu0 %vm158_vm0, %v59_v31 }
  0x7d   :  { %3536 = vmatmul.msk.f32.gmra.mxu0 %vm158_vm0, %v60_v36 }
  0x85   :  { %3537 = vmatmul.msk.f32.gmra.mxu0 %vm158_vm0, %v61_v39 }
  0x8d   :  { %3538 = vmatmul.msk.f32.gmra.mxu0 %vm158_vm0, %v62_v40  ;;  %v77_v40 = vld [vmem:[%s6456_s0 + $0xe8] sm:$0xff] }
  0x95   :  { %3539 = vmatmul.msk.f32.gmra.mxu0 %vm158_vm0, %v63_v41 }
  0x9a   :  { %v416_v43 = vpop.f32.mrf.mxu0 }
  0x9b   :  { %v417_v45 = vadd.f32 %v4650_v42, %v416_v43 }
  0x9d   :  { %v656_v46 = vmax.f32 %v417_v45, 0.0  ;;  %3540 = vmatmul.msk.f32.gmra.mxu0 %vm158_vm0, %v64_v44  ;;  %v123_v44 = vld [vmem:[%s6456_s0 + $0x258] sm:$0xff] }
  0x9e   :  { %3599 = vmatmul.msk.f32.gmra.mxu3 %vm158_vm0, %v123_v44 }
  0x9f   :  { %3604 = vmatmul.msk.f32.vlgmr.msra.gmra.mxu1 %vm748_vm1, %v656_v46  ;;  %v78_v46 = vld [vmem:[%s6456_s0 + $0xf0] sm:$0xff] }
  0xa2   :  { %v419_v47 = vpop.f32.mrf.mxu0 }
  0xa3   :  { %v420_v49 = vadd.f32 %v4650_v42, %v419_v47 }
  0xa5   :  { %v657_v50 = vmax.f32 %v420_v49, 0.0  ;;  %3541 = vmatmul.msk.f32.gmra.mxu0 %vm158_vm0, %v65_v48  ;;  %v124_v49 = vld [vmem:[%s6456_s0 + $0x260] sm:$0xff] }
  0xa6   :  { %3600 = vmatmul.msk.f32.gmra.mxu3 %vm158_vm0, %v124_v49 }
  0xa7   :  { %3605 = vmatmul.msk.f32.gmra.mxu1 %vm748_vm1, %v657_v50 }
  0xaa   :  { %v422_v51 = vpop.f32.mrf.mxu0 }
  0xab   :  { %v423_v53 = vadd.f32 %v4650_v42, %v422_v51  ;;  %v79_v51 = vld [vmem:[%s6456_s0 + $0xf8] sm:$0xff] }
  0xad   :  { %v658_v54 = vmax.f32 %v423_v53, 0.0  ;;  %3542 = vmatmul.msk.f32.gmra.mxu0 %vm158_vm0, %v66_v52 }
  0xaf   :  { %3606 = vmatmul.msk.f32.gmra.mxu1 %vm748_vm1, %v658_v54  ;;  %v125_v54 = vld [vmem:[%s6456_s0 + $0x268] sm:$0xff] }
  0xb0   :  { %3601 = vmatmul.msk.f32.gmra.mxu3 %vm158_vm0, %v125_v54 }
  0xb2   :  { %v425_v55 = vpop.f32.mrf.mxu0 }
  0xb3   :  { %v426_v57 = vadd.f32 %v4650_v42, %v425_v55 }
  0xb5   :  { %v659_v58 = vmax.f32 %v426_v57, 0.0  ;;  %3543 = vmatmul.msk.f32.gmra.mxu0 %vm158_vm0, %v67_v56  ;;  %v80_v56 = vld [vmem:[%s6456_s0 + $0x100] sm:$0xff] }
  0xb7   :  { %3607 = vmatmul.msk.f32.gmra.mxu1 %vm748_vm1, %v659_v58 }
  0xba   :  { %v428_v59 = vpop.f32.mrf.mxu0 }
  0xbb   :  { %v429_v61 = vadd.f32 %v4650_v42, %v428_v59 }
  0xbd   :  { %v660_v62 = vmax.f32 %v429_v61, 0.0  ;;  %3544 = vmatmul.msk.f32.gmra.mxu0 %vm158_vm0, %v68_v60  ;;  %v126_v60 = vld [vmem:[%s6456_s0 + $0x270] sm:$0xff] }
  0xbe   :  { %3602 = vmatmul.msk.f32.gmra.mxu3 %vm158_vm0, %v126_v60 }
  0xbf   :  { %3608 = vmatmul.msk.f32.gmra.mxu1 %vm748_vm1, %v660_v62  ;;  %v81_v62 = vld [vmem:[%s6456_s0 + $0x108] sm:$0xff] }
  0xc2   :  { %v431_v63 = vpop.f32.mrf.mxu0 }
  0xc3   :  { %v432_v1 = vadd.f32 %v4650_v42, %v431_v63 }
  0xc5   :  { %v661_v2 = vmax.f32 %v432_v1, 0.0  ;;  %3545 = vmatmul.msk.f32.gmra.mxu0 %vm158_vm0, %v69_v0 }
  0xc7   :  { %3609 = vmatmul.msk.f32.gmra.mxu1 %vm748_vm1, %v661_v2  ;;  %v127_v2 = vld [vmem:[%s6456_s0 + $0x278] sm:$0xff] }
  0xc8   :  { %3603 = vmatmul.msk.f32.gmra.mxu3 %vm158_vm0, %v127_v2 }
  0xca   :  { %v434_v4 = vpop.f32.mrf.mxu0 }
  0xcb   :  { %v435_v6 = vadd.f32 %v4650_v42, %v434_v4  ;;  %v82_v4 = vld [vmem:[%s6456_s0 + $0x110] sm:$0xff] }
  0xcd   :  { %v662_v7 = vmax.f32 %v435_v6, 0.0  ;;  %3546 = vmatmul.msk.f32.gmra.mxu0 %vm158_vm0, %v70_v5 }
  0xcf   :  { %3610 = vmatmul.msk.f32.gmra.mxu1 %vm748_vm1, %v662_v7 }
  0xd2   :  { %v437_v9 = vpop.f32.mrf.mxu0 }
  0xd3   :  { %v438_v11 = vadd.f32 %v4650_v42, %v437_v9  ;;  %v83_v9 = vld [vmem:[%s6456_s0 + $0x118] sm:$0xff] }
  0xd5   :  { %v663_v12 = vmax.f32 %v438_v11, 0.0  ;;  %3547 = vmatmul.msk.f32.gmra.mxu0 %vm158_vm0, %v71_v10 }
  0xd7   :  { %3611 = vmatmul.msk.f32.gmra.mxu1 %vm748_vm1, %v663_v12 }
  0xda   :  { %v440_v14 = vpop.f32.mrf.mxu0 }
  0xdb   :  { %v441_v16 = vadd.f32 %v4650_v42, %v440_v14  ;;  %v84_v14 = vld [vmem:[%s6456_s0 + $0x120] sm:$0xff] }
  0xdd   :  { %v664_v17 = vmax.f32 %v441_v16, 0.0  ;;  %3548 = vmatmul.msk.f32.gmra.mxu0 %vm158_vm0, %v72_v15 }
  0xdf   :  { %3612 = vmatmul.msk.f32.gmra.mxu1 %vm748_vm1, %v664_v17 }
  0xe2   :  { %v443_v19 = vpop.f32.mrf.mxu0 }
  0xe3   :  { %v444_v21 = vadd.f32 %v4650_v42, %v443_v19  ;;  %v85_v19 = vld [vmem:[%s6456_s0 + $0x128] sm:$0xff] }
  0xe5   :  { %v665_v22 = vmax.f32 %v444_v21, 0.0  ;;  %3549 = vmatmul.msk.f32.gmra.mxu0 %vm158_vm0, %v73_v20 }
  0xe7   :  { %3613 = vmatmul.msk.f32.gmra.mxu1 %vm748_vm1, %v665_v22 }
  0xea   :  { %v446_v24 = vpop.f32.mrf.mxu0 }
  0xeb   :  { %v447_v26 = vadd.f32 %v4650_v42, %v446_v24  ;;  %v86_v24 = vld [vmem:[%s6456_s0 + $0x130] sm:$0xff] }
  0xed   :  { %v666_v27 = vmax.f32 %v447_v26, 0.0  ;;  %3550 = vmatmul.msk.f32.gmra.mxu0 %vm158_vm0, %v74_v25 }
  0xef   :  { %3614 = vmatmul.msk.f32.gmra.mxu1 %vm748_vm1, %v666_v27  ;;  %v4854_v27 = vpop.f32.mrf.mxu3 }
  0xf2   :  { %v449_v29 = vpop.f32.mrf.mxu0 }
  0xf3   :  { %v450_v31 = vadd.f32 %v4650_v42, %v449_v29 }
  0xf5   :  { %v667_v32 = vmax.f32 %v450_v31, 0.0  ;;  %3551 = vmatmul.msk.f32.gmra.mxu0 %vm158_vm0, %v75_v30  ;;  %v87_v30 = vld [vmem:[%s6456_s0 + $0x138] sm:$0xff] }
  0xf7   :  { %3615 = vmatmul.msk.f32.gmra.mxu1 %vm748_vm1, %v667_v32  ;;  %v4864_v33 = vpop.f32.mrf.mxu3 }
  0xfa   :  { %v452_v34 = vpop.f32.mrf.mxu0 }
  0xfb   :  { %v453_v36 = vadd.f32 %v4650_v42, %v452_v34 }
  0xfd   :  { %v668_v37 = vmax.f32 %v453_v36, 0.0  ;;  %3552 = vmatmul.msk.f32.gmra.mxu0 %vm158_vm0, %v76_v35  ;;  %v88_v36 = vld [vmem:[%s6456_s0 + $0x140] sm:$0xff] }
  0xff   :  { %3616 = vmatmul.msk.f32.gmra.mxu1 %vm748_vm1, %v668_v37 }
 0x102   :  { %v455_v39 = vpop.f32.mrf.mxu0 }
 0x103   :  { %v456_v41 = vadd.f32 %v4650_v42, %v455_v39  ;;  %v623_v39 = vpop.f32.mrf.mxu3 }
 0x105   :  { %v669_v43 = vmax.f32 %v456_v41, 0.0  ;;  %3553 = vmatmul.msk.f32.gmra.mxu0 %vm158_vm0, %v77_v40  ;;  %v624_v41 = vadd.f32 %v4650_v42, %v623_v39 }
 0x107   :  { %3617 = vmatmul.msk.f32.gmra.mxu1 %vm748_vm1, %v669_v43  ;;  %v725_v43 = vmax.f32 %v624_v41, 0.0 }
 0x109   :  { %3673 = vmatmul.msk.f32.vlgmr.msra.gmra.mxu2 %vm748_vm1, %v725_v43 }
 0x10a   :  { %v458_v45 = vpop.f32.mrf.mxu0 }
 0x10b   :  { %v459_v47 = vadd.f32 %v4650_v42, %v458_v45  ;;  %v89_v45 = vld [vmem:[%s6456_s0 + $0x148] sm:$0xff] }
 0x10d   :  { %v670_v48 = vmax.f32 %v459_v47, 0.0  ;;  %3554 = vmatmul.msk.f32.gmra.mxu0 %vm158_vm0, %v78_v46 }
 0x10f   :  { %3618 = vmatmul.msk.f32.gmra.mxu1 %vm748_vm1, %v670_v48  ;;  %v626_v48 = vpop.f32.mrf.mxu3 }
 0x112   :  { %v461_v50 = vpop.f32.mrf.mxu0 }
 0x113   :  { %v462_v52 = vadd.f32 %v4650_v42, %v461_v50  ;;  %v627_v50 = vadd.f32 %v4650_v42, %v626_v48 }
 0x115   :  { %v671_v53 = vmax.f32 %v462_v52, 0.0  ;;  %3555 = vmatmul.msk.f32.gmra.mxu0 %vm158_vm0, %v79_v51  ;;  %v726_v51 = vmax.f32 %v627_v50, 0.0  ;;  %v96_v50 = vld [vmem:[%s6456_s0 + $0x180] sm:$0xff] }
 0x117   :  { %3619 = vmatmul.msk.f32.gmra.mxu1 %vm748_vm1, %v671_v53  ;;  %3674 = vmatmul.msk.f32.gmra.mxu2 %vm748_vm1, %v726_v51  ;;  %v90_v53 = vld [vmem:[%s6456_s0 + $0x150] sm:$0xff] }
 0x11a   :  { %v464_v55 = vpop.f32.mrf.mxu0 }
 0x11b   :  { %v465_v57 = vadd.f32 %v4650_v42, %v464_v55 }
 0x11c   :  { %v4796_v58 = vpop.f32.mrf.mxu1 }
 0x11d   :  { %v672_v59 = vmax.f32 %v465_v57, 0.0  ;;  %3556 = vmatmul.msk.f32.gmra.mxu0 %vm158_vm0, %v80_v56  ;;  %v629_v56 = vpop.f32.mrf.mxu3 }
 0x11f   :  { %3620 = vmatmul.msk.f32.gmra.mxu1 %vm748_vm1, %v672_v59  ;;  %v630_v59 = vadd.f32 %v4650_v42, %v629_v56 }
 0x121   :  { %v727_v60 = vmax.f32 %v630_v59, 0.0 }
 0x122   :  { %v467_v61 = vpop.f32.mrf.mxu0 }
 0x123   :  { %v468_v63 = vadd.f32 %v4650_v42, %v467_v61  ;;  %3675 = vmatmul.msk.f32.gmra.mxu2 %vm748_vm1, %v727_v60  ;;  %v97_v60 = vld [vmem:[%s6456_s0 + $0x188] sm:$0xff] }
 0x124   :  { %v4808_v0 = vpop.f32.mrf.mxu1 }
 0x125   :  { %v673_v1 = vmax.f32 %v468_v63, 0.0  ;;  %3557 = vmatmul.msk.f32.gmra.mxu0 %vm158_vm0, %v81_v62  ;;  %v91_v62 = vld [vmem:[%s6456_s0 + $0x158] sm:$0xff]  ;;  %v632_v2 = vpop.f32.mrf.mxu3 }
 0x127   :  { %3621 = vmatmul.msk.f32.gmra.mxu1 %vm748_vm1, %v673_v1 }
 0x12a   :  { %v470_v3 = vpop.f32.mrf.mxu0 }
 0x12b   :  { %v471_v5 = vadd.f32 %v4650_v42, %v470_v3 }
 0x12c   :  { %v4820_v6 = vpop.f32.mrf.mxu1 }
 0x12d   :  { %v674_v7 = vmax.f32 %v471_v5, 0.0  ;;  %3558 = vmatmul.msk.f32.gmra.mxu0 %vm158_vm0, %v82_v4  ;;  %v633_v4 = vadd.f32 %v4650_v42, %v632_v2 }
 0x12f   :  { %3622 = vmatmul.msk.f32.gmra.mxu1 %vm748_vm1, %v674_v7  ;;  %v728_v5 = vmax.f32 %v633_v4, 0.0 }
 0x131   :  { %3676 = vmatmul.msk.f32.gmra.mxu2 %vm748_vm1, %v728_v5 }
 0x132   :  { %v473_v8 = vpop.f32.mrf.mxu0 }
 0x133   :  { %v474_v10 = vadd.f32 %v4650_v42, %v473_v8  ;;  %v92_v8 = vld [vmem:[%s6456_s0 + $0x160] sm:$0xff] }
 0x134   :  { %v4828_v11 = vpop.f32.mrf.mxu1 }
 0x135   :  { %v675_v12 = vmax.f32 %v474_v10, 0.0  ;;  %3559 = vmatmul.msk.f32.gmra.mxu0 %vm158_vm0, %v83_v9 }
 0x137   :  { %3623 = vmatmul.msk.f32.gmra.mxu1 %vm748_vm1, %v675_v12  ;;  %v635_v12 = vpop.f32.mrf.mxu3 }
 0x13a   :  { %v476_v13 = vpop.f32.mrf.mxu0 }
 0x13b   :  { %v477_v15 = vadd.f32 %v4650_v42, %v476_v13 }
 0x13c   :  { %v4836_v16 = vpop.f32.mrf.mxu1 }
 0x13d   :  { %v676_v17 = vmax.f32 %v477_v15, 0.0  ;;  %3560 = vmatmul.msk.f32.gmra.mxu0 %vm158_vm0, %v84_v14  ;;  %v636_v14 = vadd.f32 %v4650_v42, %v635_v12 }
 0x13f   :  { %3624 = vmatmul.msk.f32.gmra.mxu1 %vm748_vm1, %v676_v17  ;;  %v729_v15 = vmax.f32 %v636_v14, 0.0 }
 0x141   :  { %3677 = vmatmul.msk.f32.gmra.mxu2 %vm748_vm1, %v729_v15 }
 0x142   :  { %v479_v18 = vpop.f32.mrf.mxu0 }
 0x143   :  { %v480_v20 = vadd.f32 %v4650_v42, %v479_v18  ;;  %v93_v18 = vld [vmem:[%s6456_s0 + $0x168] sm:$0xff] }
 0x144   :  { %v4844_v21 = vpop.f32.mrf.mxu1 }
 0x145   :  { %v677_v22 = vmax.f32 %v480_v20, 0.0  ;;  %3561 = vmatmul.msk.f32.gmra.mxu0 %vm158_vm0, %v85_v19 }
 0x147   :  { %3625 = vmatmul.msk.f32.gmra.mxu1 %vm748_vm1, %v677_v22  ;;  %v638_v22 = vpop.f32.mrf.mxu3 }
 0x14a   :  { %v482_v23 = vpop.f32.mrf.mxu0 }
 0x14b   :  { %v483_v25 = vadd.f32 %v4650_v42, %v482_v23 }
 0x14c   :  { %v4852_v26 = vpop.f32.mrf.mxu1 }
 0x14d   :  { %6473 = vst [vmem:[#allocation2_spill] sm:$0xff] %v4852_v26  ;;  %v678_v28 = vmax.f32 %v483_v25, 0.0  ;;  %3562 = vmatmul.msk.f32.gmra.mxu0 %vm158_vm0, %v86_v24  ;;  %v639_v24 = vadd.f32 %v4650_v42, %v638_v22 }
 0x14f   :  { %3626 = vmatmul.msk.f32.gmra.mxu1 %vm748_vm1, %v678_v28  ;;  %v730_v25 = vmax.f32 %v639_v24, 0.0 }
 0x151   :  { %3678 = vmatmul.msk.f32.gmra.mxu2 %vm748_vm1, %v730_v25  ;;  %v100_v25 = vld [vmem:[%s6456_s0 + $0x1a0] sm:$0xff] }
 0x152   :  { %v485_v29 = vpop.f32.mrf.mxu0 }
 0x153   :  { %v486_v31 = vadd.f32 %v4650_v42, %v485_v29  ;;  %v94_v29 = vld [vmem:[%s6456_s0 + $0x170] sm:$0xff] }
 0x154   :  { %v4862_v32 = vpop.f32.mrf.mxu1 }
 0x155   :  { %6474 = vst [vmem:[#allocation3_spill] sm:$0xff] %v4862_v32  ;;  %v679_v34 = vmax.f32 %v486_v31, 0.0  ;;  %3563 = vmatmul.msk.f32.gmra.mxu0 %vm158_vm0, %v87_v30 }
 0x157   :  { %3627 = vmatmul.msk.f32.gmra.mxu1 %vm748_vm1, %v679_v34  ;;  %v641_v34 = vpop.f32.mrf.mxu3 }
 0x15a   :  { %v488_v35 = vpop.f32.mrf.mxu0 }
 0x15b   :  { %v489_v37 = vadd.f32 %v4650_v42, %v488_v35 }
 0x15c   :  { %v4872_v38 = vpop.f32.mrf.mxu1 }
 0x15d   :  { %6475 = vst [vmem:[#allocation4_spill] sm:$0xff] %v4872_v38  ;;  %v680_v40 = vmax.f32 %v489_v37, 0.0  ;;  %3564 = vmatmul.msk.f32.gmra.mxu0 %vm158_vm0, %v88_v36  ;;  %v642_v36 = vadd.f32 %v4650_v42, %v641_v34 }
 0x15f   :  { %3628 = vmatmul.msk.f32.gmra.mxu1 %vm748_vm1, %v680_v40  ;;  %v731_v37 = vmax.f32 %v642_v36, 0.0  ;;  %v95_v40 = vld [vmem:[%s6456_s0 + $0x178] sm:$0xff] }
 0x161   :  { %3679 = vmatmul.msk.f32.gmra.mxu2 %vm748_vm1, %v731_v37 }
 0x162   :  { %v491_v44 = vpop.f32.mrf.mxu0 }
 0x163   :  { %v492_v46 = vadd.f32 %v4650_v42, %v491_v44  ;;  %v644_v44 = vpop.f32.mrf.mxu3 }
 0x164   :  { %v4882_v47 = vpop.f32.mrf.mxu1 }
 0x165   :  { %v681_v49 = vmax.f32 %v492_v46, 0.0  ;;  %3565 = vmatmul.msk.f32.gmra.mxu0 %vm158_vm0, %v89_v45  ;;  %v645_v46 = vadd.f32 %v4650_v42, %v644_v44 }
 0x167   :  { %3629 = vmatmul.msk.f32.gmra.mxu1 %vm748_vm1, %v681_v49  ;;  %v732_v48 = vmax.f32 %v645_v46, 0.0 }
 0x169   :  { %3680 = vmatmul.msk.f32.gmra.mxu2 %vm748_vm1, %v732_v48 }
 0x16a   :  { %v494_v52 = vpop.f32.mrf.mxu0 }
 0x16b   :  { %v495_v54 = vadd.f32 %v4650_v42, %v494_v52 }
 0x16c   :  { %v4892_v55 = vpop.f32.mrf.mxu1 }
 0x16d   :  { %v682_v57 = vmax.f32 %v495_v54, 0.0  ;;  %3566 = vmatmul.msk.f32.gmra.mxu0 %vm158_vm0, %v90_v53  ;;  %v647_v53 = vpop.f32.mrf.mxu3 }
 0x16e   :  { %v648_v56 = vadd.f32 %v4650_v42, %v647_v53 }
 0x16f   :  { %3630 = vmatmul.msk.f32.gmra.mxu1 %vm748_vm1, %v682_v57 }
 0x170   :  { %v733_v57 = vmax.f32 %v648_v56, 0.0  ;;  %v104_v56 = vld [vmem:[%s6456_s0 + $0x1c0] sm:$0xff] }
 0x172   :  { %v497_v61 = vpop.f32.mrf.mxu0  ;;  %3681 = vmatmul.msk.f32.gmra.mxu2 %vm748_vm1, %v733_v57 }
 0x173   :  { %v498_v63 = vadd.f32 %v4650_v42, %v497_v61 }
 0x174   :  { %v4902_v1 = vpop.f32.mrf.mxu1 }
 0x175   :  { %v683_v3 = vmax.f32 %v498_v63, 0.0  ;;  %3567 = vmatmul.msk.f32.gmra.mxu0 %vm158_vm0, %v91_v62  ;;  %v650_v63 = vpop.f32.mrf.mxu3 }
 0x177   :  { %3631 = vmatmul.msk.f32.gmra.mxu1 %vm748_vm1, %v683_v3  ;;  %v651_v3 = vadd.f32 %v4650_v42, %v650_v63  ;;  %v105_v63 = vld [vmem:[%s6456_s0 + $0x1c8] sm:$0xff] }
 0x179   :  { %v734_v4 = vmax.f32 %v651_v3, 0.0 }
 0x17a   :  { %v500_v7 = vpop.f32.mrf.mxu0 }
 0x17b   :  { %v501_v9 = vadd.f32 %v4650_v42, %v500_v7  ;;  %3682 = vmatmul.msk.f32.gmra.mxu2 %vm748_vm1, %v734_v4  ;;  %v98_v7 = vld [vmem:[%s6456_s0 + $0x190] sm:$0xff] }
 0x17c   :  { %v4912_v10 = vpop.f32.mrf.mxu1 }
 0x17d   :  { %v684_v13 = vmax.f32 %v501_v9, 0.0  ;;  %3568 = vmatmul.msk.f32.gmra.mxu0 %vm158_vm0, %v92_v8  ;;  %v653_v12 = vpop.f32.mrf.mxu3 }
 0x17e   :  { %v654_v14 = vadd.f32 %v4650_v42, %v653_v12 }
 0x17f   :  { %3632 = vmatmul.msk.f32.gmra.mxu1 %vm748_vm1, %v684_v13 }
 0x180   :  { %v735_v15 = vmax.f32 %v654_v14, 0.0 }
 0x182   :  { %v503_v17 = vpop.f32.mrf.mxu0 }
 0x183   :  { %v504_v19 = vadd.f32 %v4650_v42, %v503_v17  ;;  %3683 = vmatmul.msk.f32.gmra.mxu2 %vm748_vm1, %v735_v15  ;;  %v107_v15 = vld [vmem:[%s6456_s0 + $0x1d8] sm:$0xff] }
 0x184   :  { %v4922_v20 = vpop.f32.mrf.mxu1 }
 0x185   :  { %v685_v23 = vmax.f32 %v504_v19, 0.0  ;;  %3569 = vmatmul.msk.f32.gmra.mxu0 %vm158_vm0, %v93_v18  ;;  %v99_v18 = vld [vmem:[%s6456_s0 + $0x198] sm:$0xff] }
 0x187   :  { %3633 = vmatmul.msk.f32.gmra.mxu1 %vm748_vm1, %v685_v23 }
 0x18a   :  { %v506_v28 = vpop.f32.mrf.mxu0 }
 0x18b   :  { %v507_v30 = vadd.f32 %v4650_v42, %v506_v28 }
 0x18c   :  { %v4932_v31 = vpop.f32.mrf.mxu1 }
 0x18d   :  { %v686_v35 = vmax.f32 %v507_v30, 0.0  ;;  %3570 = vmatmul.msk.f32.gmra.mxu0 %vm158_vm0, %v94_v29 }
 0x18f   :  { %3634 = vmatmul.msk.f32.gmra.mxu1 %vm748_vm1, %v686_v35  ;;  %v101_v35 = vld [vmem:[%s6456_s0 + $0x1a8] sm:$0xff] }
 0x192   :  { %v509_v39 = vpop.f32.mrf.mxu0 }
 0x193   :  { %v510_v41 = vadd.f32 %v4650_v42, %v509_v39 }
 0x194   :  { %v4942_v43 = vpop.f32.mrf.mxu1 }
 0x195   :  { %v687_v45 = vmax.f32 %v510_v41, 0.0  ;;  %3571 = vmatmul.msk.f32.gmra.mxu0 %vm158_vm0, %v95_v40  ;;  %v102_v41 = vld [vmem:[%s6456_s0 + $0x1b0] sm:$0xff] }
 0x197   :  { %3635 = vmatmul.msk.f32.gmra.mxu1 %vm748_vm1, %v687_v45 }
 0x19a   :  { %v512_v49 = vpop.f32.mrf.mxu0 }
 0x19b   :  { %v513_v51 = vadd.f32 %v4650_v42, %v512_v49  ;;  %v103_v49 = vld [vmem:[%s6456_s0 + $0x1b8] sm:$0xff] }
 0x19c   :  { %v4952_v52 = vpop.f32.mrf.mxu1 }
 0x19d   :  { %6476 = vst [vmem:[#allocation5_spill] sm:$0xff] %v4952_v52  ;;  %v688_v54 = vmax.f32 %v513_v51, 0.0  ;;  %3572 = vmatmul.msk.f32.gmra.mxu0 %vm158_vm0, %v96_v50 }
 0x19f   :  { %3636 = vmatmul.msk.f32.gmra.mxu1 %vm748_vm1, %v688_v54 }
 0x1a2   :  { %v515_v59 = vpop.f32.mrf.mxu0 }
 0x1a3   :  { %v516_v61 = vadd.f32 %v4650_v42, %v515_v59 }
 0x1a4   :  { %v4962_v62 = vpop.f32.mrf.mxu1 }
 0x1a5   :  { %6477 = vst [vmem:[#allocation6_spill] sm:$0xff] %v4962_v62  ;;  %v689_v2 = vmax.f32 %v516_v61, 0.0  ;;  %3573 = vmatmul.msk.f32.gmra.mxu0 %vm158_vm0, %v97_v60 }
 0x1a7   :  { %3637 = vmatmul.msk.f32.gmra.mxu1 %vm748_vm1, %v689_v2 }
 0x1aa   :  { %v518_v5 = vpop.f32.mrf.mxu0 }
 0x1ab   :  { %v519_v8 = vadd.f32 %v4650_v42, %v518_v5 }
 0x1ac   :  { %v4972_v9 = vpop.f32.mrf.mxu1 }
 0x1ad   :  { %6478 = vst [vmem:[#allocation7_spill] sm:$0xff] %v4972_v9  ;;  %v690_v13 = vmax.f32 %v519_v8, 0.0  ;;  %3574 = vmatmul.msk.f32.gmra.mxu0 %vm158_vm0, %v98_v7  ;;  %v106_v7 = vld [vmem:[%s6456_s0 + $0x1d0] sm:$0xff] }
 0x1af   :  { %3638 = vmatmul.msk.f32.gmra.mxu1 %vm748_vm1, %v690_v13 }
 0x1b2   :  { %v521_v17 = vpop.f32.mrf.mxu0 }
 0x1b3   :  { %v522_v19 = vadd.f32 %v4650_v42, %v521_v17 }
 0x1b4   :  { %v4982_v22 = vpop.f32.mrf.mxu1 }
 0x1b5   :  { %v691_v23 = vmax.f32 %v522_v19, 0.0  ;;  %3575 = vmatmul.msk.f32.gmra.mxu0 %vm158_vm0, %v99_v18 }
 0x1b7   :  { %3639 = vmatmul.msk.f32.gmra.mxu1 %vm748_vm1, %v691_v23 }
 0x1ba   :  { %v524_v24 = vpop.f32.mrf.mxu0 }
 0x1bb   :  { %v525_v28 = vadd.f32 %v4650_v42, %v524_v24  ;;  %v108_v24 = vld [vmem:[%s6456_s0 + $0x1e0] sm:$0xff] }
 0x1bc   :  { %v4990_v29 = vpop.f32.mrf.mxu1 }
 0x1bd   :  { %v692_v30 = vmax.f32 %v525_v28, 0.0  ;;  %3576 = vmatmul.msk.f32.gmra.mxu0 %vm158_vm0, %v100_v25 }
 0x1bf   :  { %3640 = vmatmul.msk.f32.gmra.mxu1 %vm748_vm1, %v692_v30 }
 0x1c2   :  { %v527_v34 = vpop.f32.mrf.mxu0 }
 0x1c3   :  { %v528_v36 = vadd.f32 %v4650_v42, %v527_v34 }
 0x1c4   :  { %v4998_v37 = vpop.f32.mrf.mxu1 }
 0x1c5   :  { %v693_v39 = vmax.f32 %v528_v36, 0.0  ;;  %3577 = vmatmul.msk.f32.gmra.mxu0 %vm158_vm0, %v101_v35  ;;  %v109_v35 = vld [vmem:[%s6456_s0 + $0x1e8] sm:$0xff] }
 0x1c7   :  { %3641 = vmatmul.msk.f32.gmra.mxu1 %vm748_vm1, %v693_v39 }
 0x1ca   :  { %v530_v40 = vpop.f32.mrf.mxu0 }
 0x1cb   :  { %v531_v44 = vadd.f32 %v4650_v42, %v530_v40 }
 0x1cc   :  { %v5006_v45 = vpop.f32.mrf.mxu1 }
 0x1cd   :  { %v694_v46 = vmax.f32 %v531_v44, 0.0  ;;  %3578 = vmatmul.msk.f32.gmra.mxu0 %vm158_vm0, %v102_v41  ;;  %v110_v44 = vld [vmem:[%s6456_s0 + $0x1f0] sm:$0xff] }
 0x1cf   :  { %3642 = vmatmul.msk.f32.gmra.mxu1 %vm748_vm1, %v694_v46 }
 0x1d2   :  { %v533_v48 = vpop.f32.mrf.mxu0 }
 0x1d3   :  { %v534_v50 = vadd.f32 %v4650_v42, %v533_v48 }
 0x1d4   :  { %v5014_v51 = vpop.f32.mrf.mxu1 }
 0x1d5   :  { %v695_v53 = vmax.f32 %v534_v50, 0.0  ;;  %3579 = vmatmul.msk.f32.gmra.mxu0 %vm158_vm0, %v103_v49 }
 0x1d7   :  { %3643 = vmatmul.msk.f32.gmra.mxu1 %vm748_vm1, %v695_v53  ;;  %v111_v53 = vld [vmem:[%s6456_s0 + $0x1f8] sm:$0xff] }
 0x1da   :  { %v536_v54 = vpop.f32.mrf.mxu0 }
 0x1db   :  { %v537_v57 = vadd.f32 %v4650_v42, %v536_v54 }
 0x1dc   :  { %v5022_v59 = vpop.f32.mrf.mxu1 }
 0x1dd   :  { %v696_v60 = vmax.f32 %v537_v57, 0.0  ;;  %3580 = vmatmul.msk.f32.gmra.mxu0 %vm158_vm0, %v104_v56 }
 0x1df   :  { %3644 = vmatmul.msk.f32.gmra.mxu1 %vm748_vm1, %v696_v60 }
 0x1e2   :  { %v539_v61 = vpop.f32.mrf.mxu0 }
 0x1e3   :  { %v540_v2 = vadd.f32 %v4650_v42, %v539_v61  ;;  %v112_v61 = vld [vmem:[%s6456_s0 + $0x200] sm:$0xff] }
 0x1e4   :  { %v5030_v3 = vpop.f32.mrf.mxu1 }
 0x1e5   :  { %v697_v4 = vmax.f32 %v540_v2, 0.0  ;;  %3581 = vmatmul.msk.f32.gmra.mxu0 %vm158_vm0, %v105_v63 }
 0x1e7   :  { %3645 = vmatmul.msk.f32.gmra.mxu1 %vm748_vm1, %v697_v4 }
 0x1ea   :  { %v542_v5 = vpop.f32.mrf.mxu0 }
 0x1eb   :  { %v543_v8 = vadd.f32 %v4650_v42, %v542_v5 }
 0x1ec   :  { %v5038_v12 = vpop.f32.mrf.mxu1 }
 0x1ed   :  { %6479 = vst [vmem:[#allocation8_spill] sm:$0xff] %v5038_v12  ;;  %v698_v13 = vmax.f32 %v543_v8, 0.0  ;;  %3582 = vmatmul.msk.f32.gmra.mxu0 %vm158_vm0, %v106_v7  ;;  %v113_v7 = vld [vmem:[%s6456_s0 + $0x208] sm:$0xff] }
 0x1ef   :  { %3646 = vmatmul.msk.f32.gmra.mxu1 %vm748_vm1, %v698_v13 }
 0x1f2   :  { %v545_v14 = vpop.f32.mrf.mxu0 }
 0x1f3   :  { %v546_v17 = vadd.f32 %v4650_v42, %v545_v14 }
 0x1f4   :  { %v5046_v18 = vpop.f32.mrf.mxu1 }
 0x1f5   :  { %6480 = vst [vmem:[#allocation9_spill] sm:$0xff] %v5046_v18  ;;  %v699_v19 = vmax.f32 %v546_v17, 0.0  ;;  %3583 = vmatmul.msk.f32.gmra.mxu0 %vm158_vm0, %v107_v15  ;;  %v114_v17 = vld [vmem:[%s6456_s0 + $0x210] sm:$0xff] }
 0x1f7   :  { %3647 = vmatmul.msk.f32.gmra.mxu1 %vm748_vm1, %v699_v19 }
 0x1fa   :  { %v548_v23 = vpop.f32.mrf.mxu0 }
 0x1fb   :  { %v549_v25 = vadd.f32 %v4650_v42, %v548_v23 }
 0x1fc   :  { %v5054_v28 = vpop.f32.mrf.mxu1 }
 0x1fd   :  { %6481 = vst [vmem:[#allocation10_spill] sm:$0xff] %v5054_v28  ;;  %v700_v30 = vmax.f32 %v549_v25, 0.0  ;;  %3584 = vmatmul.msk.f32.gmra.mxu0 %vm158_vm0, %v108_v24 }
 0x1ff   :  { %3648 = vmatmul.msk.f32.gmra.mxu1 %vm748_vm1, %v700_v30 }
 0x202   :  { %v551_v34 = vpop.f32.mrf.mxu0 }
 0x203   :  { %v552_v36 = vadd.f32 %v4650_v42, %v551_v34 }
 0x204   :  { %v5062_v39 = vpop.f32.mrf.mxu1 }
 0x205   :  { %v701_v40 = vmax.f32 %v552_v36, 0.0  ;;  %3585 = vmatmul.msk.f32.gmra.mxu0 %vm158_vm0, %v109_v35 }
 0x207   :  { %3649 = vmatmul.msk.f32.gmra.mxu1 %vm748_vm1, %v701_v40 }
 0x20a   :  { %v554_v41 = vpop.f32.mrf.mxu0 }
 0x20b   :  { %v555_v46 = vadd.f32 %v4650_v42, %v554_v41 }
 0x20c   :  { %v5070_v48 = vpop.f32.mrf.mxu1 }
 0x20d   :  { %v702_v49 = vmax.f32 %v555_v46, 0.0  ;;  %3586 = vmatmul.msk.f32.gmra.mxu0 %vm158_vm0, %v110_v44 }
 0x20f   :  { %3650 = vmatmul.msk.f32.gmra.mxu1 %vm748_vm1, %v702_v49 }
 0x212   :  { %v557_v50 = vpop.f32.mrf.mxu0 }
 0x213   :  { %v558_v54 = vadd.f32 %v4650_v42, %v557_v50 }
 0x214   :  { %v5078_v56 = vpop.f32.mrf.mxu1 }
 0x215   :  { %v703_v57 = vmax.f32 %v558_v54, 0.0  ;;  %3587 = vmatmul.msk.f32.gmra.mxu0 %vm158_vm0, %v111_v53 }
 0x217   :  { %3651 = vmatmul.msk.f32.gmra.mxu1 %vm748_vm1, %v703_v57 }
 0x21a   :  { %v560_v60 = vpop.f32.mrf.mxu0 }
 0x21b   :  { %v561_v63 = vadd.f32 %v4650_v42, %v560_v60 }
 0x21c   :  { %v5086_v2 = vpop.f32.mrf.mxu1 }
 0x21d   :  { %v704_v4 = vmax.f32 %v561_v63, 0.0  ;;  %3588 = vmatmul.msk.f32.gmra.mxu0 %vm158_vm0, %v112_v61 }
 0x21f   :  { %3652 = vmatmul.msk.f32.gmra.mxu1 %vm748_vm1, %v704_v4 }
 0x222   :  { %v563_v5 = vpop.f32.mrf.mxu0 }
 0x223   :  { %v564_v8 = vadd.f32 %v4650_v42, %v563_v5 }
 0x224   :  { %v5094_v13 = vpop.f32.mrf.mxu1 }
 0x225   :  { %v705_v14 = vmax.f32 %v564_v8, 0.0  ;;  %3589 = vmatmul.msk.f32.gmra.mxu0 %vm158_vm0, %v113_v7 }
 0x227   :  { %3653 = vmatmul.msk.f32.gmra.mxu1 %vm748_vm1, %v705_v14 }
 0x22a   :  { %v566_v15 = vpop.f32.mrf.mxu0 }
 0x22b   :  { %v567_v19 = vadd.f32 %v4650_v42, %v566_v15 }
 0x22c   :  { %v5102_v23 = vpop.f32.mrf.mxu1 }
 0x22d   :  { %v706_v24 = vmax.f32 %v567_v19, 0.0  ;;  %3590 = vmatmul.msk.f32.gmra.mxu0 %vm158_vm0, %v114_v17 }
 0x22f   :  { %3654 = vmatmul.msk.f32.gmra.mxu1 %vm748_vm1, %v706_v24 }
 0x232   :  { %v569_v25 = vpop.f32.mrf.mxu0 }
 0x233   :  { %v570_v30 = vadd.f32 %v4650_v42, %v569_v25 }
 0x234   :  { %v5107_v34 = vpop.f32.mrf.mxu1 }
 0x235   :  { %v707_v35 = vmax.f32 %v570_v30, 0.0 }
 0x237   :  { %3655 = vmatmul.msk.f32.gmra.mxu1 %vm748_vm1, %v707_v35 }
 0x23a   :  { %v572_v36 = vpop.f32.mrf.mxu0 }
 0x23b   :  { %v573_v40 = vadd.f32 %v4650_v42, %v572_v36 }
 0x23c   :  { %v5111_v41 = vpop.f32.mrf.mxu1 }
 0x23d   :  { %6482 = vst [vmem:[#allocation11_spill] sm:$0xff] %v5111_v41  ;;  %v708_v44 = vmax.f32 %v573_v40, 0.0 }
 0x23f   :  { %3656 = vmatmul.msk.f32.gmra.mxu1 %vm748_vm1, %v708_v44 }
 0x242   :  { %v575_v46 = vpop.f32.mrf.mxu0 }
 0x243   :  { %v576_v49 = vadd.f32 %v4650_v42, %v575_v46 }
 0x244   :  { %v5115_v50 = vpop.f32.mrf.mxu1 }
 0x245   :  { %6483 = vst [vmem:[#allocation12_spill] sm:$0xff] %v5115_v50  ;;  %v709_v53 = vmax.f32 %v576_v49, 0.0 }
 0x247   :  { %3657 = vmatmul.msk.f32.gmra.mxu1 %vm748_vm1, %v709_v53 }
 0x24a   :  { %v578_v54 = vpop.f32.mrf.mxu0 }
 0x24b   :  { %v579_v57 = vadd.f32 %v4650_v42, %v578_v54 }
 0x24c   :  { %v5119_v60 = vpop.f32.mrf.mxu1 }
 0x24d   :  { %6484 = vst [vmem:[#allocation13_spill] sm:$0xff] %v5119_v60  ;;  %v710_v61 = vmax.f32 %v579_v57, 0.0 }
 0x24f   :  { %3658 = vmatmul.msk.f32.gmra.mxu1 %vm748_vm1, %v710_v61 }
 0x252   :  { %v581_v63 = vpop.f32.mrf.mxu0 }
 0x253   :  { %v582_v4 = vadd.f32 %v4650_v42, %v581_v63 }
 0x254   :  { %v5123_v5 = vpop.f32.mrf.mxu1 }
 0x255   :  { %v711_v7 = vmax.f32 %v582_v4, 0.0 }
 0x257   :  { %3659 = vmatmul.msk.f32.gmra.mxu1 %vm748_vm1, %v711_v7 }
 0x25a   :  { %v584_v8 = vpop.f32.mrf.mxu0 }
 0x25b   :  { %v585_v14 = vadd.f32 %v4650_v42, %v584_v8 }
 0x25c   :  { %v5127_v15 = vpop.f32.mrf.mxu1 }
 0x25d   :  { %v712_v17 = vmax.f32 %v585_v14, 0.0 }
 0x25f   :  { %3660 = vmatmul.msk.f32.gmra.mxu1 %vm748_vm1, %v712_v17 }
 0x262   :  { %v587_v19 = vpop.f32.mrf.mxu0 }
 0x263   :  { %v588_v24 = vadd.f32 %v4650_v42, %v587_v19  ;;  %v5150_v19 = vpop.f32.mrf.mxu2 }
 0x264   :  { %v5131_v25 = vpop.f32.mrf.mxu1 }
 0x265   :  { %v713_v30 = vmax.f32 %v588_v24, 0.0 }
 0x267   :  { %3661 = vmatmul.msk.f32.gmra.mxu1 %vm748_vm1, %v713_v30 }
 0x26a   :  { %v590_v35 = vpop.f32.mrf.mxu0 }
 0x26b   :  { %v591_v36 = vadd.f32 %v4650_v42, %v590_v35 }
 0x26c   :  { %v5135_v40 = vpop.f32.mrf.mxu1 }
 0x26d   :  { %v714_v44 = vmax.f32 %v591_v36, 0.0 }
 0x26f   :  { %3662 = vmatmul.msk.f32.gmra.mxu1 %vm748_vm1, %v714_v44 }
 0x272   :  { %v593_v46 = vpop.f32.mrf.mxu0 }
 0x273   :  { %v594_v49 = vadd.f32 %v4650_v42, %v593_v46 }
 0x274   :  { %v5139_v53 = vpop.f32.mrf.mxu1 }
 0x275   :  { %v715_v54 = vmax.f32 %v594_v49, 0.0  ;;  %v1396_v49 = vld [vmem:[%s6459_s5] sm:$0xff] }
 0x277   :  { %3663 = vmatmul.msk.f32.gmra.mxu1 %vm748_vm1, %v715_v54  ;;  %v5160_v54 = vpop.f32.mrf.mxu2 }
 0x27a   :  { %v596_v57 = vpop.f32.mrf.mxu0 }
 0x27b   :  { %v597_v61 = vadd.f32 %v4650_v42, %v596_v57 }
 0x27c   :  { %v5143_v63 = vpop.f32.mrf.mxu1 }
 0x27d   :  { %v716_v4 = vmax.f32 %v597_v61, 0.0  ;;  %v1397_v61 = vunpack.c.l.bf16 %v1396_v49 }
 0x27f   :  { %3664 = vmatmul.msk.f32.gmra.mxu1 %vm748_vm1, %v716_v4  ;;  %1451 = vmatpush.msrb.mxu2 %v1397_v61 }
 0x282   :  { %v599_v7 = vpop.f32.mrf.mxu0 }
 0x283   :  { %v600_v8 = vadd.f32 %v4650_v42, %v599_v7 }
 0x284   :  { %v5147_v14 = vpop.f32.mrf.mxu1 }
 0x285   :  { %v717_v17 = vmax.f32 %v600_v8, 0.0 }
 0x287   :  { %3665 = vmatmul.msk.f32.gmra.mxu1 %vm748_vm1, %v717_v17  ;;  %v1398_v17 = vunpack.c.h.bf16 %v1396_v49 }
 0x289   :  { %1498 = vmatpush.msrb.mxu3 %v1398_v17 }
 0x28a   :  { %v602_v24 = vpop.f32.mrf.mxu0 }
 0x28b   :  { %v603_v30 = vadd.f32 %v4650_v42, %v602_v24 }
 0x28c   :  { %v5153_v35 = vpop.f32.mrf.mxu1 }
 0x28d   :  { %6485 = vst [vmem:[#allocation14_spill] sm:$0xff] %v5153_v35  ;;  %v718_v36 = vmax.f32 %v603_v30, 0.0 }
 0x28f   :  { %3666 = vmatmul.msk.f32.gmra.mxu1 %vm748_vm1, %v718_v36  ;;  %v5168_v36 = vpop.f32.mrf.mxu2 }
 0x292   :  { %v605_v44 = vpop.f32.mrf.mxu0 }
 0x293   :  { %v606_v46 = vadd.f32 %v4650_v42, %v605_v44 }
 0x294   :  { %v5162_v57 = vpop.f32.mrf.mxu1 }
 0x295   :  { %6486 = vst [vmem:[#allocation15_spill] sm:$0xff] %v5162_v57  ;;  %v719_v4 = vmax.f32 %v606_v46, 0.0  ;;  %v5224_v57 = vld [vmem:[%s6458_s4] ss:$0 sm:$0xff] }
 0x296   :  { %v1034_v50 = vadd.f32 %v5224_v57, %v4882_v47  ;;  %v1214_v62 = vadd.f32 %v5224_v57, %v5150_v19  ;;  %v1064_v26 = vadd.f32 %v5224_v57, %v4982_v22 }
 0x297   :  { %3667 = vmatmul.msk.f32.gmra.mxu1 %vm748_vm1, %v719_v4  ;;  %v5173_v61 = vpop.f32.mrf.mxu2 }
 0x298   :  { %v1255_v47 = vmax.f32 %v1034_v50, 0.0  ;;  %v1315_v35 = vmax.f32 %v1214_v62, 0.0  ;;  %v1265_v22 = vmax.f32 %v1064_v26, 0.0  ;;  %v1037_v50 = vadd.f32 %v5224_v57, %v4892_v55 }
 0x299   :  { %v1097_v62 = vadd.f32 %v5224_v57, %v5070_v48  ;;  %v1007_v26 = vadd.f32 %v5224_v57, %v4796_v58  ;;  %v5265_v48 = vld [vmem:[%s6460_s6 + $0x28] sm:$0xff] }
 0x29a   :  { %v608_v7 = vpop.f32.mrf.mxu0 }
 0x29b   :  { %v609_v8 = vadd.f32 %v4650_v42, %v608_v7 }
 0x29c   :  { %v5166_v24 = vpop.f32.mrf.mxu1 }
 0x29d   :  { %6487 = vst [vmem:[#allocation16_spill] sm:$0xff] %v5166_v24  ;;  %v720_v30 = vmax.f32 %v609_v8, 0.0  ;;  %v618_v8 = vadd.f32 %v4650_v42, %v4854_v27 }
 0x29f   :  { %3668 = vmatmul.msk.f32.gmra.mxu1 %vm748_vm1, %v720_v30  ;;  %v5179_v17 = vpop.f32.mrf.mxu2 }
 0x2a2   :  { %v611_v44 = vpop.f32.mrf.mxu0 }
 0x2a3   :  { %v612_v28 = vadd.f32 %v4650_v42, %v611_v44  ;;  %v723_v44 = vmax.f32 %v618_v8, 0.0 }
 0x2a4   :  { %v1153_v38 = vpop.f32.mrf.mxu1 }
 0x2a5   :  { %v721_v46 = vmax.f32 %v612_v28, 0.0  ;;  %v4478_v28 = vld [vmem:[%s6455_s2] ss:$0 sm:$0xff] }
 0x2a7   :  { %3669 = vmatmul.msk.f32.gmra.mxu1 %vm748_vm1, %v721_v46  ;;  %v621_v46 = vadd.f32 %v4478_v28, %v4864_v33 }
 0x2aa   :  { %v614_v4 = vpop.f32.mrf.mxu0 }
 0x2ab   :  { %v615_v49 = vadd.f32 %v4650_v42, %v614_v4  ;;  %v5188_v4 = vpop.f32.mrf.mxu2 }
 0x2ac   :  { %v1156_v7 = vpop.f32.mrf.mxu1 }
 0x2ad   :  { %v722_v24 = vmax.f32 %v615_v49, 0.0  ;;  %v1157_v52 = vadd.f32 %v5224_v57, %v1156_v7 }
 0x2af   :  { %3670 = vmatmul.msk.f32.gmra.mxu1 %vm748_vm1, %v722_v24  ;;  %v724_v24 = vmax.f32 %v621_v46, 0.0  ;;  %v5214_v46 = vld [vmem:[%s6460_s6 + $0x38] sm:$0xff]  ;;  %v1296_v55 = vmax.f32 %v1157_v52, 0.0 }
 0x2b0   :  { %v5219_v32 = vunpack.c.l.bf16 %v5214_v46 }
 0x2b2   :  { %6494 = vst [vmem:[#allocation23_spill] sm:$0xff] %v5219_v32  ;;  %1566 = vmatpush.msra.mxu2 %v5219_v32 }
 0x2b3   :  { %v5195_v27 = vpop.f32.mrf.mxu2 }
 0x2b4   :  { %v5181_v30 = vpop.f32.mrf.mxu1 }
 0x2b7   :  { %3671 = vmatmul.msk.f32.gmra.mxu1 %vm748_vm1, %v723_v44 }
 0x2bb   :  { %v5199_v44 = vpop.f32.mrf.mxu2 }
 0x2bc   :  { %v5190_v49 = vpop.f32.mrf.mxu1  ;;  %6488 = vst [vmem:[#allocation17_spill] sm:$0xff] %v5199_v44 }
 0x2bf   :  { %3672 = vmatmul.msk.f32.gmra.mxu1 %vm748_vm1, %v724_v24 }
 0x2c3   :  { %v5203_v9 = vpop.f32.mrf.mxu2 }
 0x2c4   :  { %v5193_v42 = vpop.f32.mrf.mxu1  ;;  %6489 = vst [vmem:[#allocation18_spill] sm:$0xff] %v5203_v9 }
 0x2cb   :  { %v5207_v28 = vpop.f32.mrf.mxu2 }
 0x2cc   :  { %v5197_v8 = vpop.f32.mrf.mxu1  ;;  %6491 = vst [vmem:[#allocation20_spill] sm:$0xff] %v5207_v28  ;;  %v1154_v28 = vadd.f32 %v5224_v57, %v1153_v38  ;;  %v5242_v38 = vld [vmem:[%s6460_s6 + $0x30] sm:$0xff] }
 0x2cd   :  { %v5245_v44 = vunpack.c.l.bf16 %v5242_v38 }
 0x2ce   :  { %v1295_v32 = vmax.f32 %v1154_v28, 0.0 }
 0x2cf   :  { %6495 = vst [vmem:[#allocation24_spill] sm:$0xff] %v5245_v44  ;;  %1567 = vmatpush.msra.mxu2 %v5245_v44 }
 0x2d0   :  { %v1335_v28 = vmax.f32 %v1255_v47, %v1295_v32  ;;  %v1067_v32 = vadd.f32 %v5224_v57, %v4990_v29  ;;  %v1246_v29 = vmax.f32 %v1007_v26, 0.0  ;;  %v1010_v26 = vadd.f32 %v5224_v57, %v4808_v0 }
 0x2d2   :  { %v1266_v52 = vmax.f32 %v1067_v32, 0.0  ;;  %v1247_v0 = vmax.f32 %v1010_v26, 0.0 }
 0x2d3   :  { %v1243_v9 = vpop.f32.mrf.mxu2 }
 0x2d4   :  { %v5201_v60 = vpop.f32.mrf.mxu1  ;;  %v1244_v12 = vadd.f32 %v5224_v57, %v1243_v9 }
 0x2dc   :  { %v5205_v33 = vpop.f32.mrf.mxu1 }
 0x2dd   :  { %6490 = vst [vmem:[#allocation19_spill] sm:$0xff] %v5205_v33 }
 0x2e4   :  { %v5209_v18 = vpop.f32.mrf.mxu1 }
 0x2e5   :  { %6492 = vst [vmem:[#allocation21_spill] sm:$0xff] %v5209_v18  ;;  %v1124_v18 = vadd.f32 %v5224_v57, %v5123_v5  ;;  %v1325_v5 = vmax.f32 %v1244_v12, 0.0 }
 0x2e7   :  { %v1285_v41 = vmax.f32 %v1124_v18, 0.0 }
 0x2e9   :  { %v1365_v12 = vmax.f32 %v1285_v41, %v1325_v5 }
 0x2ec   :  { %v5216_v24 = vpop.f32.mrf.mxu1 }
 0x2ed   :  { %6493 = vst [vmem:[#allocation22_spill] sm:$0xff] %v5216_v24  ;;  %v1094_v24 = vadd.f32 %v5224_v57, %v5062_v39 }
 0x2ef   :  { %v1275_v39 = vmax.f32 %v1094_v24, 0.0  ;;  %v1217_v24 = vadd.f32 %v5224_v57, %v5160_v54 }
 0x2f1   :  { %v1355_v18 = vmax.f32 %v1275_v39, %v1315_v35  ;;  %v1276_v35 = vmax.f32 %v1097_v62, 0.0  ;;  %v1316_v41 = vmax.f32 %v1217_v24, 0.0  ;;  %v1100_v24 = vadd.f32 %v5224_v57, %v5078_v56 }
 0x2f3   :  { %v1375_v7 = vmax.f32 %v1335_v28, %v1355_v18  ;;  %v1040_v28 = vadd.f32 %v5224_v57, %v4902_v1  ;;  %v1356_v62 = vmax.f32 %v1276_v35, %v1316_v41  ;;  %v1277_v35 = vmax.f32 %v1100_v24, 0.0 }
 0x2f4   :  { %v1183_v19 = vpop.f32.mrf.mxu1 }
 0x2f5   :  { %v1184_v9 = vadd.f32 %v5224_v57, %v1183_v19  ;;  %v1127_v19 = vadd.f32 %v5224_v57, %v5127_v15  ;;  %v5268_v15 = vunpack.c.l.bf16 %v5265_v48 }
 0x2f7   :  { %v1305_v33 = vmax.f32 %v1184_v9, 0.0  ;;  %v1286_v39 = vmax.f32 %v1127_v19, 0.0  ;;  %1568 = vmatpush.msra.mxu2 %v5268_v15  ;;  %v1160_v9 = vadd.f32 %v5224_v57, %v5181_v30  ;;  %v1070_v30 = vadd.f32 %v5224_v57, %v4998_v37 }
 0x2f9   :  { %v1345_v44 = vmax.f32 %v1265_v22, %v1305_v33  ;;  %v1256_v33 = vmax.f32 %v1037_v50, 0.0  ;;  %v1220_v50 = vadd.f32 %v5224_v57, %v5168_v36  ;;  %v1326_v18 = vmax.f32 %v1246_v29, %v1286_v39 }
 0x2fa   :  { %v1297_v1 = vmax.f32 %v1160_v9, 0.0  ;;  %v1257_v36 = vmax.f32 %v1040_v28, 0.0  ;;  %v1163_v39 = vadd.f32 %v5224_v57, %v5190_v49  ;;  %v1103_v29 = vadd.f32 %v5224_v57, %v5086_v2  ;;  %v5312_v2 = vld [vmem:[%s6460_s6 + $0x20] sm:$0xff] }
 0x2fb   :  { %v1385_v47 = vmax.f32 %v1345_v44, %v1365_v12  ;;  %v1336_v44 = vmax.f32 %v1256_v33, %v1296_v55  ;;  %v1130_v12 = vadd.f32 %v5224_v57, %v5131_v25  ;;  %v5289_v55 = vunpack.c.h.bf16 %v5214_v46 }
 0x2fc   :  { %v1186_v54 = vpop.f32.mrf.mxu1  ;;  %v1267_v33 = vmax.f32 %v1070_v30, 0.0  ;;  %v1337_v37 = vmax.f32 %v1257_v36, %v1297_v1  ;;  %v1043_v46 = vadd.f32 %v5224_v57, %v4912_v10  ;;  %v1013_v28 = vadd.f32 %v5224_v57, %v4820_v6 }
 0x2fd   :  { %v1187_v58 = vadd.f32 %v5224_v57, %v1186_v54  ;;  %v5271_v5 = vmax.f32 %v1375_v7, %v1385_v47  ;;  %v1376_v32 = vmax.f32 %v1336_v44, %v1356_v62  ;;  %v1317_v47 = vmax.f32 %v1220_v50, 0.0  ;;  %1586 = vmatpush.msra.mxu3 %v5289_v55 }
 0x2fe   :  { %v1287_v41 = vmax.f32 %v1130_v12, 0.0  ;;  %v1073_v62 = vadd.f32 %v5224_v57, %v5006_v45  ;;  %v1298_v10 = vmax.f32 %v1163_v39, 0.0  ;;  %v1258_v6 = vmax.f32 %v1043_v46, 0.0 }
 0x2ff   :  { %v1306_v22 = vmax.f32 %v1187_v58, 0.0  ;;  %v1357_v44 = vmax.f32 %v1277_v35, %v1317_v47  ;;  %v1046_v47 = vadd.f32 %v5224_v57, %v4922_v20  ;;  %v1226_v35 = vadd.f32 %v5224_v57, %v5179_v17  ;;  %v5342_v17 = vld [vmem:[%s6460_s6 + $0x18] sm:$0xff] }
 0x300   :  { %v1327_v9 = vmax.f32 %v1247_v0, %v1287_v41  ;;  %v1268_v1 = vmax.f32 %v1073_v62, 0.0  ;;  %v1106_v41 = vadd.f32 %v5224_v57, %v5094_v13  ;;  %v1016_v0 = vadd.f32 %v5224_v57, %v4828_v11 }
 0x301   :  { %v1346_v19 = vmax.f32 %v1266_v52, %v1306_v22  ;;  %v1223_v52 = vadd.f32 %v5224_v57, %v5173_v61  ;;  %v1133_v22 = vadd.f32 %v5224_v57, %v5135_v40  ;;  %v1377_v50 = vmax.f32 %v1337_v37, %v1357_v44 }
 0x302   :  { %v5315_v61 = vunpack.c.h.bf16 %v5242_v38  ;;  %v1166_v38 = vadd.f32 %v5224_v57, %v5193_v42  ;;  %v5345_v13 = vunpack.c.h.bf16 %v5265_v48  ;;  %v1279_v11 = vmax.f32 %v1106_v41, 0.0 }
 0x303   :  { %v1366_v7 = vmax.f32 %v1326_v18, %v1346_v19  ;;  %v1278_v18 = vmax.f32 %v1103_v29, 0.0  ;;  %v1318_v40 = vmax.f32 %v1223_v52, 0.0  ;;  %v5318_v19 = vunpack.c.l.bf16 %v5312_v2 }
 0x304   :  { %v1189_v56 = vpop.f32.mrf.mxu1  ;;  %v1288_v26 = vmax.f32 %v1133_v22, 0.0  ;;  %1587 = vmatpush.msra.mxu3 %v5315_v61  ;;  %v1299_v20 = vmax.f32 %v1166_v38, 0.0  ;;  %v5348_v29 = vunpack.c.l.bf16 %v5342_v17  ;;  %v1169_v48 = vadd.f32 %v5224_v57, %v5197_v8 }
 0x305   :  { %v1386_v25 = vmax.f32 %v1366_v7, %v1376_v32  ;;  %v1190_v54 = vadd.f32 %v5224_v57, %v1189_v56  ;;  %v1248_v32 = vmax.f32 %v1013_v28, 0.0  ;;  %1569 = vmatpush.msra.mxu2 %v5318_v19  ;;  %v1338_v7 = vmax.f32 %v1258_v6, %v1298_v10 }
 0x306   :  { %v1358_v56 = vmax.f32 %v1278_v18, %v1318_v40  ;;  %1588 = vmatpush.msra.mxu3 %v5345_v13  ;;  %v1049_v62 = vadd.f32 %v5224_v57, %v4932_v31  ;;  %v1229_v10 = vadd.f32 %v5224_v57, %v5188_v4  ;;  %v1139_v40 = vadd.f32 %v5224_v57, %v5143_v63 }
 0x307   :  { %v1307_v58 = vmax.f32 %v1190_v54, 0.0  ;;  %3684 = vmatmul.msk.f32.vlgmr.msrb.gmra.mxu2 %vm1405_vm2, %v1386_v25  ;;  %3694 = vmatmul.msk.f32.vlgmr.msrb.gmra.mxu3 %vm1405_vm2, %v1386_v25  ;;  %v1328_v25 = vmax.f32 %v1248_v32, %v1288_v26  ;;  %v1136_v54 = vadd.f32 %v5224_v57, %v5139_v53  ;;  %v1319_v53 = vmax.f32 %v1226_v35, 0.0 }
 0x308   :  { %v1378_v37 = vmax.f32 %v1338_v7, %v1358_v56  ;;  %1570 = vmatpush.msra.mxu2 %v5348_v29  ;;  %v1079_v6 = vadd.f32 %v5224_v57, %v5022_v59  ;;  %v1300_v31 = vmax.f32 %v1169_v48, 0.0  ;;  %v1290_v7 = vmax.f32 %v1139_v40, 0.0 }
 0x309   :  { %v1347_v49 = vmax.f32 %v1267_v33, %v1307_v58  ;;  %v1076_v33 = vadd.f32 %v5224_v57, %v5014_v51  ;;  %v1259_v58 = vmax.f32 %v1046_v47, 0.0  ;;  %v1289_v52 = vmax.f32 %v1136_v54, 0.0 }
 0x30a   :  { %v1172_v56 = vadd.f32 %v5224_v57, %v5201_v60  ;;  %v1052_v41 = vadd.f32 %v5224_v57, %v4942_v43  ;;  %v1232_v54 = vadd.f32 %v5224_v57, %v5195_v27 }
 0x30b   :  { %v1367_v24 = vmax.f32 %v1327_v9, %v1347_v49  ;;  %v1249_v9 = vmax.f32 %v1016_v0, 0.0  ;;  %v1269_v22 = vmax.f32 %v1076_v33, 0.0  ;;  %v1339_v49 = vmax.f32 %v1259_v58, %v1299_v20 }
 0x30c   :  { %v1192_v12 = vpop.f32.mrf.mxu1  ;;  %v1142_v33 = vadd.f32 %v5224_v57, %v5147_v14  ;;  %v1082_v20 = vadd.f32 %v5224_v57, %v5030_v3  ;;  %v1301_v43 = vmax.f32 %v1172_v56, 0.0  ;;  %v1261_v27 = vmax.f32 %v1052_v41, 0.0 }
 0x30d   :  { %v1193_v45 = vadd.f32 %v5224_v57, %v1192_v12  ;;  %v1387_v30 = vmax.f32 %v1367_v24, %v1377_v50  ;;  %v1109_v50 = vadd.f32 %v5224_v57, %v5102_v23  ;;  %v1359_v24 = vmax.f32 %v1279_v11, %v1319_v53  ;;  %v5372_v23 = vld [vmem:[%s6460_s6 + $0x10] sm:$0xff] }
 0x30e   :  { %v1329_v18 = vmax.f32 %v1249_v9, %v1289_v52  ;;  %v1019_v12 = vadd.f32 %v5224_v57, %v4836_v16  ;;  %v5375_v63 = vunpack.c.l.bf16 %v5372_v23  ;;  %v5396_v53 = vunpack.c.h.bf16 %v5312_v2  ;;  %v6496_v2 = vld [vmem:[#allocation19_spill] sm:$0xff] }
 0x30f   :  { %v1308_v36 = vmax.f32 %v1193_v45, 0.0  ;;  %3685 = vmatmul.msk.f32.gmra.mxu2 %vm1405_vm2, %v1387_v30  ;;  %3695 = vmatmul.msk.f32.gmra.mxu3 %vm1405_vm2, %v1387_v30  ;;  %v1379_v26 = vmax.f32 %v1339_v49, %v1359_v24  ;;  %v1280_v4 = vmax.f32 %v1109_v50, 0.0  ;;  %v1320_v30 = vmax.f32 %v1229_v10, 0.0  ;;  %v6498_v10 = vld [vmem:[#allocation11_spill] sm:$0xff] }
 0x310   :  { %v1250_v59 = vmax.f32 %v1019_v12, 0.0  ;;  %1571 = vmatpush.msra.mxu2 %v5375_v63  ;;  %v1291_v3 = vmax.f32 %v1142_v33, 0.0  ;;  %1589 = vmatpush.msra.mxu3 %v5396_v53  ;;  %v1175_v9 = vadd.f32 %v5224_v57, %v6496_v2  ;;  %v1271_v49 = vmax.f32 %v1082_v20, 0.0 }
 0x311   :  { %v1348_v42 = vmax.f32 %v1268_v1, %v1308_v36  ;;  %v1260_v1 = vmax.f32 %v1049_v62, 0.0  ;;  %v1270_v36 = vmax.f32 %v1079_v6, 0.0  ;;  %v1341_v48 = vmax.f32 %v1261_v27, %v1301_v43  ;;  %v6497_v62 = vld [vmem:[#allocation5_spill] sm:$0xff]  ;;  %v6506_v27 = vld [vmem:[#allocation6_spill] sm:$0xff] }
 0x312   :  { %v1330_v0 = vmax.f32 %v1250_v59, %v1290_v7  ;;  %v1055_v50 = vadd.f32 %v5224_v57, %v6497_v62  ;;  %v1115_v24 = vadd.f32 %v5224_v57, %v6498_v10  ;;  %v1302_v7 = vmax.f32 %v1175_v9, 0.0  ;;  %v6503_v59 = vld [vmem:[#allocation23_spill] sm:$0xff] }
 0x313   :  { %v1368_v39 = vmax.f32 %v1328_v25, %v1348_v42  ;;  %v1340_v47 = vmax.f32 %v1260_v1, %v1300_v31  ;;  %v1360_v25 = vmax.f32 %v1280_v4, %v1320_v30  ;;  %v1112_v42 = vadd.f32 %v5224_v57, %v5107_v34  ;;  %v1531_v34 = vld [vmem:[%s6460_s6 + $0x8] sm:$0xff]  ;;  %v6501_v4 = vld [vmem:[#allocation2_spill] sm:$0xff] }
 0x314   :  { %v1195_v46 = vpop.f32.mrf.mxu1  ;;  %v5401_v11 = vunpack.c.l.bf16 %v1531_v34  ;;  %v1025_v30 = vadd.f32 %v5224_v57, %v6501_v4  ;;  %v5440_v43 = vunpack.c.h.bf16 %v5372_v23  ;;  %v6509_v9 = vld [vmem:[#allocation15_spill] sm:$0xff] }
 0x315   :  { %v1196_v51 = vadd.f32 %v5224_v57, %v1195_v46  ;;  %v1388_v44 = vmax.f32 %v1368_v39, %v1378_v37  ;;  %v1022_v37 = vadd.f32 %v5224_v57, %v4844_v21  ;;  %v1380_v39 = vmax.f32 %v1340_v47, %v1360_v25 }
 0x316   :  { %v1321_v46 = vmax.f32 %v1232_v54, 0.0  ;;  %v5404_v21 = vunpack.c.h.bf16 %v5342_v17  ;;  %v1281_v52 = vmax.f32 %v1112_v42, 0.0  ;;  %1572 = vmatpush.msra.mxu2 %v5401_v11  ;;  %v1530_v17 = vld [vmem:[%s6460_s6] sm:$0xff]  ;;  %v1282_v47 = vmax.f32 %v1115_v24, 0.0  ;;  %v6504_v42 = vld [vmem:[#allocation24_spill] sm:$0xff] }
 0x317   :  { %v1309_v28 = vmax.f32 %v1196_v51, 0.0  ;;  %3686 = vmatmul.msk.f32.gmra.mxu2 %vm1405_vm2, %v1388_v44  ;;  %3696 = vmatmul.msk.f32.gmra.mxu3 %vm1405_vm2, %v1388_v44 }
 0x318   :  { %1590 = vmatpush.msra.mxu3 %v5404_v21  ;;  %v1361_v12 = vmax.f32 %v1281_v52, %v1321_v46  ;;  %v1058_v46 = vadd.f32 %v5224_v57, %v6506_v27  ;;  %v6507_v52 = vld [vmem:[#allocation12_spill] sm:$0xff] }
 0x319   :  { %v1349_v8 = vmax.f32 %v1269_v22, %v1309_v28  ;;  %v1251_v22 = vmax.f32 %v1022_v37, 0.0  ;;  %v6505_v37 = vld [vmem:[#allocation21_spill] sm:$0xff] }
 0x31a   :  { %v1178_v20 = vadd.f32 %v5224_v57, %v6505_v37  ;;  %1591 = vmatpush.msra.mxu3 %v5440_v43 }
 0x31b   :  { %v1369_v45 = vmax.f32 %v1329_v18, %v1349_v8  ;;  %v6499_v18 = vld [vmem:[#allocation17_spill] sm:$0xff]  ;;  %v5423_v8 = vunpack.c.l.bf16 %v1530_v17  ;;  %v1331_v6 = vmax.f32 %v1251_v22, %v1291_v3  ;;  %v1118_v3 = vadd.f32 %v5224_v57, %v6507_v52 }
 0x31c   :  { %v1198_v32 = vpop.f32.mrf.mxu1  ;;  %v1235_v40 = vadd.f32 %v5224_v57, %v6499_v18  ;;  %v1148_v22 = vadd.f32 %v5224_v57, %v6509_v9  ;;  %v1303_v10 = vmax.f32 %v1178_v20, 0.0  ;;  %v6518_v20 = vld [vmem:[#allocation10_spill] sm:$0xff] }
 0x31d   :  { %v1199_v16 = vadd.f32 %v5224_v57, %v1198_v32  ;;  %v1389_v38 = vmax.f32 %v1369_v45, %v1379_v26  ;;  %v6500_v26 = vld [vmem:[#allocation14_spill] sm:$0xff]  ;;  %v6502_v32 = vld [vmem:[#allocation8_spill] sm:$0xff]  ;;  %1573 = vmatpush.msra.mxu2 %v5423_v8  ;;  %v1283_v18 = vmax.f32 %v1118_v3, 0.0 }
 0x31e   :  { %v1145_v31 = vadd.f32 %v5224_v57, %v6500_v26  ;;  %v1085_v1 = vadd.f32 %v5224_v57, %v6502_v32  ;;  %v1322_v56 = vmax.f32 %v1235_v40, 0.0  ;;  %v6512_v32 = vld [vmem:[#allocation22_spill] sm:$0xff] }
 0x31f   :  { %v1310_v35 = vmax.f32 %v1199_v16, 0.0  ;;  %3687 = vmatmul.msk.f32.gmra.mxu2 %vm1405_vm2, %v1389_v38  ;;  %3697 = vmatmul.msk.f32.gmra.mxu3 %vm1405_vm2, %v1389_v38  ;;  %v1381_v16 = vmax.f32 %v1341_v48, %v1361_v12 }
 0x320   :  { %1670 = vmatpush.msrb.mxu2 %v6503_v59  ;;  %v1292_v41 = vmax.f32 %v1145_v31, 0.0  ;;  %v1272_v33 = vmax.f32 %v1085_v1, 0.0  ;;  %v1181_v1 = vadd.f32 %v5224_v57, %v6512_v32 }
 0x321   :  { %v1350_v60 = vmax.f32 %v1270_v36, %v1310_v35  ;;  %v1262_v36 = vmax.f32 %v1055_v50, 0.0 }
 0x322   :  { %1671 = vmatpush.msrb.mxu2 %v6504_v42 }
 0x323   :  { %v1370_v58 = vmax.f32 %v1330_v0, %v1350_v60  ;;  %v1252_v0 = vmax.f32 %v1025_v30, 0.0  ;;  %v1342_v60 = vmax.f32 %v1262_v36, %v1302_v7 }
 0x324   :  { %v1201_v14 = vpop.f32.mrf.mxu1  ;;  %1672 = vmatpush.msrb.mxu2 %v5268_v15 }
 0x325   :  { %v1202_v51 = vadd.f32 %v5224_v57, %v1201_v14  ;;  %v1390_v44 = vmax.f32 %v1370_v58, %v1380_v39  ;;  %v5442_v58 = vunpack.c.h.bf16 %v1531_v34  ;;  %v1362_v14 = vmax.f32 %v1282_v47, %v1322_v56  ;;  %v6514_v47 = vld [vmem:[#allocation20_spill] sm:$0xff] }
 0x326   :  { %v1332_v2 = vmax.f32 %v1252_v0, %v1292_v41  ;;  %v5454_v34 = vunpack.c.h.bf16 %v1530_v17  ;;  %1673 = vmatpush.msrb.mxu2 %v5318_v19  ;;  %v1263_v17 = vmax.f32 %v1058_v46, 0.0  ;;  %v1241_v56 = vadd.f32 %v5224_v57, %v6514_v47 }
 0x327   :  { %v1311_v28 = vmax.f32 %v1202_v51, 0.0  ;;  %3688 = vmatmul.msk.f32.gmra.mxu2 %vm1405_vm2, %v1390_v44  ;;  %3698 = vmatmul.msk.f32.gmra.mxu3 %vm1405_vm2, %v1390_v44  ;;  %v6508_v51 = vld [vmem:[#allocation18_spill] sm:$0xff]  ;;  %v1382_v50 = vmax.f32 %v1342_v60, %v1362_v14  ;;  %v6517_v60 = vld [vmem:[#allocation4_spill] sm:$0xff]  ;;  %v1304_v46 = vmax.f32 %v1181_v1, 0.0 }
 0x328   :  { %v1238_v44 = vadd.f32 %v5224_v57, %v6508_v51  ;;  %1592 = vmatpush.msra.mxu3 %v5442_v58  ;;  %1674 = vmatpush.msrb.mxu2 %v5348_v29  ;;  %v1343_v30 = vmax.f32 %v1263_v17, %v1303_v10  ;;  %v1031_v37 = vadd.f32 %v5224_v57, %v6517_v60  ;;  %v1324_v3 = vmax.f32 %v1241_v56, 0.0 }
 0x329   :  { %v1351_v45 = vmax.f32 %v1271_v49, %v1311_v28  ;;  %v6510_v49 = vld [vmem:[#allocation3_spill] sm:$0xff]  ;;  %v6511_v28 = vld [vmem:[#allocation9_spill] sm:$0xff] }
 0x32a   :  { %v1028_v48 = vadd.f32 %v5224_v57, %v6510_v49  ;;  %v1088_v62 = vadd.f32 %v5224_v57, %v6511_v28  ;;  %v1323_v40 = vmax.f32 %v1238_v44, 0.0  ;;  %1593 = vmatpush.msra.mxu3 %v5454_v34  ;;  %1675 = vmatpush.msrb.mxu2 %v5375_v63 }
 0x32b   :  { %v1371_v38 = vmax.f32 %v1331_v6, %v1351_v45  ;;  %v1293_v6 = vmax.f32 %v1148_v22, 0.0 }
 0x32c   :  { %v1204_v35 = vpop.f32.mrf.mxu1  ;;  %v1253_v45 = vmax.f32 %v1028_v48, 0.0  ;;  %1690 = vmatpush.msrb.mxu3 %v5289_v55  ;;  %v1273_v4 = vmax.f32 %v1088_v62, 0.0  ;;  %v1363_v36 = vmax.f32 %v1283_v18, %v1323_v40  ;;  %1676 = vmatpush.msrb.mxu2 %v5401_v11  ;;  %v4479_v40 = vmov 0.0  }
 0x32d   :  { %v1205_v25 = vadd.f32 %v5224_v57, %v1204_v35  ;;  %v1391_v54 = vmax.f32 %v1371_v38, %v1381_v16  ;;  %v6513_v16 = vld [vmem:[#allocation7_spill] sm:$0xff]  ;;  %v6515_v35 = vld [vmem:[#allocation13_spill] sm:$0xff] }
 0x32e   :  { %v1061_v38 = vadd.f32 %v5224_v57, %v6513_v16  ;;  %1691 = vmatpush.msrb.mxu3 %v5315_v61  ;;  %v1121_v41 = vadd.f32 %v5224_v57, %v6515_v35  ;;  %1677 = vmatpush.msrb.mxu2 %v5423_v8  ;;  %v1383_v27 = vmax.f32 %v1343_v30, %v1363_v36  ;;  %v1399_v35 = vld [vmem:[%s6461_s7] sm:$0x3]  ;;  %s4480_s7 = smov 64  }
 0x32f   :  { %v1312_v39 = vmax.f32 %v1205_v25, 0.0  ;;  %3689 = vmatmul.msk.f32.gmra.mxu2 %vm1405_vm2, %v1391_v54  ;;  %3699 = vmatmul.msk.f32.gmra.mxu3 %vm1405_vm2, %v1391_v54  ;;  %v1333_v25 = vmax.f32 %v1253_v45, %v1293_v6  ;;  %v6516_v54 = vld [vmem:[#allocation16_spill] sm:$0xff] }
 0x330   :  { %v1151_v0 = vadd.f32 %v5224_v57, %v6516_v54  ;;  %1692 = vmatpush.msrb.mxu3 %v5345_v13  ;;  %v1264_v52 = vmax.f32 %v1061_v38, 0.0  ;;  %v1284_v44 = vmax.f32 %v1121_v41, 0.0 }
 0x331   :  { %v1352_v23 = vmax.f32 %v1272_v33, %v1312_v39  ;;  %v1091_v39 = vadd.f32 %v5224_v57, %v6518_v20 }
 0x332   :  { %1693 = vmatpush.msrb.mxu3 %v5396_v53  ;;  %v1344_v48 = vmax.f32 %v1264_v52, %v1304_v46  ;;  %v1364_v62 = vmax.f32 %v1284_v44, %v1324_v3 }
 0x333   :  { %v1372_v24 = vmax.f32 %v1332_v2, %v1352_v23  ;;  %v1294_v2 = vmax.f32 %v1151_v0, 0.0  ;;  %v1254_v23 = vmax.f32 %v1031_v37, 0.0  ;;  %v1274_v49 = vmax.f32 %v1091_v39, 0.0 }
 0x334   :  { %v1207_v12 = vpop.f32.mrf.mxu1  ;;  %1694 = vmatpush.msrb.mxu3 %v5404_v21 }
 0x335   :  { %v1208_v26 = vadd.f32 %v5224_v57, %v1207_v12  ;;  %v1392_v31 = vmax.f32 %v1372_v24, %v1382_v50  ;;  %v1334_v50 = vmax.f32 %v1254_v23, %v1294_v2  ;;  %v1384_v24 = vmax.f32 %v1344_v48, %v1364_v62 }
 0x336   :  { %1695 = vmatpush.msrb.mxu3 %v5440_v43 }
 0x337   :  { %v1313_v7 = vmax.f32 %v1208_v26, 0.0  ;;  %3690 = vmatmul.msk.f32.gmra.mxu2 %vm1405_vm2, %v1392_v31  ;;  %3700 = vmatmul.msk.f32.gmra.mxu3 %vm1405_vm2, %v1392_v31 }
 0x338   :  { %1696 = vmatpush.msrb.mxu3 %v5442_v58 }
 0x339   :  { %v1353_v33 = vmax.f32 %v1273_v4, %v1313_v7 }
 0x33a   :  { %1697 = vmatpush.msrb.mxu3 %v5454_v34 }
 0x33b   :  { %v1373_v14 = vmax.f32 %v1333_v25, %v1353_v33  ;;  %v5536_v25 = vperm.slane %v1399_v35, 0 }
 0x33c   :  { %v1210_v51 = vpop.f32.mrf.mxu1 }
 0x33d   :  { %v1211_v9 = vadd.f32 %v5224_v57, %v1210_v51  ;;  %v1393_v22 = vmax.f32 %v1373_v14, %v1383_v27  ;;  %v5543_v14 = vperm.slane %v1399_v35, 1 }
 0x33f   :  { %v1314_v28 = vmax.f32 %v1211_v9, 0.0  ;;  %3691 = vmatmul.msk.f32.gmra.mxu2 %vm1405_vm2, %v1393_v22  ;;  %3701 = vmatmul.msk.f32.gmra.mxu3 %vm1405_vm2, %v1393_v22 }
 0x341   :  { %v1354_v10 = vmax.f32 %v1274_v49, %v1314_v28 }
 0x343   :  { %v1374_v57 = vmax.f32 %v1334_v50, %v1354_v10 }
 0x345   :  { %v1394_v18 = vmax.f32 %v1374_v57, %v1384_v24 }
 0x347   :  { %3692 = vmatmul.msk.f32.gmra.mxu2 %vm1405_vm2, %v1394_v18  ;;  %3702 = vmatmul.msk.f32.gmra.mxu3 %vm1405_vm2, %v1394_v18 }
 0x34f   :  { %3693 = vmatmul.msk.f32.gmra.mxu2 %vm1405_vm2, %v5271_v5  ;;  %3703 = vmatmul.msk.f32.gmra.mxu3 %vm1405_vm2, %v5271_v5 }
 0x357   :  { %1574 = vmatmul.f32.vlgmr.msra.gmra.mxu2 %v4479_v40  ;;  %1594 = vmatmul.f32.vlgmr.msra.gmra.mxu3 %v4479_v40 }
 0x38a   :  { %v1453_v12 = vpop.f32.mrf.mxu2  ;;  %v1500_v17 = vpop.f32.mrf.mxu3 }
 0x38b   :  { %v1454_v54 = vadd.f32 %v1453_v12, %v5536_v25  ;;  %v1501_v3 = vadd.f32 %v1500_v17, %v5543_v14 }
 0x392   :  { %v5501_v6 = vpop.f32.mrf.mxu2  ;;  %v5503_v26 = vpop.f32.mrf.mxu3 }
 0x39a   :  { %v5505_v31 = vpop.f32.mrf.mxu2  ;;  %v5507_v45 = vpop.f32.mrf.mxu3 }
 0x3a2   :  { %v5509_v4 = vpop.f32.mrf.mxu2  ;;  %v5511_v30 = vpop.f32.mrf.mxu3 }
 0x3aa   :  { %v5513_v32 = vpop.f32.mrf.mxu2  ;;  %v5515_v5 = vpop.f32.mrf.mxu3 }
 0x3b2   :  { %v5517_v1 = vpop.f32.mrf.mxu2  ;;  %v5521_v16 = vpop.f32.mrf.mxu3 }
 0x3ba   :  { %v5519_v7 = vpop.f32.mrf.mxu2  ;;  %v5525_v36 = vpop.f32.mrf.mxu3 }
 0x3c2   :  { %v5523_v38 = vpop.f32.mrf.mxu2  ;;  %v5529_v56 = vpop.f32.mrf.mxu3 }
 0x3ca   :  { %v5527_v47 = vpop.f32.mrf.mxu2  ;;  %v5539_v0 = vpop.f32.mrf.mxu3 }
 0x3d2   :  { %v5534_v41 = vpop.f32.mrf.mxu2  ;;  %v5541_v39 = vpop.f32.mrf.mxu3 }
 0x3da   :  { %v1575_v33 = vpop.f32.mrf.mxu2  ;;  %v1595_v52 = vpop.f32.mrf.mxu3 }
 0x3db   :  { %v1598_v60 = vadd.f32 %v1575_v33, %v1454_v54  ;;  %v1599_v44 = vadd.f32 %v1595_v52, %v1501_v3 }
 0x3dd   :  { %v1600_v37 = vsub.f32 0.0, %v1598_v60  ;;  %v1620_v57 = vsub.f32 0.0, %v1599_v44 }
 0x3df   :  { %v1601_v20 = vmul.f32 1.442695, %v1600_v37  ;;  %v1621_v18 = vmul.f32 1.442695, %v1620_v57 }
 0x3e1   :  { %4354 = vpow2.f32 %v1601_v20 }
 0x3e7   :  { %v4355_v27 = vpop.eup %4354 }
 0x3e8   :  { %v1603_v46 = vadd.f32 1.0, %v4355_v27 }
 0x3ea   :  { %4356 = vrcp.f32 %v1603_v46  ;;  %v1615_v22 = vand.u32 2147483648, %v1603_v46  ;;  %v1613_v49 = vand.u32 2147483647, %v1603_v46  ;;  %vm1609_vm4 = vweird.f32 %v1603_v46 }
 0x3eb   :  { %4358 = vtanh.f32 %v1599_v44 }
 0x3ec   :  { %v1616_v28 = vor.u32 1.1754944e-38, %v1615_v22  ;;  %vm1614_vm6 = vcmp.eq.f32.partialorder %v1613_v49, 8.507059e+37  ;;  %4360 = vpow2.f32 %v1621_v18  ;;  %v1457_v49 = vadd.f32 %v5501_v6, %v5536_v25 }
 0x3ed   :  { %v1504_v18 = vadd.f32 %v5503_v26, %v5543_v14 }
 0x3f0   :  { %v4357_v51 = vpop.eup %4356 }
 0x3f1   :  { %v1605_v2 = vmul.f32 %v4357_v51, %v1603_v46  ;;  %vm1610_vm3 = vweird.f32 %v4357_v51  ;;  %v4359_v50 = vpop.eup %4358 }
 0x3f2   :  { %vm1611_vm5 = vmor %vm1609_vm4, %vm1610_vm3  ;;  %v4361_v40 = vpop.eup %4360 }
 0x3f3   :  { %v1606_v9 = vsub.f32 1.0, %v1605_v2  ;;  %v1623_v12 = vadd.f32 1.0, %v4361_v40 }
 0x3f5   :  { %v1607_v23 = vmul.f32 %v4357_v51, %v1606_v9  ;;  %4362 = vrcp.f32 %v1623_v12  ;;  %v1635_v46 = vand.u32 2147483648, %v1623_v12  ;;  %vm1629_vm8 = vweird.f32 %v1623_v12 }
 0x3f6   :  { %v1633_v52 = vand.u32 2147483647, %v1623_v12 }
 0x3f7   :  { %v1608_v48 = vadd.f32 %v4357_v51, %v1607_v23 }
 0x3f8   :  { %vm1634_vm10 = vcmp.eq.f32.partialorder %v1633_v52, 8.507059e+37 }
 0x3f9   :  { %v1612_v62 = vsel %vm1611_vm5, %v4357_v51, %v1608_v48  ;;  %v1636_v51 = vor.u32 1.1754944e-38, %v1635_v46 }
 0x3fa   :  { %v1617_v10 = vsel %vm1614_vm6, %v1616_v28, %v1612_v62 }
 0x3fb   :  { %v1640_v24 = vmul.f32 %v4359_v50, %v1617_v10  ;;  %v4363_v17 = vpop.eup %4362  ;;  %v1639_v60 = vmul.f32 0.0, %v1617_v10 }
 0x3fc   :  { %v1625_v35 = vmul.f32 %v4363_v17, %v1623_v12  ;;  %vm1630_vm7 = vweird.f32 %v4363_v17 }
 0x3fd   :  { %1642 = vrot.lane.b32.xlu0 %v1640_v24, %s4480_s7  ;;  %vm1631_vm9 = vmor %vm1629_vm8, %vm1630_vm7 }
 0x3fe   :  { %v1626_v54 = vsub.f32 1.0, %v1625_v35 }
 0x400   :  { %v1627_v33 = vmul.f32 %v4363_v17, %v1626_v54 }
 0x402   :  { %v1628_v27 = vadd.f32 %v4363_v17, %v1627_v33 }
 0x404   :  { %v1632_v3 = vsel %vm1631_vm9, %v4363_v17, %v1628_v27 }
 0x405   :  { %v1637_v2 = vsel %vm1634_vm10, %v1636_v51, %v1632_v3 }
 0x46f   :  { %v1643_v37 = vpop.permute.xlu0 %1642 }
 0x470   :  { %v1645_v20 = vadd.f32 %v1643_v37, %v1639_v60 }
 0x472   :  { %4364 = vtanh.f32 %v1645_v20 }
 0x478   :  { %v4365_v44 = vpop.eup %4364 }
 0x479   :  { %v1647_v9 = vmul.f32 %v4365_v44, %v1637_v2 }
 0x47b   :  { %1658 = vrot.lane.b32.xlu0 %v1647_v9, %s4480_s7  ;;  %v1648_v22 = vpack.c.bf16 %v1647_v9, %v1647_v9 }
 0x47d   :  { %1835 = vrot.lane.b32.xlu2 %v1648_v22, %s4480_s7 }
 0x4ed   :  { %v1659_v23 = vpop.permute.xlu0 %1658 }
 0x4ee   :  { %3704 = vmatmul.msk.f32.vlgmr.msrb.gmra.mxu2 %vm1554_vm11, %v1659_v23  ;;  %3705 = vmatmul.msk.f32.vlgmr.msrb.gmra.mxu3 %vm1554_vm11, %v1659_v23 }
 0x571   :  { %v1679_v48 = vpop.f32.mrf.mxu2  ;;  %v1699_v57 = vpop.f32.mrf.mxu3 }
 0x572   :  { %v1702_v28 = vadd.f32 %v1679_v48, %v1457_v49  ;;  %v1703_v12 = vadd.f32 %v1699_v57, %v1504_v18 }
 0x574   :  { %v1704_v62 = vsub.f32 0.0, %v1702_v28  ;;  %v1724_v26 = vsub.f32 0.0, %v1703_v12 }
 0x576   :  { %v1705_v50 = vmul.f32 1.442695, %v1704_v62  ;;  %v1725_v51 = vmul.f32 1.442695, %v1724_v26 }
 0x578   :  { %4366 = vpow2.f32 %v1705_v50 }
 0x57e   :  { %v4367_v10 = vpop.eup %4366 }
 0x57f   :  { %v1707_v24 = vadd.f32 1.0, %v4367_v10 }
 0x581   :  { %4368 = vrcp.f32 %v1707_v24  ;;  %v1719_v54 = vand.u32 2147483648, %v1707_v24  ;;  %v1717_v6 = vand.u32 2147483647, %v1707_v24  ;;  %vm1713_vm13 = vweird.f32 %v1707_v24 }
 0x582   :  { %4370 = vtanh.f32 %v1703_v12 }
 0x583   :  { %v1720_v37 = vor.u32 1.1754944e-38, %v1719_v54  ;;  %vm1718_vm15 = vcmp.eq.f32.partialorder %v1717_v6, 8.507059e+37  ;;  %4372 = vpow2.f32 %v1725_v51  ;;  %v4149_v54 = vld [vmem:[%s6462_s8 + $0x74] sm:$0xf0] }
 0x587   :  { %v4369_v40 = vpop.eup %4368 }
 0x588   :  { %v1709_v17 = vmul.f32 %v4369_v40, %v1707_v24  ;;  %vm1714_vm12 = vweird.f32 %v4369_v40  ;;  %v4371_v46 = vpop.eup %4370 }
 0x589   :  { %vm1715_vm14 = vmor %vm1713_vm13, %vm1714_vm12  ;;  %v4373_v44 = vpop.eup %4372 }
 0x58a   :  { %v1710_v35 = vsub.f32 1.0, %v1709_v17  ;;  %v1727_v2 = vadd.f32 1.0, %v4373_v44  ;;  %v3724_v44 = vld [vmem:[%s6462_s8 + $0x50] sm:$0xf] }
 0x58c   :  { %v1711_v33 = vmul.f32 %v4369_v40, %v1710_v35  ;;  %4374 = vrcp.f32 %v1727_v2  ;;  %v1739_v10 = vand.u32 2147483648, %v1727_v2  ;;  %vm1733_vm1 = vweird.f32 %v1727_v2  ;;  %v3740_v35 = vld [vmem:[%s6462_s8 + $0x70] sm:$0xf] }
 0x58d   :  { %v1737_v24 = vand.u32 2147483647, %v1727_v2  ;;  %v3741_v6 = vor.u32 %v4149_v54, %v3740_v35  ;;  %v3766_v35 = vld [vmem:[%s6462_s8 + $0x20] sm:$0xf]  ;;  %v4139_v54 = vld [vmem:[%s6462_s8 + $0x24] sm:$0xf0] }
 0x58e   :  { %v1712_v60 = vadd.f32 %v4369_v40, %v1711_v33  ;;  %v1740_v18 = vor.u32 1.1754944e-38, %v1739_v10  ;;  %v4148_v33 = vld [vmem:[%s6462_s8 + $0x74] sm:$0xf]  ;;  %v3718_v10 = vld [vmem:[%s6462_s8 + $0x48] sm:$0xf0] }
 0x58f   :  { %vm1738_vm3 = vcmp.eq.f32.partialorder %v1737_v24, 8.507059e+37  ;;  %1812 = vmatpush.bf16.msra.mxu2 %v3741_v6  ;;  %v4138_v6 = vld [vmem:[%s6462_s8 + $0x24] sm:$0xf] }
 0x590   :  { %v1716_v27 = vsel %vm1715_vm14, %v4369_v40, %v1712_v60  ;;  %v3742_v60 = vld [vmem:[%s6462_s8 + $0x78] sm:$0xf0] }
 0x591   :  { %v1721_v52 = vsel %vm1718_vm15, %v1720_v37, %v1716_v27  ;;  %v3732_v37 = vld [vmem:[%s6462_s8 + $0x60] sm:$0xf]  ;;  %v4147_v27 = vld [vmem:[%s6462_s8 + $0x64] sm:$0xf0] }
 0x592   :  { %v1744_v3 = vmul.f32 %v4371_v46, %v1721_v52  ;;  %v4375_v9 = vpop.eup %4374  ;;  %v1743_v48 = vmul.f32 %v1721_v52, %v1645_v20  ;;  %v3745_v46 = vor.u32 %v4148_v33, %v3742_v60  ;;  %v4146_v52 = vld [vmem:[%s6462_s8 + $0x64] sm:$0xf]  ;;  %v3733_v26 = vor.u32 %v4147_v27, %v3732_v37  ;;  %v3768_v60 = vld [vmem:[%s6462_s8 + $0x28] sm:$0xf0] }
 0x593   :  { %v1729_v22 = vmul.f32 %v4375_v9, %v1727_v2  ;;  %vm1734_vm0 = vweird.f32 %v4375_v9  ;;  %v4145_v2 = vld [vmem:[%s6462_s8 + $0x54] sm:$0xf0]  ;;  %v3767_v37 = vor.u32 %v4139_v54, %v3766_v35  ;;  %v3771_v27 = vor.u32 %v4138_v6, %v3768_v60 }
 0x594   :  { %1746 = vrot.lane.b32.xlu1 %v1744_v3, %s4480_s7  ;;  %vm1735_vm2 = vmor %vm1733_vm1, %vm1734_vm0  ;;  %v3734_v3 = vld [vmem:[%s6462_s8 + $0x68] sm:$0xf0]  ;;  %1825 = vmatpush.bf16.msra.mxu3 %v3745_v46  ;;  %v3758_v46 = vld [vmem:[%s6462_s8 + $0x10] sm:$0xf]  ;;  %v1460_v54 = vadd.f32 %v5505_v31, %v5536_v25 }
 0x595   :  { %v1730_v23 = vsub.f32 1.0, %v1729_v22  ;;  %v3737_v51 = vor.u32 %v4146_v52, %v3734_v3  ;;  %v3726_v22 = vld [vmem:[%s6462_s8 + $0x58] sm:$0xf0]  ;;  %1813 = vmatpush.bf16.msra.mxu2 %v3733_v26  ;;  %v4137_v52 = vld [vmem:[%s6462_s8 + $0x14] sm:$0xf0] }
 0x596   :  { %v4136_v3 = vld [vmem:[%s6462_s8 + $0x14] sm:$0xf]  ;;  %v3760_v26 = vld [vmem:[%s6462_s8 + $0x18] sm:$0xf0] }
 0x597   :  { %v1731_v49 = vmul.f32 %v4375_v9, %v1730_v23  ;;  %v3725_v23 = vor.u32 %v4145_v2, %v3724_v44  ;;  %v3763_v44 = vor.u32 %v4136_v3, %v3760_v26  ;;  %v3750_v2 = vld [vmem:[%s6462_s8] sm:$0xf]  ;;  %v1507_v3 = vadd.f32 %v5507_v45, %v5543_v14 }
 0x598   :  { %1826 = vmatpush.bf16.msra.mxu3 %v3737_v51  ;;  %v3759_v51 = vor.u32 %v4137_v52, %v3758_v46 }
 0x599   :  { %v1732_v50 = vadd.f32 %v4375_v9, %v1731_v49  ;;  %1814 = vmatpush.bf16.msra.mxu2 %v3725_v23  ;;  %v3752_v23 = vld [vmem:[%s6462_s8 + $0x8] sm:$0xf0] }
 0x59b   :  { %v1736_v57 = vsel %vm1735_vm2, %v4375_v9, %v1732_v50  ;;  %v4144_v9 = vld [vmem:[%s6462_s8 + $0x54] sm:$0xf]  ;;  %v4142_v50 = vld [vmem:[%s6462_s8 + $0x44] sm:$0xf] }
 0x59c   :  { %v1741_v12 = vsel %vm1738_vm3, %v1740_v18, %v1736_v57  ;;  %v3729_v49 = vor.u32 %v4144_v9, %v3726_v22  ;;  %v3721_v57 = vor.u32 %v4142_v50, %v3718_v10  ;;  %v3774_v18 = vld [vmem:[%s6462_s8 + $0x30] sm:$0xf]  ;;  %v4135_v9 = vld [vmem:[%s6462_s8 + $0x4] sm:$0xf0]  ;;  %v4134_v22 = vld [vmem:[%s6462_s8 + $0x4] sm:$0xf]  ;;  %v1836_v50 = vpop.permute.xlu2 %1835 }
 0x59e   :  { %1827 = vmatpush.bf16.msra.mxu3 %v3729_v49  ;;  %v3751_v49 = vor.u32 %v4135_v9, %v3750_v2 }
 0x5a2   :  { %1828 = vmatpush.bf16.msra.mxu3 %v3721_v57 }
 0x606   :  { %v1747_v28 = vpop.permute.xlu1 %1746 }
 0x607   :  { %v5556_v62 = vadd.f32 %v1747_v28, %v1743_v48  ;;  %v3716_v48 = vld [vmem:[%s6462_s8 + $0x40] sm:$0xf]  ;;  %v4143_v28 = vld [vmem:[%s6462_s8 + $0x44] sm:$0xf0] }
 0x608   :  { %v3717_v24 = vor.u32 %v4143_v28, %v3716_v48  ;;  %v3755_v48 = vor.u32 %v4134_v22, %v3752_v23 }
 0x609   :  { %4376 = vtanh.f32 %v5556_v62 }
 0x60a   :  { %1815 = vmatpush.bf16.msra.mxu2 %v3717_v24 }
 0x60f   :  { %v4377_v40 = vpop.eup %4376 }
 0x610   :  { %v1751_v17 = vmul.f32 %v4377_v40, %v1741_v12  ;;  %v4141_v40 = vld [vmem:[%s6462_s8 + $0x34] sm:$0xf0]  ;;  %v4140_v12 = vld [vmem:[%s6462_s8 + $0x34] sm:$0xf] }
 0x612   :  { %1907 = vrot.lane.b32.xlu2 %v1751_v17, %s4480_s7  ;;  %v1752_v20 = vpack.c.bf16 %v1751_v17, %v1751_v17  ;;  %v3775_v17 = vor.u32 %v4141_v40, %v3774_v18 }
 0x614   :  { %1763 = vrot.lane.b32.xlu1 %v1752_v20, %s4480_s7  ;;  %v3776_v20 = vld [vmem:[%s6462_s8 + $0x38] sm:$0xf0]  ;;  %1884 = vmatpush.bf16.msrb.mxu2 %v3775_v17 }
 0x615   :  { %v3779_v33 = vor.u32 %v4140_v12, %v3776_v20 }
 0x617   :  { %1897 = vmatpush.bf16.msrb.mxu3 %v3779_v33 }
 0x618   :  { %1885 = vmatpush.bf16.msrb.mxu2 %v3767_v37 }
 0x61b   :  { %1898 = vmatpush.bf16.msrb.mxu3 %v3771_v27 }
 0x61c   :  { %1886 = vmatpush.bf16.msrb.mxu2 %v3759_v51 }
 0x61f   :  { %1899 = vmatpush.bf16.msrb.mxu3 %v3763_v44 }
 0x620   :  { %1887 = vmatpush.bf16.msrb.mxu2 %v3751_v49 }
 0x623   :  { %1900 = vmatpush.bf16.msrb.mxu3 %v3755_v48 }
 0x66c   :  { %v1908_v10 = vpop.permute.xlu2 %1907 }
 0x686   :  { %v1764_v28 = vpop.permute.xlu1 %1763 }
 0x687   :  { %3746 = vmatmul.msk.bf16.vlgmr.msra.gmra.mxu2 %vm1554_vm11, %v1764_v28  ;;  %3747 = vmatmul.msk.bf16.vlgmr.msra.gmra.mxu3 %vm1554_vm11, %v1764_v28 }
 0x688   :  { %1919 = vmatpush.msra.mxu2 %v6503_v59  ;;  %1939 = vmatpush.msra.mxu3 %v5289_v55 }
 0x68a   :  { %1920 = vmatpush.msra.mxu2 %v6504_v42  ;;  %1940 = vmatpush.msra.mxu3 %v5315_v61 }
 0x68c   :  { %1921 = vmatpush.msra.mxu2 %v5268_v15  ;;  %1941 = vmatpush.msra.mxu3 %v5345_v13 }
 0x68e   :  { %1922 = vmatpush.msra.mxu2 %v5318_v19  ;;  %1942 = vmatpush.msra.mxu3 %v5396_v53 }
 0x690   :  { %1923 = vmatpush.msra.mxu2 %v5348_v29  ;;  %1943 = vmatpush.msra.mxu3 %v5404_v21 }
 0x692   :  { %1924 = vmatpush.msra.mxu2 %v5375_v63  ;;  %1944 = vmatpush.msra.mxu3 %v5440_v43 }
 0x694   :  { %1925 = vmatpush.msra.mxu2 %v5401_v11  ;;  %1945 = vmatpush.msra.mxu3 %v5442_v58 }
 0x696   :  { %1926 = vmatpush.msra.mxu2 %v5423_v8  ;;  %1946 = vmatpush.msra.mxu3 %v5454_v34 }
 0x697   :  { %3780 = vmatmul.msk.bf16.vlgmr.msrb.gmra.mxu2 %vm1554_vm11, %v1836_v50  ;;  %3781 = vmatmul.msk.bf16.vlgmr.msrb.gmra.mxu3 %vm1554_vm11, %v1836_v50 }
 0x6a7   :  { %3782 = vmatmul.msk.f32.vlgmr.msra.gmra.mxu2 %vm1554_vm11, %v1908_v10  ;;  %3783 = vmatmul.msk.f32.vlgmr.msra.gmra.mxu3 %vm1554_vm11, %v1908_v10 }
 0x70a   :  { %v5679_v24 = vpop.f32.mrf.mxu2  ;;  %v5681_v57 = vpop.f32.mrf.mxu3 }
 0x712   :  { %v1819_v18 = vpop.f32.mrf.mxu2  ;;  %v1832_v40 = vpop.f32.mrf.mxu3 }
 0x71a   :  { %v5683_v12 = vpop.f32.mrf.mxu2  ;;  %v5685_v17 = vpop.f32.mrf.mxu3 }
 0x722   :  { %v1891_v20 = vpop.f32.mrf.mxu2  ;;  %v1904_v35 = vpop.f32.mrf.mxu3 }
 0x72a   :  { %v1928_v33 = vpop.f32.mrf.mxu2  ;;  %v1948_v52 = vpop.f32.mrf.mxu3 }
 0x72b   :  { %v1951_v6 = vadd.f32 %v1928_v33, %v1460_v54  ;;  %v1952_v51 = vadd.f32 %v1948_v52, %v1507_v3 }
 0x72d   :  { %v1953_v60 = vsub.f32 0.0, %v1951_v6  ;;  %v1973_v45 = vsub.f32 0.0, %v1952_v51 }
 0x72f   :  { %v1954_v37 = vmul.f32 1.442695, %v1953_v60  ;;  %v1974_v18 = vmul.f32 1.442695, %v1973_v45  ;;  %v4154_v45 = vld [vmem:[%s6462_s8 + $0xa4] sm:$0xf] }
 0x731   :  { %4378 = vpow2.f32 %v1954_v37 }
 0x737   :  { %v4379_v27 = vpop.eup %4378 }
 0x738   :  { %v1956_v46 = vadd.f32 1.0, %v4379_v27 }
 0x73a   :  { %4380 = vrcp.f32 %v1956_v46  ;;  %v1968_v9 = vand.u32 2147483648, %v1956_v46  ;;  %v1966_v31 = vand.u32 2147483647, %v1956_v46  ;;  %vm1962_vm5 = vweird.f32 %v1956_v46 }
 0x73b   :  { %4382 = vtanh.f32 %v1952_v51 }
 0x73c   :  { %v1969_v49 = vor.u32 1.1754944e-38, %v1968_v9  ;;  %vm1967_vm7 = vcmp.eq.f32.partialorder %v1966_v31, 8.507059e+37  ;;  %4384 = vpow2.f32 %v1974_v18  ;;  %v4157_v31 = vld [vmem:[%s6462_s8 + $0xb4] sm:$0xf0]  ;;  %v3812_v18 = vld [vmem:[%s6462_s8 + $0xa8] sm:$0xf0] }
 0x740   :  { %v4381_v26 = vpop.eup %4380 }
 0x741   :  { %v1958_v44 = vmul.f32 %v4381_v26, %v1956_v46  ;;  %vm1963_vm4 = vweird.f32 %v4381_v26  ;;  %v4383_v28 = vpop.eup %4382 }
 0x742   :  { %vm1964_vm6 = vmor %vm1962_vm5, %vm1963_vm4  ;;  %v4385_v40 = vpop.eup %4384 }
 0x743   :  { %v1959_v2 = vsub.f32 1.0, %v1958_v44  ;;  %v1976_v20 = vadd.f32 1.0, %v4385_v40 }
 0x745   :  { %v1960_v22 = vmul.f32 %v4381_v26, %v1959_v2  ;;  %4386 = vrcp.f32 %v1976_v20  ;;  %v1988_v52 = vand.u32 2147483648, %v1976_v20  ;;  %vm1982_vm9 = vweird.f32 %v1976_v20 }
 0x746   :  { %v1986_v3 = vand.u32 2147483647, %v1976_v20 }
 0x747   :  { %v1961_v23 = vadd.f32 %v4381_v26, %v1960_v22  ;;  %v1989_v51 = vor.u32 1.1754944e-38, %v1988_v52  ;;  %v3818_v22 = vld [vmem:[%s6462_s8 + $0xb0] sm:$0xf]  ;;  %v4151_v52 = vld [vmem:[%s6462_s8 + $0x84] sm:$0xf0] }
 0x748   :  { %vm1987_vm12 = vcmp.eq.f32.partialorder %v1986_v3, 8.507059e+37  ;;  %v4150_v3 = vld [vmem:[%s6462_s8 + $0x84] sm:$0xf] }
 0x749   :  { %v1965_v48 = vsel %vm1964_vm6, %v4381_v26, %v1961_v23  ;;  %v4156_v23 = vld [vmem:[%s6462_s8 + $0xb4] sm:$0xf] }
 0x74a   :  { %v1970_v50 = vsel %vm1967_vm7, %v1969_v49, %v1965_v48  ;;  %v3819_v49 = vor.u32 %v4157_v31, %v3818_v22  ;;  %v3820_v48 = vld [vmem:[%s6462_s8 + $0xb8] sm:$0xf0] }
 0x74b   :  { %v1993_v10 = vmul.f32 %v4383_v28, %v1970_v50  ;;  %v4387_v35 = vpop.eup %4386  ;;  %v1992_v60 = vmul.f32 %v1970_v50, %v5556_v62  ;;  %v3810_v28 = vld [vmem:[%s6462_s8 + $0xa0] sm:$0xf]  ;;  %v4155_v50 = vld [vmem:[%s6462_s8 + $0xa4] sm:$0xf0] }
 0x74c   :  { %v1978_v54 = vmul.f32 %v4387_v35, %v1976_v20  ;;  %vm1983_vm8 = vweird.f32 %v4387_v35  ;;  %2061 = vmatpush.bf16.msrb.mxu2 %v3819_v49  ;;  %v3811_v40 = vor.u32 %v4155_v50, %v3810_v28  ;;  %v3815_v20 = vor.u32 %v4154_v45, %v3812_v18 }
 0x74d   :  { %1995 = vrot.lane.b32.xlu0 %v1993_v10, %s4480_s7  ;;  %vm1984_vm10 = vmor %vm1982_vm9, %vm1983_vm8  ;;  %v3823_v10 = vor.u32 %v4156_v23, %v3820_v48  ;;  %v1463_v28 = vadd.f32 %v5509_v4, %v5536_v25 }
 0x74e   :  { %v1979_v33 = vsub.f32 1.0, %v1978_v54  ;;  %v4153_v54 = vld [vmem:[%s6462_s8 + $0x94] sm:$0xf0] }
 0x74f   :  { %2074 = vmatpush.bf16.msrb.mxu3 %v3823_v10 }
 0x750   :  { %v1980_v6 = vmul.f32 %v4387_v35, %v1979_v33  ;;  %v4152_v33 = vld [vmem:[%s6462_s8 + $0x94] sm:$0xf]  ;;  %2062 = vmatpush.bf16.msrb.mxu2 %v3811_v40 }
 0x752   :  { %v1981_v46 = vadd.f32 %v4387_v35, %v1980_v6  ;;  %v3804_v6 = vld [vmem:[%s6462_s8 + $0x98] sm:$0xf0] }
 0x753   :  { %2075 = vmatpush.bf16.msrb.mxu3 %v3815_v20 }
 0x754   :  { %v1985_v26 = vsel %vm1984_vm10, %v4387_v35, %v1981_v46  ;;  %v3802_v35 = vld [vmem:[%s6462_s8 + $0x90] sm:$0xf]  ;;  %v3794_v46 = vld [vmem:[%s6462_s8 + $0x80] sm:$0xf] }
 0x755   :  { %v1990_v2 = vsel %vm1987_vm12, %v1989_v51, %v1985_v26  ;;  %v3796_v26 = vld [vmem:[%s6462_s8 + $0x88] sm:$0xf0]  ;;  %v3795_v51 = vor.u32 %v4151_v52, %v3794_v46 }
 0x7bf   :  { %v1996_v37 = vpop.permute.xlu0 %1995 }
 0x7c0   :  { %v5693_v27 = vadd.f32 %v1996_v37, %v1992_v60  ;;  %v3803_v60 = vor.u32 %v4153_v54, %v3802_v35  ;;  %v3807_v37 = vor.u32 %v4152_v33, %v3804_v6 }
 0x7c2   :  { %4388 = vtanh.f32 %v5693_v27  ;;  %2063 = vmatpush.bf16.msrb.mxu2 %v3803_v60  ;;  %2076 = vmatpush.bf16.msrb.mxu3 %v3807_v37 }
 0x7c6   :  { %2064 = vmatpush.bf16.msrb.mxu2 %v3795_v51 }
 0x7c8   :  { %v4389_v44 = vpop.eup %4388 }
 0x7c9   :  { %v2000_v9 = vmul.f32 %v4389_v44, %v1990_v2  ;;  %v3799_v44 = vor.u32 %v4150_v3, %v3796_v26 }
 0x7ca   :  { %2098 = vmatpush.msra.mxu2 %v6503_v59 }
 0x7cb   :  { %2086 = vrot.lane.b32.xlu2 %v2000_v9, %s4480_s7  ;;  %v2001_v62 = vpack.c.bf16 %v2000_v9, %v2000_v9  ;;  %2077 = vmatpush.bf16.msrb.mxu3 %v3799_v44 }
 0x7cc   :  { %2099 = vmatpush.msra.mxu2 %v6504_v42 }
 0x7cd   :  { %2012 = vrot.lane.b32.xlu1 %v2001_v62, %s4480_s7  ;;  %v1903_v62 = vadd.f32 %v5685_v17, %v5681_v57  ;;  %v1510_v57 = vadd.f32 %v5511_v30, %v5543_v14 }
 0x7ce   :  { %2100 = vmatpush.msra.mxu2 %v5268_v15 }
 0x7cf   :  { %2118 = vmatpush.msra.mxu3 %v5289_v55 }
 0x7d0   :  { %2101 = vmatpush.msra.mxu2 %v5318_v19 }
 0x7d1   :  { %2119 = vmatpush.msra.mxu3 %v5315_v61 }
 0x7d2   :  { %2102 = vmatpush.msra.mxu2 %v5348_v29 }
 0x7d3   :  { %2120 = vmatpush.msra.mxu3 %v5345_v13 }
 0x7d4   :  { %2103 = vmatpush.msra.mxu2 %v5375_v63 }
 0x7d5   :  { %2121 = vmatpush.msra.mxu3 %v5396_v53 }
 0x7d6   :  { %2104 = vmatpush.msra.mxu2 %v5401_v11 }
 0x7d7   :  { %2122 = vmatpush.msra.mxu3 %v5404_v21 }
 0x7d8   :  { %2105 = vmatpush.msra.mxu2 %v5423_v8 }
 0x7d9   :  { %2123 = vmatpush.msra.mxu3 %v5440_v43 }
 0x7db   :  { %2124 = vmatpush.msra.mxu3 %v5442_v58 }
 0x7dd   :  { %2125 = vmatpush.msra.mxu3 %v5454_v34 }
 0x825   :  { %v2087_v9 = vpop.permute.xlu2 %2086 }
 0x83f   :  { %v2013_v2 = vpop.permute.xlu1 %2012 }
 0x840   :  { %3824 = vmatmul.msk.bf16.vlgmr.msrb.gmra.mxu2 %vm1554_vm11, %v2013_v2  ;;  %3825 = vmatmul.msk.bf16.vlgmr.msrb.gmra.mxu3 %vm1554_vm11, %v2013_v2 }
 0x850   :  { %3826 = vmatmul.msk.f32.vlgmr.msra.gmra.mxu2 %vm1554_vm11, %v2087_v9  ;;  %3827 = vmatmul.msk.f32.vlgmr.msra.gmra.mxu3 %vm1554_vm11, %v2087_v9 }
 0x8c3   :  { %v5768_v22 = vpop.f32.mrf.mxu2  ;;  %v2079_v31 = vpop.f32.mrf.mxu3 }
 0x8c4   :  { %v5770_v23 = vadd.f32 %v2079_v31, %v1903_v62 }
 0x8cb   :  { %v2068_v49 = vpop.f32.mrf.mxu2  ;;  %v2081_v48 = vpop.f32.mrf.mxu3 }
 0x8d3   :  { %v2107_v50 = vpop.f32.mrf.mxu2  ;;  %v2127_v35 = vpop.f32.mrf.mxu3 }
 0x8d4   :  { %v2130_v10 = vadd.f32 %v2107_v50, %v1463_v28  ;;  %v2131_v54 = vadd.f32 %v2127_v35, %v1510_v57 }
 0x8d6   :  { %v2132_v45 = vsub.f32 0.0, %v2130_v10  ;;  %v2152_v30 = vsub.f32 0.0, %v2131_v54 }
 0x8d8   :  { %v2133_v18 = vmul.f32 1.442695, %v2132_v45  ;;  %v2153_v2 = vmul.f32 1.442695, %v2152_v30 }
 0x8da   :  { %4390 = vpow2.f32 %v2133_v18 }
 0x8e0   :  { %v4391_v40 = vpop.eup %4390 }
 0x8e1   :  { %v2135_v20 = vadd.f32 1.0, %v4391_v40 }
 0x8e3   :  { %4392 = vrcp.f32 %v2135_v20  ;;  %v2147_v60 = vand.u32 2147483648, %v2135_v20  ;;  %v2145_v4 = vand.u32 2147483647, %v2135_v20  ;;  %vm2141_vm14 = vweird.f32 %v2135_v20 }
 0x8e4   :  { %4394 = vtanh.f32 %v2131_v54 }
 0x8e5   :  { %v2148_v52 = vor.u32 1.1754944e-38, %v2147_v60  ;;  %vm2146_vm0 = vcmp.eq.f32.partialorder %v2145_v4, 8.507059e+37  ;;  %4396 = vpow2.f32 %v2153_v2  ;;  %v4165_v60 = vld [vmem:[%s6462_s8 + $0xf4] sm:$0xf0] }
 0x8e9   :  { %v4393_v17 = vpop.eup %4392 }
 0x8ea   :  { %v2137_v33 = vmul.f32 %v4393_v17, %v2135_v20  ;;  %vm2142_vm13 = vweird.f32 %v4393_v17  ;;  %v4395_v26 = vpop.eup %4394 }
 0x8eb   :  { %vm2143_vm15 = vmor %vm2141_vm14, %vm2142_vm13  ;;  %v4397_v9 = vpop.eup %4396 }
 0x8ec   :  { %v2138_v6 = vsub.f32 1.0, %v2137_v33  ;;  %v2155_v62 = vadd.f32 1.0, %v4397_v9  ;;  %v3846_v9 = vld [vmem:[%s6462_s8 + $0xd0] sm:$0xf] }
 0x8ee   :  { %v2139_v37 = vmul.f32 %v4393_v17, %v2138_v6  ;;  %4398 = vrcp.f32 %v2155_v62  ;;  %v2167_v40 = vand.u32 2147483648, %v2155_v62  ;;  %vm2161_vm2 = vweird.f32 %v2155_v62  ;;  %v3862_v6 = vld [vmem:[%s6462_s8 + $0xf0] sm:$0xf] }
 0x8ef   :  { %v2165_v20 = vand.u32 2147483647, %v2155_v62  ;;  %v3863_v4 = vor.u32 %v4165_v60, %v3862_v6 }
 0x8f0   :  { %v2140_v46 = vadd.f32 %v4393_v17, %v2139_v37  ;;  %v2168_v57 = vor.u32 1.1754944e-38, %v2167_v40  ;;  %v4164_v37 = vld [vmem:[%s6462_s8 + $0xf4] sm:$0xf]  ;;  %v3840_v40 = vld [vmem:[%s6462_s8 + $0xc8] sm:$0xf0] }
 0x8f1   :  { %vm2166_vm4 = vcmp.eq.f32.partialorder %v2165_v20, 8.507059e+37  ;;  %2240 = vmatpush.bf16.msrb.mxu2 %v3863_v4 }
 0x8f2   :  { %v2144_v3 = vsel %vm2143_vm15, %v4393_v17, %v2140_v46  ;;  %v3864_v46 = vld [vmem:[%s6462_s8 + $0xf8] sm:$0xf0] }
 0x8f3   :  { %v2149_v51 = vsel %vm2146_vm0, %v2148_v52, %v2144_v3  ;;  %v3854_v52 = vld [vmem:[%s6462_s8 + $0xe0] sm:$0xf]  ;;  %v4163_v3 = vld [vmem:[%s6462_s8 + $0xe4] sm:$0xf0] }
 0x8f4   :  { %v2172_v44 = vmul.f32 %v4395_v26, %v2149_v51  ;;  %v4399_v31 = vpop.eup %4398  ;;  %v2171_v50 = vmul.f32 %v2149_v51, %v5693_v27  ;;  %v3867_v26 = vor.u32 %v4164_v37, %v3864_v46  ;;  %v4162_v51 = vld [vmem:[%s6462_s8 + $0xe4] sm:$0xf]  ;;  %v3855_v30 = vor.u32 %v4163_v3, %v3854_v52 }
 0x8f5   :  { %v2157_v49 = vmul.f32 %v4399_v31, %v2155_v62  ;;  %vm2162_vm1 = vweird.f32 %v4399_v31  ;;  %v4161_v62 = vld [vmem:[%s6462_s8 + $0xd4] sm:$0xf0]  ;;  %v1466_v52 = vadd.f32 %v5513_v32, %v5536_v25 }
 0x8f6   :  { %2174 = vrot.lane.b32.xlu0 %v2172_v44, %s4480_s7  ;;  %vm2163_vm3 = vmor %vm2161_vm2, %vm2162_vm1  ;;  %v3856_v44 = vld [vmem:[%s6462_s8 + $0xe8] sm:$0xf0]  ;;  %2253 = vmatpush.bf16.msrb.mxu3 %v3867_v26 }
 0x8f7   :  { %v2158_v48 = vsub.f32 1.0, %v2157_v49  ;;  %v3859_v2 = vor.u32 %v4162_v51, %v3856_v44  ;;  %v3848_v49 = vld [vmem:[%s6462_s8 + $0xd8] sm:$0xf0]  ;;  %2241 = vmatpush.bf16.msrb.mxu2 %v3855_v30  ;;  %v1513_v30 = vadd.f32 %v5515_v5, %v5543_v14 }
 0x8f9   :  { %v2159_v28 = vmul.f32 %v4399_v31, %v2158_v48  ;;  %v3847_v48 = vor.u32 %v4161_v62, %v3846_v9 }
 0x8fa   :  { %2254 = vmatpush.bf16.msrb.mxu3 %v3859_v2 }
 0x8fb   :  { %v2160_v18 = vadd.f32 %v4399_v31, %v2159_v28  ;;  %2242 = vmatpush.bf16.msrb.mxu2 %v3847_v48 }
 0x8fd   :  { %v2164_v35 = vsel %vm2163_vm3, %v4399_v31, %v2160_v18  ;;  %v4160_v31 = vld [vmem:[%s6462_s8 + $0xd4] sm:$0xf]  ;;  %v4158_v18 = vld [vmem:[%s6462_s8 + $0xc4] sm:$0xf] }
 0x8fe   :  { %v2169_v54 = vsel %vm2166_vm4, %v2168_v57, %v2164_v35  ;;  %v3851_v28 = vor.u32 %v4160_v31, %v3848_v49  ;;  %v3843_v35 = vor.u32 %v4158_v18, %v3840_v40 }
 0x900   :  { %2255 = vmatpush.bf16.msrb.mxu3 %v3851_v28 }
 0x904   :  { %2256 = vmatpush.bf16.msrb.mxu3 %v3843_v35 }
 0x908   :  { %2297 = vmatpush.msra.mxu3 %v5289_v55 }
 0x90a   :  { %2298 = vmatpush.msra.mxu3 %v5315_v61 }
 0x90c   :  { %2299 = vmatpush.msra.mxu3 %v5345_v13 }
 0x90e   :  { %2300 = vmatpush.msra.mxu3 %v5396_v53 }
 0x910   :  { %2301 = vmatpush.msra.mxu3 %v5404_v21 }
 0x912   :  { %2302 = vmatpush.msra.mxu3 %v5440_v43 }
 0x914   :  { %2303 = vmatpush.msra.mxu3 %v5442_v58 }
 0x916   :  { %2304 = vmatpush.msra.mxu3 %v5454_v34 }
 0x968   :  { %v2175_v10 = vpop.permute.xlu0 %2174 }
 0x969   :  { %v5778_v45 = vadd.f32 %v2175_v10, %v2171_v50  ;;  %v3838_v50 = vld [vmem:[%s6462_s8 + $0xc0] sm:$0xf]  ;;  %v4159_v10 = vld [vmem:[%s6462_s8 + $0xc4] sm:$0xf0] }
 0x96a   :  { %v3839_v20 = vor.u32 %v4159_v10, %v3838_v50 }
 0x96b   :  { %4400 = vtanh.f32 %v5778_v45 }
 0x96c   :  { %2243 = vmatpush.bf16.msrb.mxu2 %v3839_v20 }
 0x970   :  { %2277 = vmatpush.msra.mxu2 %v6503_v59 }
 0x971   :  { %v4401_v17 = vpop.eup %4400 }
 0x972   :  { %v2179_v33 = vmul.f32 %v4401_v17, %v2169_v54  ;;  %2278 = vmatpush.msra.mxu2 %v6504_v42  ;;  %v1890_v54 = vadd.f32 %v5683_v12, %v5679_v24 }
 0x974   :  { %2265 = vrot.lane.b32.xlu2 %v2179_v33, %s4480_s7  ;;  %v2180_v27 = vpack.c.bf16 %v2179_v33, %v2179_v33  ;;  %2279 = vmatpush.msra.mxu2 %v5268_v15  ;;  %v2083_v33 = vadd.f32 %v5768_v22, %v1890_v54 }
 0x976   :  { %2191 = vrot.lane.b32.xlu1 %v2180_v27, %s4480_s7  ;;  %2280 = vmatpush.msra.mxu2 %v5318_v19 }
 0x978   :  { %2281 = vmatpush.msra.mxu2 %v5348_v29 }
 0x97a   :  { %2282 = vmatpush.msra.mxu2 %v5375_v63 }
 0x97c   :  { %2283 = vmatpush.msra.mxu2 %v5401_v11 }
 0x97e   :  { %2284 = vmatpush.msra.mxu2 %v5423_v8 }
 0x9ce   :  { %v2266_v17 = vpop.permute.xlu2 %2265 }
 0x9e8   :  { %v2192_v57 = vpop.permute.xlu1 %2191 }
 0x9e9   :  { %3868 = vmatmul.msk.bf16.vlgmr.msrb.gmra.mxu2 %vm1554_vm11, %v2192_v57  ;;  %3869 = vmatmul.msk.bf16.vlgmr.msrb.gmra.mxu3 %vm1554_vm11, %v2192_v57 }
 0x9f9   :  { %3870 = vmatmul.msk.f32.vlgmr.msra.gmra.mxu2 %vm1554_vm11, %v2266_v17  ;;  %3871 = vmatmul.msk.f32.vlgmr.msra.gmra.mxu3 %vm1554_vm11, %v2266_v17 }
 0xa6c   :  { %v2245_v27 = vpop.f32.mrf.mxu2  ;;  %v2258_v6 = vpop.f32.mrf.mxu3 }
 0xa6d   :  { %v5854_v60 = vadd.f32 %v2245_v27, %v2083_v33  ;;  %v5857_v37 = vadd.f32 %v2258_v6, %v5770_v23 }
 0xa74   :  { %v2247_v4 = vpop.f32.mrf.mxu2  ;;  %v2260_v46 = vpop.f32.mrf.mxu3 }
 0xa7c   :  { %v2286_v3 = vpop.f32.mrf.mxu2  ;;  %v2306_v22 = vpop.f32.mrf.mxu3 }
 0xa7d   :  { %v2309_v26 = vadd.f32 %v2286_v3, %v1466_v52  ;;  %v2310_v23 = vadd.f32 %v2306_v22, %v1513_v30  ;;  %v3906_v30 = vld [vmem:[%s6462_s8 + $0x130] sm:$0xf] }
 0xa7f   :  { %v2311_v51 = vsub.f32 0.0, %v2309_v26  ;;  %v2331_v5 = vsub.f32 0.0, %v2310_v23 }
 0xa81   :  { %v2312_v44 = vmul.f32 1.442695, %v2311_v51  ;;  %v2332_v20 = vmul.f32 1.442695, %v2331_v5  ;;  %v4168_v5 = vld [vmem:[%s6462_s8 + $0x114] sm:$0xf] }
 0xa83   :  { %4402 = vpow2.f32 %v2312_v44 }
 0xa89   :  { %v4403_v24 = vpop.eup %4402 }
 0xa8a   :  { %v2314_v12 = vadd.f32 1.0, %v4403_v24 }
 0xa8c   :  { %4404 = vrcp.f32 %v2314_v12  ;;  %v2326_v31 = vand.u32 2147483648, %v2314_v12  ;;  %v2324_v32 = vand.u32 2147483647, %v2314_v12  ;;  %vm2320_vm6 = vweird.f32 %v2314_v12 }
 0xa8d   :  { %4406 = vtanh.f32 %v2310_v23  ;;  %v4172_v23 = vld [vmem:[%s6462_s8 + $0x134] sm:$0xf] }
 0xa8e   :  { %v2327_v28 = vor.u32 1.1754944e-38, %v2326_v31  ;;  %vm2325_vm8 = vcmp.eq.f32.partialorder %v2324_v32, 8.507059e+37  ;;  %4408 = vpow2.f32 %v2332_v20  ;;  %v3898_v31 = vld [vmem:[%s6462_s8 + $0x120] sm:$0xf]  ;;  %v3892_v20 = vld [vmem:[%s6462_s8 + $0x118] sm:$0xf0] }
 0xa92   :  { %v4405_v2 = vpop.eup %4404 }
 0xa93   :  { %v2316_v9 = vmul.f32 %v4405_v2, %v2314_v12  ;;  %vm2321_vm5 = vweird.f32 %v4405_v2  ;;  %v4407_v10 = vpop.eup %4406 }
 0xa94   :  { %vm2322_vm7 = vmor %vm2320_vm6, %vm2321_vm5  ;;  %v4409_v35 = vpop.eup %4408 }
 0xa95   :  { %v2317_v62 = vsub.f32 1.0, %v2316_v9  ;;  %v2334_v57 = vadd.f32 1.0, %v4409_v35 }
 0xa97   :  { %v2318_v49 = vmul.f32 %v4405_v2, %v2317_v62  ;;  %4410 = vrcp.f32 %v2334_v57  ;;  %v2346_v3 = vand.u32 2147483648, %v2334_v57  ;;  %vm2340_vm10 = vweird.f32 %v2334_v57  ;;  %v3908_v62 = vld [vmem:[%s6462_s8 + $0x138] sm:$0xf0] }
 0xa98   :  { %v2344_v26 = vand.u32 2147483647, %v2334_v57  ;;  %v3911_v32 = vor.u32 %v4172_v23, %v3908_v62 }
 0xa99   :  { %v2319_v48 = vadd.f32 %v4405_v2, %v2318_v49  ;;  %v2347_v44 = vor.u32 1.1754944e-38, %v2346_v3  ;;  %v4171_v49 = vld [vmem:[%s6462_s8 + $0x124] sm:$0xf0] }
 0xa9a   :  { %vm2345_vm13 = vcmp.eq.f32.partialorder %v2344_v26, 8.507059e+37  ;;  %2432 = vmatpush.bf16.msrb.mxu3 %v3911_v32 }
 0xa9b   :  { %v2323_v50 = vsel %vm2322_vm7, %v4405_v2, %v2319_v48  ;;  %v4173_v2 = vld [vmem:[%s6462_s8 + $0x134] sm:$0xf0]  ;;  %v4170_v48 = vld [vmem:[%s6462_s8 + $0x124] sm:$0xf] }
 0xa9c   :  { %v2328_v18 = vsel %vm2325_vm8, %v2327_v28, %v2323_v50  ;;  %v3907_v9 = vor.u32 %v4173_v2, %v3906_v30  ;;  %v3900_v28 = vld [vmem:[%s6462_s8 + $0x128] sm:$0xf0]  ;;  %v3899_v50 = vor.u32 %v4171_v49, %v3898_v31 }
 0xa9d   :  { %v2351_v40 = vmul.f32 %v4407_v10, %v2328_v18  ;;  %v4411_v17 = vpop.eup %4410  ;;  %v2350_v6 = vmul.f32 %v2328_v18, %v5778_v45  ;;  %v3903_v10 = vor.u32 %v4170_v48, %v3900_v28  ;;  %v3890_v18 = vld [vmem:[%s6462_s8 + $0x110] sm:$0xf] }
 0xa9e   :  { %v2336_v54 = vmul.f32 %v4411_v17, %v2334_v57  ;;  %vm2341_vm9 = vweird.f32 %v4411_v17  ;;  %2419 = vmatpush.bf16.msrb.mxu2 %v3907_v9  ;;  %v3895_v57 = vor.u32 %v4168_v5, %v3892_v20 }
 0xa9f   :  { %2353 = vrot.lane.b32.xlu0 %v2351_v40, %s4480_s7  ;;  %vm2342_vm12 = vmor %vm2340_vm10, %vm2341_vm9  ;;  %v4169_v40 = vld [vmem:[%s6462_s8 + $0x114] sm:$0xf0]  ;;  %2433 = vmatpush.bf16.msrb.mxu3 %v3903_v10 }
 0xaa0   :  { %v2337_v33 = vsub.f32 1.0, %v2336_v54  ;;  %v3891_v35 = vor.u32 %v4169_v40, %v3890_v18  ;;  %v4167_v54 = vld [vmem:[%s6462_s8 + $0x104] sm:$0xf0] }
 0xaa2   :  { %v2338_v27 = vmul.f32 %v4411_v17, %v2337_v33  ;;  %2420 = vmatpush.bf16.msrb.mxu2 %v3899_v50  ;;  %v4166_v33 = vld [vmem:[%s6462_s8 + $0x104] sm:$0xf] }
 0xaa3   :  { %2434 = vmatpush.bf16.msrb.mxu3 %v3895_v57 }
 0xaa4   :  { %v2339_v52 = vadd.f32 %v4411_v17, %v2338_v27  ;;  %v3884_v27 = vld [vmem:[%s6462_s8 + $0x108] sm:$0xf0] }
 0xaa6   :  { %v2343_v51 = vsel %vm2342_vm12, %v4411_v17, %v2339_v52  ;;  %v3882_v17 = vld [vmem:[%s6462_s8 + $0x100] sm:$0xf]  ;;  %2421 = vmatpush.bf16.msrb.mxu2 %v3891_v35 }
 0xaa7   :  { %v2348_v12 = vsel %vm2345_vm13, %v2347_v44, %v2343_v51 }
 0xb11   :  { %v2354_v4 = vpop.permute.xlu0 %2353 }
 0xb12   :  { %v5865_v46 = vadd.f32 %v2354_v4, %v2350_v6  ;;  %v3883_v6 = vor.u32 %v4167_v54, %v3882_v17  ;;  %v3887_v4 = vor.u32 %v4166_v33, %v3884_v27 }
 0xb14   :  { %4412 = vtanh.f32 %v5865_v46  ;;  %2422 = vmatpush.bf16.msrb.mxu2 %v3883_v6  ;;  %2435 = vmatpush.bf16.msrb.mxu3 %v3887_v4 }
 0xb18   :  { %2456 = vmatpush.msra.mxu2 %v6503_v59  ;;  %2476 = vmatpush.msra.mxu3 %v5289_v55 }
 0xb1a   :  { %v4413_v24 = vpop.eup %4412  ;;  %2457 = vmatpush.msra.mxu2 %v6504_v42  ;;  %2477 = vmatpush.msra.mxu3 %v5315_v61 }
 0xb1b   :  { %v2358_v22 = vmul.f32 %v4413_v24, %v2348_v12 }
 0xb1c   :  { %2458 = vmatpush.msra.mxu2 %v5268_v15  ;;  %2478 = vmatpush.msra.mxu3 %v5345_v13 }
 0xb1d   :  { %2444 = vrot.lane.b32.xlu2 %v2358_v22, %s4480_s7  ;;  %v2359_v45 = vpack.c.bf16 %v2358_v22, %v2358_v22 }
 0xb1e   :  { %2459 = vmatpush.msra.mxu2 %v5318_v19  ;;  %2479 = vmatpush.msra.mxu3 %v5396_v53 }
 0xb1f   :  { %2370 = vrot.lane.b32.xlu1 %v2359_v45, %s4480_s7  ;;  %v1469_v45 = vadd.f32 %v5517_v1, %v5536_v25 }
 0xb20   :  { %2460 = vmatpush.msra.mxu2 %v5348_v29  ;;  %2480 = vmatpush.msra.mxu3 %v5404_v21 }
 0xb22   :  { %2461 = vmatpush.msra.mxu2 %v5375_v63  ;;  %2481 = vmatpush.msra.mxu3 %v5440_v43 }
 0xb24   :  { %2462 = vmatpush.msra.mxu2 %v5401_v11  ;;  %2482 = vmatpush.msra.mxu3 %v5442_v58 }
 0xb26   :  { %2463 = vmatpush.msra.mxu2 %v5423_v8  ;;  %2483 = vmatpush.msra.mxu3 %v5454_v34 }
 0xb77   :  { %v2445_v3 = vpop.permute.xlu2 %2444 }
 0xb91   :  { %v2371_v52 = vpop.permute.xlu1 %2370 }
 0xb92   :  { %3912 = vmatmul.msk.bf16.vlgmr.msrb.gmra.mxu2 %vm1554_vm11, %v2371_v52  ;;  %3913 = vmatmul.msk.bf16.vlgmr.msrb.gmra.mxu3 %vm1554_vm11, %v2371_v52 }
 0xba2   :  { %3914 = vmatmul.msk.f32.vlgmr.msra.gmra.mxu2 %vm1554_vm11, %v2445_v3  ;;  %3915 = vmatmul.msk.f32.vlgmr.msra.gmra.mxu3 %vm1554_vm11, %v2445_v3 }
 0xc15   :  { %v2424_v26 = vpop.f32.mrf.mxu2  ;;  %v2437_v51 = vpop.f32.mrf.mxu3 }
 0xc16   :  { %v5939_v44 = vadd.f32 %v2424_v26, %v5854_v60  ;;  %v5942_v24 = vadd.f32 %v2437_v51, %v5857_v37  ;;  %v1516_v60 = vadd.f32 %v5521_v16, %v5543_v14 }
 0xc1d   :  { %v2426_v12 = vpop.f32.mrf.mxu2  ;;  %v2439_v22 = vpop.f32.mrf.mxu3 }
 0xc25   :  { %v2465_v30 = vpop.f32.mrf.mxu2  ;;  %v2485_v49 = vpop.f32.mrf.mxu3 }
 0xc26   :  { %v2488_v2 = vadd.f32 %v2465_v30, %v1469_v45  ;;  %v2489_v37 = vadd.f32 %v2485_v49, %v1516_v60  ;;  %v4181_v49 = vld [vmem:[%s6462_s8 + $0x174] sm:$0xf0]  ;;  %v4180_v60 = vld [vmem:[%s6462_s8 + $0x174] sm:$0xf] }
 0xc28   :  { %v2490_v23 = vsub.f32 0.0, %v2488_v2  ;;  %v2510_v16 = vsub.f32 0.0, %v2489_v37 }
 0xc2a   :  { %v2491_v9 = vmul.f32 1.442695, %v2490_v23  ;;  %v2511_v17 = vmul.f32 1.442695, %v2510_v16 }
 0xc2c   :  { %4414 = vpow2.f32 %v2491_v9 }
 0xc32   :  { %v4415_v62 = vpop.eup %4414 }
 0xc33   :  { %v2493_v31 = vadd.f32 1.0, %v4415_v62 }
 0xc35   :  { %4416 = vrcp.f32 %v2493_v31  ;;  %v2505_v50 = vand.u32 2147483648, %v2493_v31  ;;  %v2503_v1 = vand.u32 2147483647, %v2493_v31  ;;  %vm2499_vm15 = vweird.f32 %v2493_v31 }
 0xc36   :  { %4418 = vtanh.f32 %v2489_v37  ;;  %v3952_v37 = vld [vmem:[%s6462_s8 + $0x178] sm:$0xf0] }
 0xc37   :  { %v2506_v40 = vor.u32 1.1754944e-38, %v2505_v50  ;;  %vm2504_vm1 = vcmp.eq.f32.partialorder %v2503_v1, 8.507059e+37  ;;  %4420 = vpow2.f32 %v2511_v17  ;;  %v3955_v50 = vor.u32 %v4180_v60, %v3952_v37  ;;  %v3944_v1 = vld [vmem:[%s6462_s8 + $0x168] sm:$0xf0] }
 0xc39   :  { %2611 = vmatpush.bf16.msrb.mxu3 %v3955_v50 }
 0xc3b   :  { %v4417_v32 = vpop.eup %4416 }
 0xc3c   :  { %v2495_v48 = vmul.f32 %v4417_v32, %v2493_v31  ;;  %vm2500_vm14 = vweird.f32 %v4417_v32  ;;  %v4419_v20 = vpop.eup %4418  ;;  %v3950_v31 = vld [vmem:[%s6462_s8 + $0x170] sm:$0xf] }
 0xc3d   :  { %vm2501_vm0 = vmor %vm2499_vm15, %vm2500_vm14  ;;  %v4421_v54 = vpop.eup %4420 }
 0xc3e   :  { %v2496_v28 = vsub.f32 1.0, %v2495_v48  ;;  %v2513_v33 = vadd.f32 1.0, %v4421_v54  ;;  %v3942_v48 = vld [vmem:[%s6462_s8 + $0x160] sm:$0xf] }
 0xc3f   :  { %v3926_v54 = vld [vmem:[%s6462_s8 + $0x140] sm:$0xf] }
 0xc40   :  { %v2497_v10 = vmul.f32 %v4417_v32, %v2496_v28  ;;  %4422 = vrcp.f32 %v2513_v33  ;;  %v2525_v22 = vand.u32 2147483648, %v2513_v33  ;;  %vm2519_vm3 = vweird.f32 %v2513_v33  ;;  %v4179_v28 = vld [vmem:[%s6462_s8 + $0x164] sm:$0xf0] }
 0xc41   :  { %v2523_v45 = vand.u32 2147483647, %v2513_v33 }
 0xc42   :  { %v2498_v18 = vadd.f32 %v4417_v32, %v2497_v10  ;;  %v2526_v2 = vor.u32 1.1754944e-38, %v2525_v22  ;;  %v4178_v10 = vld [vmem:[%s6462_s8 + $0x164] sm:$0xf] }
 0xc43   :  { %vm2524_vm5 = vcmp.eq.f32.partialorder %v2523_v45, 8.507059e+37 }
 0xc44   :  { %v2502_v5 = vsel %vm2501_vm0, %v4417_v32, %v2498_v18  ;;  %v3951_v32 = vor.u32 %v4181_v49, %v3950_v31  ;;  %v3943_v18 = vor.u32 %v4179_v28, %v3942_v48 }
 0xc45   :  { %v2507_v35 = vsel %vm2504_vm1, %v2506_v40, %v2502_v5  ;;  %v3947_v40 = vor.u32 %v4178_v10, %v3944_v1  ;;  %v3934_v5 = vld [vmem:[%s6462_s8 + $0x150] sm:$0xf] }
 0xc46   :  { %v2530_v57 = vmul.f32 %v4419_v20, %v2507_v35  ;;  %v4423_v27 = vpop.eup %4422  ;;  %v2529_v3 = vmul.f32 %v2507_v35, %v5865_v46  ;;  %2598 = vmatpush.bf16.msrb.mxu2 %v3951_v32  ;;  %v4177_v20 = vld [vmem:[%s6462_s8 + $0x154] sm:$0xf0]  ;;  %v4176_v35 = vld [vmem:[%s6462_s8 + $0x154] sm:$0xf] }
 0xc47   :  { %v2515_v6 = vmul.f32 %v4423_v27, %v2513_v33  ;;  %vm2520_vm2 = vweird.f32 %v4423_v27  ;;  %v3935_v16 = vor.u32 %v4177_v20, %v3934_v5  ;;  %2612 = vmatpush.bf16.msrb.mxu3 %v3947_v40  ;;  %v4175_v33 = vld [vmem:[%s6462_s8 + $0x144] sm:$0xf0] }
 0xc48   :  { %2532 = vrot.lane.b32.xlu0 %v2530_v57, %s4480_s7  ;;  %vm2521_vm4 = vmor %vm2519_vm3, %vm2520_vm2  ;;  %v3936_v57 = vld [vmem:[%s6462_s8 + $0x158] sm:$0xf0] }
 0xc49   :  { %v2516_v4 = vsub.f32 1.0, %v2515_v6  ;;  %v3939_v17 = vor.u32 %v4176_v35, %v3936_v57  ;;  %v3928_v6 = vld [vmem:[%s6462_s8 + $0x148] sm:$0xf0] }
 0xc4a   :  { %2599 = vmatpush.bf16.msrb.mxu2 %v3943_v18 }
 0xc4b   :  { %v2517_v52 = vmul.f32 %v4423_v27, %v2516_v4  ;;  %v3927_v4 = vor.u32 %v4175_v33, %v3926_v54  ;;  %2613 = vmatpush.bf16.msrb.mxu3 %v3939_v17 }
 0xc4d   :  { %v2518_v12 = vadd.f32 %v4423_v27, %v2517_v52 }
 0xc4e   :  { %2600 = vmatpush.bf16.msrb.mxu2 %v3935_v16 }
 0xc4f   :  { %v2522_v30 = vsel %vm2521_vm4, %v4423_v27, %v2518_v12  ;;  %v4174_v27 = vld [vmem:[%s6462_s8 + $0x144] sm:$0xf] }
 0xc50   :  { %v2527_v9 = vsel %vm2524_vm5, %v2526_v2, %v2522_v30  ;;  %v3931_v52 = vor.u32 %v4174_v27, %v3928_v6 }
 0xc52   :  { %2601 = vmatpush.bf16.msrb.mxu2 %v3927_v4  ;;  %2614 = vmatpush.bf16.msrb.mxu3 %v3931_v52 }
 0xc56   :  { %2635 = vmatpush.msra.mxu2 %v6503_v59  ;;  %2655 = vmatpush.msra.mxu3 %v5289_v55 }
 0xc58   :  { %2636 = vmatpush.msra.mxu2 %v6504_v42  ;;  %2656 = vmatpush.msra.mxu3 %v5315_v61 }
 0xc5a   :  { %2637 = vmatpush.msra.mxu2 %v5268_v15  ;;  %2657 = vmatpush.msra.mxu3 %v5345_v13 }
 0xc5c   :  { %2638 = vmatpush.msra.mxu2 %v5318_v19  ;;  %2658 = vmatpush.msra.mxu3 %v5396_v53 }
 0xc5e   :  { %2639 = vmatpush.msra.mxu2 %v5348_v29  ;;  %2659 = vmatpush.msra.mxu3 %v5404_v21 }
 0xc60   :  { %2640 = vmatpush.msra.mxu2 %v5375_v63  ;;  %2660 = vmatpush.msra.mxu3 %v5440_v43 }
 0xc62   :  { %2641 = vmatpush.msra.mxu2 %v5401_v11  ;;  %2661 = vmatpush.msra.mxu3 %v5442_v58 }
 0xc64   :  { %2642 = vmatpush.msra.mxu2 %v5423_v8  ;;  %2662 = vmatpush.msra.mxu3 %v5454_v34 }
 0xcba   :  { %v2533_v26 = vpop.permute.xlu0 %2532 }
 0xcbb   :  { %v5950_v51 = vadd.f32 %v2533_v26, %v2529_v3 }
 0xcbd   :  { %4424 = vtanh.f32 %v5950_v51 }
 0xcc3   :  { %v4425_v23 = vpop.eup %4424 }
 0xcc4   :  { %v2537_v62 = vmul.f32 %v4425_v23, %v2527_v9  ;;  %v1472_v9 = vadd.f32 %v5519_v7, %v5536_v25 }
 0xcc6   :  { %2623 = vrot.lane.b32.xlu2 %v2537_v62, %s4480_s7  ;;  %v2538_v46 = vpack.c.bf16 %v2537_v62, %v2537_v62 }
 0xcc8   :  { %2549 = vrot.lane.b32.xlu1 %v2538_v46, %s4480_s7 }
 0xd20   :  { %v2624_v26 = vpop.permute.xlu2 %2623 }
 0xd3a   :  { %v2550_v3 = vpop.permute.xlu1 %2549 }
 0xd3b   :  { %3956 = vmatmul.msk.bf16.vlgmr.msrb.gmra.mxu2 %vm1554_vm11, %v2550_v3  ;;  %3957 = vmatmul.msk.bf16.vlgmr.msrb.gmra.mxu3 %vm1554_vm11, %v2550_v3 }
 0xd4b   :  { %3958 = vmatmul.msk.f32.vlgmr.msra.gmra.mxu2 %vm1554_vm11, %v2624_v26  ;;  %3959 = vmatmul.msk.f32.vlgmr.msra.gmra.mxu3 %vm1554_vm11, %v2624_v26 }
 0xdbe   :  { %v2603_v12 = vpop.f32.mrf.mxu2  ;;  %v2616_v22 = vpop.f32.mrf.mxu3 }
 0xdbf   :  { %v6024_v45 = vadd.f32 %v2603_v12, %v5939_v44  ;;  %v6027_v30 = vadd.f32 %v2616_v22, %v5942_v24  ;;  %v1519_v44 = vadd.f32 %v5525_v36, %v5543_v14 }
 0xdc6   :  { %v2605_v2 = vpop.f32.mrf.mxu2  ;;  %v2618_v23 = vpop.f32.mrf.mxu3 }
 0xdce   :  { %v2644_v62 = vpop.f32.mrf.mxu2  ;;  %v2664_v37 = vpop.f32.mrf.mxu3 }
 0xdcf   :  { %v2667_v46 = vadd.f32 %v2644_v62, %v1472_v9  ;;  %v2668_v24 = vadd.f32 %v2664_v37, %v1519_v44  ;;  %v3996_v44 = vld [vmem:[%s6462_s8 + $0x1b8] sm:$0xf0] }
 0xdd1   :  { %v2669_v31 = vsub.f32 0.0, %v2667_v46  ;;  %v2689_v36 = vsub.f32 0.0, %v2668_v24 }
 0xdd3   :  { %v2670_v49 = vmul.f32 1.442695, %v2669_v31  ;;  %v2690_v16 = vmul.f32 1.442695, %v2689_v36  ;;  %v3970_v36 = vld [vmem:[%s6462_s8 + $0x180] sm:$0xf] }
 0xdd5   :  { %4426 = vpow2.f32 %v2670_v49  ;;  %v3994_v49 = vld [vmem:[%s6462_s8 + $0x1b0] sm:$0xf] }
 0xddb   :  { %v4427_v60 = vpop.eup %4426 }
 0xddc   :  { %v2672_v32 = vadd.f32 1.0, %v4427_v60  ;;  %v4189_v60 = vld [vmem:[%s6462_s8 + $0x1b4] sm:$0xf0] }
 0xddd   :  { %v3995_v37 = vor.u32 %v4189_v60, %v3994_v49 }
 0xdde   :  { %4428 = vrcp.f32 %v2672_v32  ;;  %v2684_v10 = vand.u32 2147483648, %v2672_v32  ;;  %v2682_v7 = vand.u32 2147483647, %v2672_v32  ;;  %vm2678_vm7 = vweird.f32 %v2672_v32 }
 0xddf   :  { %4430 = vtanh.f32 %v2668_v24  ;;  %v4187_v24 = vld [vmem:[%s6462_s8 + $0x1a4] sm:$0xf0]  ;;  %2777 = vmatpush.bf16.msrb.mxu2 %v3995_v37 }
 0xde0   :  { %v2685_v40 = vor.u32 1.1754944e-38, %v2684_v10  ;;  %vm2683_vm9 = vcmp.eq.f32.partialorder %v2682_v7, 8.507059e+37  ;;  %4432 = vpow2.f32 %v2690_v16  ;;  %v3988_v10 = vld [vmem:[%s6462_s8 + $0x1a8] sm:$0xf0]  ;;  %v4183_v16 = vld [vmem:[%s6462_s8 + $0x184] sm:$0xf0] }
 0xde4   :  { %v4429_v48 = vpop.eup %4428 }
 0xde5   :  { %v2674_v28 = vmul.f32 %v4429_v48, %v2672_v32  ;;  %vm2679_vm6 = vweird.f32 %v4429_v48  ;;  %v4431_v20 = vpop.eup %4430  ;;  %v4188_v32 = vld [vmem:[%s6462_s8 + $0x1b4] sm:$0xf] }
 0xde6   :  { %vm2680_vm8 = vmor %vm2678_vm7, %vm2679_vm6  ;;  %v4433_v17 = vpop.eup %4432 }
 0xde7   :  { %v2675_v50 = vsub.f32 1.0, %v2674_v28  ;;  %v2692_v54 = vadd.f32 1.0, %v4433_v17  ;;  %v3999_v28 = vor.u32 %v4188_v32, %v3996_v44  ;;  %v4182_v17 = vld [vmem:[%s6462_s8 + $0x184] sm:$0xf] }
 0xde9   :  { %v2676_v1 = vmul.f32 %v4429_v48, %v2675_v50  ;;  %4434 = vrcp.f32 %v2692_v54  ;;  %v2704_v22 = vand.u32 2147483648, %v2692_v54  ;;  %vm2698_vm12 = vweird.f32 %v2692_v54  ;;  %v4186_v50 = vld [vmem:[%s6462_s8 + $0x1a4] sm:$0xf]  ;;  %2790 = vmatpush.bf16.msrb.mxu3 %v3999_v28 }
 0xdea   :  { %v2702_v2 = vand.u32 2147483647, %v2692_v54  ;;  %v3991_v7 = vor.u32 %v4186_v50, %v3988_v10 }
 0xdeb   :  { %v2677_v18 = vadd.f32 %v4429_v48, %v2676_v1  ;;  %v2705_v9 = vor.u32 1.1754944e-38, %v2704_v22 }
 0xdec   :  { %vm2703_vm14 = vcmp.eq.f32.partialorder %v2702_v2, 8.507059e+37 }
 0xded   :  { %v2681_v5 = vsel %vm2680_vm8, %v4429_v48, %v2677_v18  ;;  %v3986_v48 = vld [vmem:[%s6462_s8 + $0x1a0] sm:$0xf]  ;;  %v3978_v18 = vld [vmem:[%s6462_s8 + $0x190] sm:$0xf]  ;;  %2791 = vmatpush.bf16.msrb.mxu3 %v3991_v7 }
 0xdee   :  { %v2686_v35 = vsel %vm2683_vm9, %v2685_v40, %v2681_v5  ;;  %v3987_v1 = vor.u32 %v4187_v24, %v3986_v48  ;;  %v4185_v40 = vld [vmem:[%s6462_s8 + $0x194] sm:$0xf0]  ;;  %v4184_v5 = vld [vmem:[%s6462_s8 + $0x194] sm:$0xf] }
 0xdef   :  { %v2709_v57 = vmul.f32 %v4431_v20, %v2686_v35  ;;  %v4435_v33 = vpop.eup %4434  ;;  %v2708_v52 = vmul.f32 %v2686_v35, %v5950_v51  ;;  %v3980_v20 = vld [vmem:[%s6462_s8 + $0x198] sm:$0xf0]  ;;  %v3979_v35 = vor.u32 %v4185_v40, %v3978_v18 }
 0xdf0   :  { %v2694_v27 = vmul.f32 %v4435_v33, %v2692_v54  ;;  %vm2699_vm10 = vweird.f32 %v4435_v33  ;;  %2778 = vmatpush.bf16.msrb.mxu2 %v3987_v1  ;;  %v3972_v54 = vld [vmem:[%s6462_s8 + $0x188] sm:$0xf0] }
 0xdf1   :  { %2711 = vrot.lane.b32.xlu0 %v2709_v57, %s4480_s7  ;;  %vm2700_vm13 = vmor %vm2698_vm12, %vm2699_vm10  ;;  %v3983_v57 = vor.u32 %v4184_v5, %v3980_v20 }
 0xdf2   :  { %v2695_v6 = vsub.f32 1.0, %v2694_v27  ;;  %v3975_v27 = vor.u32 %v4182_v17, %v3972_v54 }
 0xdf3   :  { %2792 = vmatpush.bf16.msrb.mxu3 %v3983_v57 }
 0xdf4   :  { %v2696_v4 = vmul.f32 %v4435_v33, %v2695_v6  ;;  %2779 = vmatpush.bf16.msrb.mxu2 %v3979_v35 }
 0xdf6   :  { %v2697_v12 = vadd.f32 %v4435_v33, %v2696_v4 }
 0xdf7   :  { %2793 = vmatpush.bf16.msrb.mxu3 %v3975_v27 }
 0xdf8   :  { %v2701_v23 = vsel %vm2700_vm13, %v4435_v33, %v2697_v12  ;;  %v3971_v33 = vor.u32 %v4183_v16, %v3970_v36 }
 0xdf9   :  { %v2706_v46 = vsel %vm2703_vm14, %v2705_v9, %v2701_v23  ;;  %v1475_v9 = vadd.f32 %v5523_v38, %v5536_v25 }
 0xdfa   :  { %2780 = vmatpush.bf16.msrb.mxu2 %v3971_v33 }
 0xdfb   :  { %2834 = vmatpush.msra.mxu3 %v5289_v55 }
 0xdfd   :  { %2835 = vmatpush.msra.mxu3 %v5315_v61 }
 0xdfe   :  { %2814 = vmatpush.msra.mxu2 %v6503_v59 }
 0xdff   :  { %2836 = vmatpush.msra.mxu3 %v5345_v13 }
 0xe00   :  { %2815 = vmatpush.msra.mxu2 %v6504_v42 }
 0xe01   :  { %2837 = vmatpush.msra.mxu3 %v5396_v53 }
 0xe02   :  { %2816 = vmatpush.msra.mxu2 %v5268_v15 }
 0xe03   :  { %2838 = vmatpush.msra.mxu3 %v5404_v21 }
 0xe04   :  { %2817 = vmatpush.msra.mxu2 %v5318_v19 }
 0xe05   :  { %2839 = vmatpush.msra.mxu3 %v5440_v43 }
 0xe06   :  { %2818 = vmatpush.msra.mxu2 %v5348_v29 }
 0xe07   :  { %2840 = vmatpush.msra.mxu3 %v5442_v58 }
 0xe08   :  { %2819 = vmatpush.msra.mxu2 %v5375_v63 }
 0xe09   :  { %2841 = vmatpush.msra.mxu3 %v5454_v34 }
 0xe0a   :  { %2820 = vmatpush.msra.mxu2 %v5401_v11 }
 0xe0c   :  { %2821 = vmatpush.msra.mxu2 %v5423_v8 }
 0xe63   :  { %v2712_v3 = vpop.permute.xlu0 %2711 }
 0xe64   :  { %v6035_v26 = vadd.f32 %v2712_v3, %v2708_v52 }
 0xe66   :  { %4436 = vtanh.f32 %v6035_v26 }
 0xe6c   :  { %v4437_v62 = vpop.eup %4436 }
 0xe6d   :  { %v2716_v31 = vmul.f32 %v4437_v62, %v2706_v46 }
 0xe6f   :  { %2802 = vrot.lane.b32.xlu2 %v2716_v31, %s4480_s7  ;;  %v2717_v51 = vpack.c.bf16 %v2716_v31, %v2716_v31 }
 0xe71   :  { %2728 = vrot.lane.b32.xlu1 %v2717_v51, %s4480_s7 }
 0xec9   :  { %v2803_v4 = vpop.permute.xlu2 %2802 }
 0xee3   :  { %v2729_v6 = vpop.permute.xlu1 %2728 }
 0xee4   :  { %4000 = vmatmul.msk.bf16.vlgmr.msrb.gmra.mxu2 %vm1554_vm11, %v2729_v6  ;;  %4001 = vmatmul.msk.bf16.vlgmr.msrb.gmra.mxu3 %vm1554_vm11, %v2729_v6 }
 0xef4   :  { %4002 = vmatmul.msk.f32.vlgmr.msra.gmra.mxu2 %vm1554_vm11, %v2803_v4  ;;  %4003 = vmatmul.msk.f32.vlgmr.msra.gmra.mxu3 %vm1554_vm11, %v2803_v4 }
 0xf67   :  { %v2782_v52 = vpop.f32.mrf.mxu2  ;;  %v2795_v3 = vpop.f32.mrf.mxu3 }
 0xf68   :  { %v6109_v12 = vadd.f32 %v2782_v52, %v6024_v45  ;;  %v6112_v22 = vadd.f32 %v2795_v3, %v6027_v30  ;;  %v1522_v45 = vadd.f32 %v5529_v56, %v5543_v14 }
 0xf6f   :  { %v2784_v2 = vpop.f32.mrf.mxu2  ;;  %v2797_v23 = vpop.f32.mrf.mxu3 }
 0xf77   :  { %v2823_v62 = vpop.f32.mrf.mxu2  ;;  %v2843_v32 = vpop.f32.mrf.mxu3 }
 0xf78   :  { %v2846_v46 = vadd.f32 %v2823_v62, %v1475_v9  ;;  %v2847_v30 = vadd.f32 %v2843_v32, %v1522_v45  ;;  %v4030_v32 = vld [vmem:[%s6462_s8 + $0x1e0] sm:$0xf]  ;;  %v4195_v45 = vld [vmem:[%s6462_s8 + $0x1e4] sm:$0xf0] }
 0xf7a   :  { %v2848_v31 = vsub.f32 0.0, %v2846_v46  ;;  %v2868_v56 = vsub.f32 0.0, %v2847_v30  ;;  %v4038_v46 = vld [vmem:[%s6462_s8 + $0x1f0] sm:$0xf] }
 0xf7c   :  { %v2849_v51 = vmul.f32 1.442695, %v2848_v31  ;;  %v2869_v5 = vmul.f32 1.442695, %v2868_v56  ;;  %v4197_v31 = vld [vmem:[%s6462_s8 + $0x1f4] sm:$0xf0] }
 0xf7d   :  { %v4190_v56 = vld [vmem:[%s6462_s8 + $0x1c4] sm:$0xf] }
 0xf7e   :  { %4438 = vpow2.f32 %v2849_v51  ;;  %v4196_v51 = vld [vmem:[%s6462_s8 + $0x1f4] sm:$0xf] }
 0xf84   :  { %v4439_v49 = vpop.eup %4438 }
 0xf85   :  { %v2851_v60 = vadd.f32 1.0, %v4439_v49  ;;  %v4039_v49 = vor.u32 %v4197_v31, %v4038_v46 }
 0xf87   :  { %4440 = vrcp.f32 %v2851_v60  ;;  %v2863_v24 = vand.u32 2147483648, %v2851_v60  ;;  %v2861_v38 = vand.u32 2147483647, %v2851_v60  ;;  %vm2857_vm0 = vweird.f32 %v2851_v60  ;;  %2956 = vmatpush.bf16.msrb.mxu2 %v4039_v49 }
 0xf88   :  { %4442 = vtanh.f32 %v2847_v30  ;;  %v4194_v30 = vld [vmem:[%s6462_s8 + $0x1e4] sm:$0xf] }
 0xf89   :  { %v2864_v10 = vor.u32 1.1754944e-38, %v2863_v24  ;;  %vm2862_vm2 = vcmp.eq.f32.partialorder %v2861_v38, 8.507059e+37  ;;  %4444 = vpow2.f32 %v2869_v5  ;;  %v4193_v38 = vld [vmem:[%s6462_s8 + $0x1d4] sm:$0xf0]  ;;  %v4016_v5 = vld [vmem:[%s6462_s8 + $0x1c8] sm:$0xf0] }
 0xf8d   :  { %v4441_v37 = vpop.eup %4440 }
 0xf8e   :  { %v2853_v44 = vmul.f32 %v4441_v37, %v2851_v60  ;;  %vm2858_vm15 = vweird.f32 %v4441_v37  ;;  %v4443_v7 = vpop.eup %4442  ;;  %v4040_v60 = vld [vmem:[%s6462_s8 + $0x1f8] sm:$0xf0] }
 0xf8f   :  { %vm2859_vm1 = vmor %vm2857_vm0, %vm2858_vm15  ;;  %v4445_v20 = vpop.eup %4444 }
 0xf90   :  { %v2854_v48 = vsub.f32 1.0, %v2853_v44  ;;  %v2871_v35 = vadd.f32 1.0, %v4445_v20  ;;  %v4032_v44 = vld [vmem:[%s6462_s8 + $0x1e8] sm:$0xf0] }
 0xf91   :  { %v4035_v24 = vor.u32 %v4194_v30, %v4032_v44 }
 0xf92   :  { %v2855_v28 = vmul.f32 %v4441_v37, %v2854_v48  ;;  %4446 = vrcp.f32 %v2871_v35  ;;  %v2883_v4 = vand.u32 2147483648, %v2871_v35  ;;  %vm2877_vm4 = vweird.f32 %v2871_v35 }
 0xf93   :  { %v2881_v52 = vand.u32 2147483647, %v2871_v35  ;;  %v4031_v48 = vor.u32 %v4195_v45, %v4030_v32 }
 0xf94   :  { %v2856_v50 = vadd.f32 %v4441_v37, %v2855_v28  ;;  %v2884_v2 = vor.u32 1.1754944e-38, %v2883_v4  ;;  %v4022_v28 = vld [vmem:[%s6462_s8 + $0x1d0] sm:$0xf] }
 0xf95   :  { %vm2882_vm6 = vcmp.eq.f32.partialorder %v2881_v52, 8.507059e+37  ;;  %2957 = vmatpush.bf16.msrb.mxu2 %v4031_v48  ;;  %v1478_v52 = vadd.f32 %v5527_v47, %v5536_v25 }
 0xf96   :  { %v2860_v1 = vsel %vm2859_vm1, %v4441_v37, %v2856_v50  ;;  %v4043_v37 = vor.u32 %v4196_v51, %v4040_v60  ;;  %v4192_v50 = vld [vmem:[%s6462_s8 + $0x1d4] sm:$0xf] }
 0xf97   :  { %v2865_v18 = vsel %vm2862_vm2, %v2864_v10, %v2860_v1  ;;  %v4024_v10 = vld [vmem:[%s6462_s8 + $0x1d8] sm:$0xf0]  ;;  %v4023_v1 = vor.u32 %v4193_v38, %v4022_v28 }
 0xf98   :  { %v2888_v40 = vmul.f32 %v4443_v7, %v2865_v18  ;;  %v4447_v57 = vpop.eup %4446  ;;  %v2887_v54 = vmul.f32 %v2865_v18, %v6035_v26  ;;  %2969 = vmatpush.bf16.msrb.mxu3 %v4043_v37  ;;  %v4027_v7 = vor.u32 %v4192_v50, %v4024_v10  ;;  %v4014_v18 = vld [vmem:[%s6462_s8 + $0x1c0] sm:$0xf] }
 0xf99   :  { %v2873_v36 = vmul.f32 %v4447_v57, %v2871_v35  ;;  %vm2878_vm3 = vweird.f32 %v4447_v57  ;;  %2958 = vmatpush.bf16.msrb.mxu2 %v4023_v1  ;;  %v4019_v35 = vor.u32 %v4190_v56, %v4016_v5 }
 0xf9a   :  { %2890 = vrot.lane.b32.xlu0 %v2888_v40, %s4480_s7  ;;  %vm2879_vm5 = vmor %vm2877_vm4, %vm2878_vm3  ;;  %v4191_v40 = vld [vmem:[%s6462_s8 + $0x1c4] sm:$0xf0] }
 0xf9b   :  { %v2874_v16 = vsub.f32 1.0, %v2873_v36  ;;  %v4015_v20 = vor.u32 %v4191_v40, %v4014_v18 }
 0xf9c   :  { %2970 = vmatpush.bf16.msrb.mxu3 %v4035_v24 }
 0xf9d   :  { %v2875_v17 = vmul.f32 %v4447_v57, %v2874_v16  ;;  %2959 = vmatpush.bf16.msrb.mxu2 %v4015_v20 }
 0xf9f   :  { %v2876_v6 = vadd.f32 %v4447_v57, %v2875_v17 }
 0xfa0   :  { %2971 = vmatpush.bf16.msrb.mxu3 %v4027_v7 }
 0xfa1   :  { %v2880_v3 = vsel %vm2879_vm5, %v4447_v57, %v2876_v6  ;;  %2993 = vmatpush.msra.mxu2 %v6503_v59 }
 0xfa2   :  { %v2885_v9 = vsel %vm2882_vm6, %v2884_v2, %v2880_v3 }
 0xfa3   :  { %2994 = vmatpush.msra.mxu2 %v6504_v42 }
 0xfa4   :  { %2972 = vmatpush.bf16.msrb.mxu3 %v4019_v35 }
 0xfa5   :  { %2995 = vmatpush.msra.mxu2 %v5268_v15 }
 0xfa7   :  { %2996 = vmatpush.msra.mxu2 %v5318_v19 }
 0xfa8   :  { %3013 = vmatpush.msra.mxu3 %v5289_v55 }
 0xfa9   :  { %2997 = vmatpush.msra.mxu2 %v5348_v29 }
 0xfaa   :  { %3014 = vmatpush.msra.mxu3 %v5315_v61 }
 0xfab   :  { %2998 = vmatpush.msra.mxu2 %v5375_v63 }
 0xfac   :  { %3015 = vmatpush.msra.mxu3 %v5345_v13 }
 0xfad   :  { %2999 = vmatpush.msra.mxu2 %v5401_v11 }
 0xfae   :  { %3016 = vmatpush.msra.mxu3 %v5396_v53 }
 0xfaf   :  { %3000 = vmatpush.msra.mxu2 %v5423_v8 }
 0xfb0   :  { %3017 = vmatpush.msra.mxu3 %v5404_v21 }
 0xfb2   :  { %3018 = vmatpush.msra.mxu3 %v5440_v43 }
 0xfb4   :  { %3019 = vmatpush.msra.mxu3 %v5442_v58 }
 0xfb6   :  { %3020 = vmatpush.msra.mxu3 %v5454_v34 }
0x100c   :  { %v2891_v33 = vpop.permute.xlu0 %2890 }
0x100d   :  { %v6120_v27 = vadd.f32 %v2891_v33, %v2887_v54 }
0x100f   :  { %4448 = vtanh.f32 %v6120_v27 }
0x1015   :  { %v4449_v23 = vpop.eup %4448 }
0x1016   :  { %v2895_v62 = vmul.f32 %v4449_v23, %v2885_v9 }
0x1018   :  { %2981 = vrot.lane.b32.xlu2 %v2895_v62, %s4480_s7  ;;  %v2896_v26 = vpack.c.bf16 %v2895_v62, %v2895_v62 }
0x101a   :  { %2907 = vrot.lane.b32.xlu1 %v2896_v26, %s4480_s7 }
0x1072   :  { %v2982_v36 = vpop.permute.xlu2 %2981 }
0x108c   :  { %v2908_v57 = vpop.permute.xlu1 %2907 }
0x108d   :  { %4044 = vmatmul.msk.bf16.vlgmr.msrb.gmra.mxu2 %vm1554_vm11, %v2908_v57  ;;  %4045 = vmatmul.msk.bf16.vlgmr.msrb.gmra.mxu3 %vm1554_vm11, %v2908_v57 }
0x109d   :  { %4046 = vmatmul.msk.f32.vlgmr.msra.gmra.mxu2 %vm1554_vm11, %v2982_v36  ;;  %4047 = vmatmul.msk.f32.vlgmr.msra.gmra.mxu3 %vm1554_vm11, %v2982_v36 }
0x1110   :  { %v2961_v16 = vpop.f32.mrf.mxu2  ;;  %v2974_v17 = vpop.f32.mrf.mxu3 }
0x1111   :  { %v6194_v54 = vadd.f32 %v2961_v16, %v6109_v12  ;;  %v6197_v33 = vadd.f32 %v2974_v17, %v6112_v22  ;;  %v1525_v12 = vadd.f32 %v5539_v0, %v5543_v14 }
0x1118   :  { %v2963_v6 = vpop.f32.mrf.mxu2  ;;  %v2976_v4 = vpop.f32.mrf.mxu3 }
0x1120   :  { %v3002_v3 = vpop.f32.mrf.mxu2  ;;  %v3022_v46 = vpop.f32.mrf.mxu3 }
0x1121   :  { %v3025_v2 = vadd.f32 %v3002_v3, %v1478_v52  ;;  %v3026_v22 = vadd.f32 %v3022_v46, %v1525_v12  ;;  %v4082_v52 = vld [vmem:[%s6462_s8 + $0x230] sm:$0xf]  ;;  %v4205_v3 = vld [vmem:[%s6462_s8 + $0x234] sm:$0xf0]  ;;  %v4202_v12 = vld [vmem:[%s6462_s8 + $0x224] sm:$0xf] }
0x1123   :  { %v3027_v23 = vsub.f32 0.0, %v3025_v2  ;;  %v3047_v0 = vsub.f32 0.0, %v3026_v22  ;;  %v4204_v2 = vld [vmem:[%s6462_s8 + $0x234] sm:$0xf] }
0x1125   :  { %v3028_v9 = vmul.f32 1.442695, %v3027_v23  ;;  %v3048_v28 = vmul.f32 1.442695, %v3047_v0  ;;  %v4083_v23 = vor.u32 %v4205_v3, %v4082_v52  ;;  %v4118_v52 = vld [vmem:[%s6462_s8 + $0x260] sm:$0xf] }
0x1126   :  { %v4211_v3 = vld [vmem:[%s6462_s8 + $0x264] sm:$0xf0] }
0x1127   :  { %4450 = vpow2.f32 %v3028_v9  ;;  %v4084_v9 = vld [vmem:[%s6462_s8 + $0x238] sm:$0xf0]  ;;  %3135 = vmatpush.bf16.msrb.mxu2 %v4083_v23  ;;  %v4210_v23 = vld [vmem:[%s6462_s8 + $0x264] sm:$0xf] }
0x1128   :  { %v4087_v46 = vor.u32 %v4204_v2, %v4084_v9  ;;  %v4120_v9 = vld [vmem:[%s6462_s8 + $0x268] sm:$0xf0] }
0x112a   :  { %3148 = vmatpush.bf16.msrb.mxu3 %v4087_v46  ;;  %v4110_v46 = vld [vmem:[%s6462_s8 + $0x250] sm:$0xf] }
0x112d   :  { %v4451_v62 = vpop.eup %4450 }
0x112e   :  { %v3030_v26 = vadd.f32 1.0, %v4451_v62  ;;  %v4074_v62 = vld [vmem:[%s6462_s8 + $0x220] sm:$0xf] }
0x1130   :  { %4452 = vrcp.f32 %v3030_v26  ;;  %v3042_v60 = vand.u32 2147483648, %v3030_v26  ;;  %v3040_v47 = vand.u32 2147483647, %v3030_v26  ;;  %vm3036_vm8 = vweird.f32 %v3030_v26 }
0x1131   :  { %4454 = vtanh.f32 %v3026_v22 }
0x1132   :  { %v3043_v37 = vor.u32 1.1754944e-38, %v3042_v60  ;;  %vm3041_vm10 = vcmp.eq.f32.partialorder %v3040_v47, 8.507059e+37  ;;  %4456 = vpow2.f32 %v3048_v28  ;;  %v4201_v60 = vld [vmem:[%s6462_s8 + $0x214] sm:$0xf0]  ;;  %v4068_v47 = vld [vmem:[%s6462_s8 + $0x218] sm:$0xf0] }
0x1136   :  { %v4453_v31 = vpop.eup %4452 }
0x1137   :  { %v3032_v51 = vmul.f32 %v4453_v31, %v3030_v26  ;;  %vm3037_vm7 = vweird.f32 %v4453_v31  ;;  %v4455_v44 = vpop.eup %4454  ;;  %v4203_v26 = vld [vmem:[%s6462_s8 + $0x224] sm:$0xf0] }
0x1138   :  { %vm3038_vm9 = vmor %vm3036_vm8, %vm3037_vm7  ;;  %v4457_v38 = vpop.eup %4456  ;;  %v4075_v22 = vor.u32 %v4203_v26, %v4074_v62  ;;  %v4119_v62 = vor.u32 %v4211_v3, %v4118_v52  ;;  %v4123_v26 = vor.u32 %v4210_v23, %v4120_v9  ;;  %v4317_v3 = vld [vmem:[%s6463_s10 + $0x10] sm:$0xff]  }
0x1139   :  { %v3033_v49 = vsub.f32 1.0, %v3032_v51  ;;  %v3050_v50 = vadd.f32 1.0, %v4457_v38 }
0x113a   :  { %3136 = vmatpush.bf16.msrb.mxu2 %v4075_v22  ;;  %v4208_v22 = vld [vmem:[%s6462_s8 + $0x254] sm:$0xf] }
0x113b   :  { %v3034_v32 = vmul.f32 %v4453_v31, %v3033_v49  ;;  %4458 = vrcp.f32 %v3050_v50  ;;  %v3062_v35 = vand.u32 2147483648, %v3050_v50  ;;  %vm3056_vm13 = vweird.f32 %v3050_v50  ;;  %v4066_v49 = vld [vmem:[%s6462_s8 + $0x210] sm:$0xf] }
0x113c   :  { %v3060_v57 = vand.u32 2147483647, %v3050_v50 }
0x113d   :  { %v3035_v45 = vadd.f32 %v4453_v31, %v3034_v32  ;;  %v3063_v16 = vor.u32 1.1754944e-38, %v3062_v35  ;;  %v4200_v32 = vld [vmem:[%s6462_s8 + $0x214] sm:$0xf] }
0x113e   :  { %vm3061_vm15 = vcmp.eq.f32.partialorder %v3060_v57, 8.507059e+37 }
0x113f   :  { %v3039_v30 = vsel %vm3038_vm9, %v4453_v31, %v3035_v45  ;;  %v4076_v31 = vld [vmem:[%s6462_s8 + $0x228] sm:$0xf0]  ;;  %v4067_v45 = vor.u32 %v4201_v60, %v4066_v49 }
0x1140   :  { %v3044_v48 = vsel %vm3041_vm10, %v3043_v37, %v3039_v30  ;;  %v4079_v51 = vor.u32 %v4202_v12, %v4076_v31  ;;  %v4071_v37 = vor.u32 %v4200_v32, %v4068_v47  ;;  %v4058_v30 = vld [vmem:[%s6462_s8 + $0x200] sm:$0xf]  ;;  %v4209_v12 = vld [vmem:[%s6462_s8 + $0x254] sm:$0xf0] }
0x1141   :  { %v3067_v24 = vmul.f32 %v4455_v44, %v3044_v48  ;;  %v4459_v10 = vpop.eup %4458  ;;  %v3066_v40 = vmul.f32 %v3044_v48, %v6120_v27  ;;  %v4199_v44 = vld [vmem:[%s6462_s8 + $0x204] sm:$0xf0]  ;;  %v4198_v48 = vld [vmem:[%s6462_s8 + $0x204] sm:$0xf]  ;;  %3137 = vmatpush.bf16.msrb.mxu2 %v4067_v45  ;;  %v4111_v49 = vor.u32 %v4209_v12, %v4110_v46  ;;  %v4102_v47 = vld [vmem:[%s6462_s8 + $0x240] sm:$0xf] }
0x1142   :  { %v3052_v1 = vmul.f32 %v4459_v10, %v3050_v50  ;;  %vm3057_vm12 = vweird.f32 %v4459_v10  ;;  %3149 = vmatpush.bf16.msrb.mxu3 %v4079_v51  ;;  %v4059_v0 = vor.u32 %v4199_v44, %v4058_v30  ;;  %v4112_v51 = vld [vmem:[%s6462_s8 + $0x258] sm:$0xf0]  ;;  %v4207_v45 = vld [vmem:[%s6462_s8 + $0x244] sm:$0xf0]  ;;  %v4104_v30 = vld [vmem:[%s6462_s8 + $0x248] sm:$0xf0] }
0x1143   :  { %3069 = vrot.lane.b32.xlu0 %v3067_v24, %s4480_s7  ;;  %vm3058_vm14 = vmor %vm3056_vm13, %vm3057_vm12  ;;  %v4060_v24 = vld [vmem:[%s6462_s8 + $0x208] sm:$0xf0]  ;;  %v4115_v32 = vor.u32 %v4208_v22, %v4112_v51  ;;  %v4103_v44 = vor.u32 %v4207_v45, %v4102_v47  ;;  %v4247_v45 = vld [vmem:[%s6463_s10] sm:$0xff]  }
0x1144   :  { %v3053_v7 = vsub.f32 1.0, %v3052_v1  ;;  %v4063_v28 = vor.u32 %v4198_v48, %v4060_v24  ;;  %v4316_v46 = vld [vmem:[%s6463_s10 + $0x8] sm:$0xff]  }
0x1145   :  { %3138 = vmatpush.bf16.msrb.mxu2 %v4059_v0  ;;  %v4324_v12 = vld [vmem:[%s6463_s10 + $0x48] sm:$0xff]   ;;  %v4253_v51 = vunpack.c.h.bf16 %v4316_v46 }
0x1146   :  { %v3054_v18 = vmul.f32 %v4459_v10, %v3053_v7  ;;  %3150 = vmatpush.bf16.msrb.mxu3 %v4071_v37  ;;  %v4206_v37 = vld [vmem:[%s6462_s8 + $0x244] sm:$0xf]  ;;  %v4284_v47 = vunpack.c.l.bf16 %v4324_v12 }
0x1147   :  { %v4107_v24 = vor.u32 %v4206_v37, %v4104_v30  ;;  %v4323_v37 = vld [vmem:[%s6463_s10 + $0x40] sm:$0xff]   ;;  %v4249_v30 = vunpack.c.h.bf16 %v4247_v45 }
0x1148   :  { %v3055_v20 = vadd.f32 %v4459_v10, %v3054_v18 }
0x1149   :  { %3172 = vmatpush.msra.mxu2 %v6503_v59 }
0x114a   :  { %v3059_v36 = vsel %vm3058_vm14, %v4459_v10, %v3055_v20  ;;  %3151 = vmatpush.bf16.msrb.mxu3 %v4063_v28 }
0x114b   :  { %v3064_v6 = vsel %vm3061_vm15, %v3063_v16, %v3059_v36  ;;  %3173 = vmatpush.msra.mxu2 %v6504_v42  ;;  %v4126_v16 = vld [vmem:[%s6462_s8 + $0x270] sm:$0xf] }
0x114d   :  { %3174 = vmatpush.msra.mxu2 %v5268_v15 }
0x114e   :  { %3192 = vmatpush.msra.mxu3 %v5289_v55 }
0x114f   :  { %3175 = vmatpush.msra.mxu2 %v5318_v19 }
0x1150   :  { %3193 = vmatpush.msra.mxu3 %v5315_v61 }
0x1151   :  { %3176 = vmatpush.msra.mxu2 %v5348_v29 }
0x1152   :  { %3194 = vmatpush.msra.mxu3 %v5345_v13 }
0x1153   :  { %3177 = vmatpush.msra.mxu2 %v5375_v63 }
0x1154   :  { %3195 = vmatpush.msra.mxu3 %v5396_v53 }
0x1155   :  { %3178 = vmatpush.msra.mxu2 %v5401_v11  ;;  %v1481_v11 = vadd.f32 %v5534_v41, %v5536_v25 }
0x1156   :  { %3196 = vmatpush.msra.mxu3 %v5404_v21 }
0x1157   :  { %3179 = vmatpush.msra.mxu2 %v5423_v8 }
0x1158   :  { %3197 = vmatpush.msra.mxu3 %v5440_v43 }
0x115a   :  { %3198 = vmatpush.msra.mxu3 %v5442_v58 }
0x115c   :  { %3199 = vmatpush.msra.mxu3 %v5454_v34 }
0x11b5   :  { %v3070_v56 = vpop.permute.xlu0 %3069 }
0x11b6   :  { %v6205_v5 = vadd.f32 %v3070_v56, %v3066_v40 }
0x11b8   :  { %4460 = vtanh.f32 %v6205_v5 }
0x11be   :  { %v4461_v17 = vpop.eup %4460 }
0x11bf   :  { %v3074_v4 = vmul.f32 %v4461_v17, %v3064_v6  ;;  %v4213_v17 = vld [vmem:[%s6462_s8 + $0x274] sm:$0xf0]  ;;  %v4212_v6 = vld [vmem:[%s6462_s8 + $0x274] sm:$0xf] }
0x11c1   :  { %3160 = vrot.lane.b32.xlu2 %v3074_v4, %s4480_s7  ;;  %v3075_v27 = vpack.c.bf16 %v3074_v4, %v3074_v4  ;;  %v4127_v4 = vor.u32 %v4213_v17, %v4126_v16  ;;  %v4318_v16 = vld [vmem:[%s6463_s10 + $0x18] sm:$0xff]  }
0x11c2   :  { %v4326_v17 = vld [vmem:[%s6463_s10 + $0x58] sm:$0xff]   ;;  %v4260_v23 = vunpack.c.l.bf16 %v4318_v16 }
0x11c3   :  { %3086 = vrot.lane.b32.xlu1 %v3075_v27, %s4480_s7  ;;  %v4128_v27 = vld [vmem:[%s6462_s8 + $0x278] sm:$0xf0]  ;;  %v4293_v52 = vunpack.c.h.bf16 %v4326_v17  ;;  %v4292_v9 = vunpack.c.l.bf16 %v4326_v17 }
0x11c4   :  { %v4131_v2 = vor.u32 %v4212_v6, %v4128_v27  ;;  %v4261_v27 = vunpack.c.h.bf16 %v4318_v16 }
0x121b   :  { %v3161_v55 = vpop.permute.xlu2 %3160 }
0x1235   :  { %v3087_v15 = vpop.permute.xlu1 %3086 }
0x1236   :  { %4088 = vmatmul.msk.bf16.vlgmr.msrb.gmra.mxu2 %vm1554_vm11, %v3087_v15  ;;  %4089 = vmatmul.msk.bf16.vlgmr.msrb.gmra.mxu3 %vm1554_vm11, %v3087_v15 }
0x1237   :  { %3314 = vmatpush.bf16.msrb.mxu2 %v4127_v4  ;;  %3327 = vmatpush.bf16.msrb.mxu3 %v4131_v2  ;;  %v4325_v2 = vld [vmem:[%s6463_s10 + $0x50] sm:$0xff]  }
0x1238   :  { %v4288_v22 = vunpack.c.l.bf16 %v4325_v2 }
0x123b   :  { %3315 = vmatpush.bf16.msrb.mxu2 %v4119_v62  ;;  %3328 = vmatpush.bf16.msrb.mxu3 %v4123_v26  ;;  %v4257_v62 = vunpack.c.h.bf16 %v4317_v3  ;;  %v4289_v26 = vunpack.c.h.bf16 %v4325_v2 }
0x123f   :  { %3316 = vmatpush.bf16.msrb.mxu2 %v4111_v49  ;;  %3329 = vmatpush.bf16.msrb.mxu3 %v4115_v32  ;;  %v4285_v49 = vunpack.c.h.bf16 %v4324_v12  ;;  %v4252_v32 = vunpack.c.l.bf16 %v4316_v46 }
0x1243   :  { %3317 = vmatpush.bf16.msrb.mxu2 %v4103_v44  ;;  %3330 = vmatpush.bf16.msrb.mxu3 %v4107_v24  ;;  %v4281_v44 = vunpack.c.h.bf16 %v4323_v37  ;;  %v4280_v24 = vunpack.c.l.bf16 %v4323_v37 }
0x1246   :  { %4090 = vmatmul.msk.f32.vlgmr.msra.gmra.mxu2 %vm1554_vm11, %v3161_v55  ;;  %4091 = vmatmul.msk.f32.vlgmr.msra.gmra.mxu3 %vm1554_vm11, %v3161_v55 }
0x12b9   :  { %v3140_v61 = vpop.f32.mrf.mxu2  ;;  %v3153_v19 = vpop.f32.mrf.mxu3 }
0x12ba   :  { %v6279_v13 = vadd.f32 %v3140_v61, %v6194_v54  ;;  %v6282_v29 = vadd.f32 %v3153_v19, %v6197_v33  ;;  %v1528_v54 = vadd.f32 %v5541_v39, %v5543_v14 }
0x12c1   :  { %v3142_v63 = vpop.f32.mrf.mxu2  ;;  %v3155_v53 = vpop.f32.mrf.mxu3 }
0x12c9   :  { %v3181_v21 = vpop.f32.mrf.mxu2  ;;  %v3201_v34 = vpop.f32.mrf.mxu3 }
0x12ca   :  { %v3204_v8 = vadd.f32 %v3181_v21, %v1481_v11  ;;  %v3205_v33 = vadd.f32 %v3201_v34, %v1528_v54 }
0x12cc   :  { %v3206_v59 = vsub.f32 0.0, %v3204_v8  ;;  %v3226_v39 = vsub.f32 0.0, %v3205_v33 }
0x12ce   :  { %v3207_v42 = vmul.f32 1.442695, %v3206_v59  ;;  %v3227_v14 = vmul.f32 1.442695, %v3226_v39 }
0x12d0   :  { %4462 = vpow2.f32 %v3207_v42 }
0x12d6   :  { %v4463_v43 = vpop.eup %4462 }
0x12d7   :  { %v3209_v58 = vadd.f32 1.0, %v4463_v43  ;;  %v4330_v43 = vld [vmem:[%s6463_s10 + $0x78] sm:$0xff]  }
0x12d8   :  { %v4309_v54 = vunpack.c.h.bf16 %v4330_v43 }
0x12d9   :  { %4464 = vrcp.f32 %v3209_v58  ;;  %v3221_v1 = vand.u32 2147483648, %v3209_v58  ;;  %v3219_v41 = vand.u32 2147483647, %v3209_v58  ;;  %vm3215_vm1 = vweird.f32 %v3209_v58 }
0x12da   :  { %4466 = vtanh.f32 %v3205_v33  ;;  %v4308_v33 = vunpack.c.l.bf16 %v4330_v43  ;;  %3434 = vmatpush.msra.mxu3 %v4309_v54 }
0x12db   :  { %v3222_v18 = vor.u32 1.1754944e-38, %v3221_v1  ;;  %vm3220_vm3 = vcmp.eq.f32.partialorder %v3219_v41, 8.507059e+37  ;;  %4468 = vpow2.f32 %v3227_v14  ;;  %v4328_v41 = vld [vmem:[%s6463_s10 + $0x68] sm:$0xff]  }
0x12dc   :  { %3435 = vmatpush.msra.mxu3 %v4308_v33  ;;  %v4300_v14 = vunpack.c.l.bf16 %v4328_v41 }
0x12df   :  { %v4465_v38 = vpop.eup %4464 }
0x12e0   :  { %v3211_v50 = vmul.f32 %v4465_v38, %v3209_v58  ;;  %vm3216_vm0 = vweird.f32 %v4465_v38  ;;  %v4467_v56 = vpop.eup %4466  ;;  %v4321_v58 = vld [vmem:[%s6463_s10 + $0x30] sm:$0xff]  }
0x12e1   :  { %vm3217_vm2 = vmor %vm3215_vm1, %vm3216_vm0  ;;  %v4469_v57 = vpop.eup %4468 }
0x12e2   :  { %v3212_v10 = vsub.f32 1.0, %v3211_v50  ;;  %v3229_v36 = vadd.f32 1.0, %v4469_v57  ;;  %v4329_v50 = vld [vmem:[%s6463_s10 + $0x70] sm:$0xff]  }
0x12e3   :  { %v4305_v1 = vunpack.c.h.bf16 %v4329_v50 }
0x12e4   :  { %v3213_v7 = vmul.f32 %v4465_v38, %v3212_v10  ;;  %4470 = vrcp.f32 %v3229_v36  ;;  %v3241_v19 = vand.u32 2147483648, %v3229_v36  ;;  %vm3235_vm5 = vweird.f32 %v3229_v36 }
0x12e5   :  { %v3239_v63 = vand.u32 2147483647, %v3229_v36  ;;  %v4273_v10 = vunpack.c.h.bf16 %v4321_v58  ;;  %3436 = vmatpush.msra.mxu3 %v4305_v1 }
0x12e6   :  { %v3214_v25 = vadd.f32 %v4465_v38, %v3213_v7  ;;  %v3242_v11 = vor.u32 1.1754944e-38, %v3241_v19  ;;  %v4320_v7 = vld [vmem:[%s6463_s10 + $0x28] sm:$0xff]   ;;  %v3464_v19 = vld [vmem:[%s6465_s12 + $0x50] sm:$0xff] }
0x12e7   :  { %vm3240_vm7 = vcmp.eq.f32.partialorder %v3239_v63, 8.507059e+37  ;;  %v4268_v39 = vunpack.c.l.bf16 %v4320_v7  ;;  %v3463_v63 = vld [vmem:[%s6465_s12 + $0x48] sm:$0xff] }
0x12e8   :  { %v3218_v40 = vsel %vm3217_vm2, %v4465_v38, %v3214_v25  ;;  %v4272_v25 = vunpack.c.l.bf16 %v4321_v58 }
0x12e9   :  { %v3223_v20 = vsel %vm3220_vm3, %v3222_v18, %v3218_v40  ;;  %v4304_v18 = vunpack.c.l.bf16 %v4329_v50  ;;  %v4269_v40 = vunpack.c.h.bf16 %v4320_v7 }
0x12ea   :  { %v3246_v35 = vmul.f32 %v4467_v56, %v3223_v20  ;;  %v4471_v31 = vpop.eup %4470  ;;  %v3245_v28 = vmul.f32 %v3223_v20, %v6205_v5  ;;  %v4322_v5 = vld [vmem:[%s6463_s10 + $0x38] sm:$0xff]   ;;  %v4301_v56 = vunpack.c.h.bf16 %v4328_v41  ;;  %v4319_v20 = vld [vmem:[%s6463_s10 + $0x20] sm:$0xff]   ;;  %v3456_v41 = vld [vmem:[%s6465_s12 + $0x10] sm:$0xff] }
0x12eb   :  { %v3231_v60 = vmul.f32 %v4471_v31, %v3229_v36  ;;  %vm3236_vm4 = vweird.f32 %v4471_v31  ;;  %v4277_v34 = vunpack.c.h.bf16 %v4322_v5  ;;  %v4276_v38 = vunpack.c.l.bf16 %v4322_v5  ;;  %3437 = vmatpush.msra.mxu3 %v4304_v18  ;;  %v3457_v5 = vld [vmem:[%s6465_s12 + $0x18] sm:$0xff] }
0x12ec   :  { %3248 = vrot.lane.b32.xlu0 %v3246_v35, %s4480_s7  ;;  %vm3237_vm6 = vmor %vm3235_vm5, %vm3236_vm4  ;;  %v4327_v35 = vld [vmem:[%s6463_s10 + $0x60] sm:$0xff]   ;;  %v4265_v57 = vunpack.c.h.bf16 %v4319_v20  ;;  %v4264_v6 = vunpack.c.l.bf16 %v4319_v20 }
0x12ed   :  { %v3232_v48 = vsub.f32 1.0, %v3231_v60  ;;  %3414 = vmatpush.msra.mxu2 %v4277_v34  ;;  %3438 = vmatpush.msra.mxu3 %v4301_v56  ;;  %v4297_v36 = vunpack.c.h.bf16 %v4327_v35  ;;  %v4296_v4 = vunpack.c.l.bf16 %v4327_v35  ;;  %v4353_v35 = vld [vmem:[%s6467_s13] ss:$0 sm:$0xff] }
0x12ef   :  { %v3233_v0 = vmul.f32 %v4471_v31, %v3232_v48  ;;  %3415 = vmatpush.msra.mxu2 %v4276_v38  ;;  %3439 = vmatpush.msra.mxu3 %v4300_v14  ;;  %v4248_v48 = vunpack.c.l.bf16 %v4247_v45 }
0x12f1   :  { %v3234_v61 = vadd.f32 %v4471_v31, %v3233_v0  ;;  %3416 = vmatpush.msra.mxu2 %v4273_v10  ;;  %3440 = vmatpush.msra.mxu3 %v4297_v36  ;;  %v3469_v0 = vld [vmem:[%s6465_s12 + $0x78] sm:$0xff] }
0x12f3   :  { %v3238_v53 = vsel %vm3237_vm6, %v4471_v31, %v3234_v61  ;;  %3417 = vmatpush.msra.mxu2 %v4272_v25  ;;  %3441 = vmatpush.msra.mxu3 %v4296_v4  ;;  %v4256_v31 = vunpack.c.l.bf16 %v4317_v3  ;;  %v3465_v61 = vld [vmem:[%s6465_s12 + $0x58] sm:$0xff]  ;;  %v3455_v25 = vld [vmem:[%s6465_s12 + $0x8] sm:$0xff] }
0x12f4   :  { %v3243_v8 = vsel %vm3240_vm7, %v3242_v11, %v3238_v53  ;;  %v3462_v53 = vld [vmem:[%s6465_s12 + $0x40] sm:$0xff]  ;;  %v3461_v11 = vld [vmem:[%s6465_s12 + $0x38] sm:$0xff] }
0x12f5   :  { %3418 = vmatpush.msra.mxu2 %v4269_v40  ;;  %3442 = vmatpush.msra.mxu3 %v4293_v52 }
0x12f7   :  { %3419 = vmatpush.msra.mxu2 %v4268_v39  ;;  %3443 = vmatpush.msra.mxu3 %v4292_v9 }
0x12f9   :  { %3420 = vmatpush.msra.mxu2 %v4265_v57  ;;  %3444 = vmatpush.msra.mxu3 %v4289_v26 }
0x12fb   :  { %3421 = vmatpush.msra.mxu2 %v4264_v6  ;;  %3445 = vmatpush.msra.mxu3 %v4288_v22 }
0x12fd   :  { %3422 = vmatpush.msra.mxu2 %v4261_v27  ;;  %3446 = vmatpush.msra.mxu3 %v4285_v49 }
0x12ff   :  { %3423 = vmatpush.msra.mxu2 %v4260_v23  ;;  %3447 = vmatpush.msra.mxu3 %v4284_v47 }
0x1301   :  { %3424 = vmatpush.msra.mxu2 %v4257_v62  ;;  %3448 = vmatpush.msra.mxu3 %v4281_v44 }
0x1303   :  { %3425 = vmatpush.msra.mxu2 %v4256_v31  ;;  %3449 = vmatpush.msra.mxu3 %v4280_v24 }
0x1305   :  { %3426 = vmatpush.msra.mxu2 %v4253_v51 }
0x1307   :  { %3427 = vmatpush.msra.mxu2 %v4252_v32 }
0x1309   :  { %3428 = vmatpush.msra.mxu2 %v4249_v30 }
0x130b   :  { %3429 = vmatpush.msra.mxu2 %v4248_v48 }
0x135e   :  { %v3249_v15 = vpop.permute.xlu0 %3248 }
0x135f   :  { %v3251_v55 = vadd.f32 %v3249_v15, %v3245_v28  ;;  %v3468_v28 = vld [vmem:[%s6465_s12 + $0x70] sm:$0xff]  ;;  %v3467_v15 = vld [vmem:[%s6465_s12 + $0x68] sm:$0xff] }
0x1361   :  { %4472 = vtanh.f32 %v3251_v55  ;;  %v3466_v55 = vld [vmem:[%s6465_s12 + $0x60] sm:$0xff] }
0x1367   :  { %v4473_v21 = vpop.eup %4472 }
0x1368   :  { %v3253_v59 = vmul.f32 %v4473_v21, %v3243_v8  ;;  %v3460_v21 = vld [vmem:[%s6465_s12 + $0x30] sm:$0xff]  ;;  %v3459_v8 = vld [vmem:[%s6465_s12 + $0x28] sm:$0xff] }
0x136a   :  { %v3254_v42 = vpack.c.bf16 %v3253_v59, %v3253_v59  ;;  %v3338_v59 = vld [vmem:[%s6466_s9] sm:$0x3] }
0x136b   :  { %v3340_v43 = vperm.slane %v3338_v59, 0  ;;  %v3341_v58 = vperm.slane %v3338_v59, 1 }
0x136c   :  { %3265 = vrot.lane.b32.xlu1 %v3254_v42, %s4480_s7  ;;  %v3458_v42 = vld [vmem:[%s6465_s12 + $0x20] sm:$0xff] }
0x13de   :  { %v3266_v60 = vpop.permute.xlu1 %3265 }
0x13df   :  { %4132 = vmatmul.msk.bf16.vlgmr.msrb.gmra.mxu2 %vm1554_vm11, %v3266_v60  ;;  %4133 = vmatmul.msk.bf16.vlgmr.msrb.gmra.mxu3 %vm1554_vm11, %v3266_v60  ;;  %vm3494_vm11 = vcmask 15360  }
0x13e0   :  { %3474 = vmatpush.msrb.mxu2 %v3469_v0 }
0x13e2   :  { %3475 = vmatpush.msrb.mxu2 %v3468_v28 }
0x13e4   :  { %3476 = vmatpush.msrb.mxu2 %v3467_v15 }
0x13e6   :  { %3477 = vmatpush.msrb.mxu2 %v3466_v55 }
0x13e8   :  { %3478 = vmatpush.msrb.mxu2 %v3465_v61 }
0x13ea   :  { %3479 = vmatpush.msrb.mxu2 %v3464_v19 }
0x13ec   :  { %3480 = vmatpush.msrb.mxu2 %v3463_v63 }
0x13ee   :  { %3481 = vmatpush.msrb.mxu2 %v3462_v53 }
0x13f0   :  { %3482 = vmatpush.msrb.mxu2 %v3461_v11 }
0x13f2   :  { %3483 = vmatpush.msrb.mxu2 %v3460_v21 }
0x13f4   :  { %3484 = vmatpush.msrb.mxu2 %v3459_v8 }
0x13f6   :  { %3485 = vmatpush.msrb.mxu2 %v3458_v42 }
0x13f8   :  { %3486 = vmatpush.msrb.mxu2 %v3457_v5 }
0x13fa   :  { %3487 = vmatpush.msrb.mxu2 %v3456_v41 }
0x13fc   :  { %3488 = vmatpush.msrb.mxu2 %v3455_v25 }
0x1462   :  { %v3319_v34 = vpop.f32.mrf.mxu2  ;;  %v3332_v54 = vpop.f32.mrf.mxu3 }
0x1463   :  { %v3336_v38 = vadd.f32 %v3319_v34, %v6279_v13  ;;  %v3337_v33 = vadd.f32 %v3332_v54, %v6282_v29  ;;  %v3454_v13 = vld [vmem:[%s6465_s12] sm:$0xff] }
0x1464   :  { %3489 = vmatpush.msrb.mxu2 %v3454_v13  ;;  %v4352_v29 = vld [vmem:[%s6464_s11] ss:$0 sm:$0xff] }
0x1465   :  { %v3344_v50 = vadd.f32 %v3340_v43, %v3336_v38  ;;  %v3345_v10 = vadd.f32 %v3341_v58, %v3337_v33 }
0x1467   :  { %3430 = vmatmul.f32.vlgmr.msra.gmra.mxu2 %v3344_v50  ;;  %3450 = vmatmul.f32.vlgmr.msra.gmra.mxu3 %v3345_v10 }
0x146a   :  { %v3321_v1 = vpop.f32.mrf.mxu2  ;;  %v3334_v7 = vpop.f32.mrf.mxu3 }
0x14ea   :  { %v3431_v18 = vpop.f32.mrf.mxu2  ;;  %v3451_v56 = vpop.f32.mrf.mxu3 }
0x14eb   :  { %v3432_v40 = vadd.f32 %v4352_v29, %v3431_v18 }
0x14ed   :  { %v3452_v20 = vadd.f32 %v3451_v56, %v3432_v40 }
0x14ef   :  { %3490 = vmatmul.f32.vlgmr.msrb.gmra.mxu2 %v3452_v20 }
0x1572   :  { %v3491_v39 = vpop.f32.mrf.mxu2 }
0x1573   :  { %v3492_v14 = vadd.f32 %v4353_v35, %v3491_v39 }
0x1575   :  { %v3495_v57 = vsel %vm3494_vm11, %v3492_v14, -inf }
0x1576   :  { %3496 = vmax.xlane.f32.xlu2 %v3495_v57 }
0x15e9   :  { %v3497_v36 = vpop.xlane.xlu2 %3496 }
0x15ea   :  { %v3498_v16 = vsub.f32 %v3492_v14, %v3497_v36 }
0x15ec   :  { %v3499_v17 = vmul.f32 1.442695, %v3498_v16 }
0x15ee   :  { %4474 = vpow2.f32 %v3499_v17 }
0x15f4   :  { %v4475_v6 = vpop.eup %4474 }
0x15f5   :  { %v3501_v4 = vsel %vm3494_vm11, %v4475_v6, 0.0 }
0x15f6   :  { %3502 = vadd.xlane.f32.xlu0 %v3501_v4 }
0x1669   :  { %v3503_v27 = vpop.xlane.xlu0 %3502 }
0x166a   :  { %4476 = vrcp.f32 %v3503_v27  ;;  %v3515_v23 = vand.u32 2147483648, %v3503_v27  ;;  %v3513_v62 = vand.u32 2147483647, %v3503_v27  ;;  %vm3509_vm9 = vweird.f32 %v3503_v27 }
0x166c   :  { %v3516_v46 = vor.u32 1.1754944e-38, %v3515_v23  ;;  %vm3514_vm12 = vcmp.eq.f32.partialorder %v3513_v62, 8.507059e+37 }
0x1670   :  { %v4477_v52 = vpop.eup %4476 }
0x1671   :  { %v3505_v3 = vmul.f32 %v4477_v52, %v3503_v27  ;;  %vm3510_vm8 = vweird.f32 %v4477_v52 }
0x1672   :  { %vm3511_vm10 = vmor %vm3509_vm9, %vm3510_vm8 }
0x1673   :  { %v3506_v2 = vsub.f32 1.0, %v3505_v3 }
0x1675   :  { %v3507_v9 = vmul.f32 %v4477_v52, %v3506_v2 }
0x1677   :  { %v3508_v26 = vadd.f32 %v4477_v52, %v3507_v9 }
0x1679   :  { %v3512_v12 = vsel %vm3511_vm10, %v4477_v52, %v3508_v26 }
0x167a   :  { %v3517_v31 = vsel %vm3514_vm12, %v3516_v46, %v3512_v12 }
0x167b   :  { %v3518_v22 = vmul.f32 %v4475_v6, %v3517_v31 }
0x167d   :  { %3519 = vst.msk [vmem:[%s6468_s14] sm:$0xff] %vm3494_vm11, %v3518_v22 }

</bundles_post_ra>
